<compile_context>
chip_gen: v7x
topology: tpu7x:2x2x1
jax: 0.10.0
libtpu: 0.0.40
codegen_flags: <defaults>
</compile_context>

<pallas_src>
import jax
import jax.numpy as jnp
from jax.experimental import pallas as pl
from jax.experimental.pallas import tpu as pltpu

H = W = 14
HW = H * W
CIN = 128
CCONV = 32
C140, C147, C161 = 256, 32, 32
CTOT = C140 + C147 + CCONV + C161  # 352
EPS = 1e-5
PADL = W + 1  # 15 = max |flat lane shift| of a 3x3 tap


def fused_kernel(x153_ref, w_ref, gb_ref, x147_ref, x161_ref, x140_hbm,
                 out_ref, x140_vmem, x140_sem):
    # Kick off the big (256,196) x140 transfer immediately so it overlaps the
    # conv; it is only consumed by the very last BN write.
    x140_cp = pltpu.make_async_copy(x140_hbm, x140_vmem, x140_sem)
    x140_cp.start()

    # ---------------- 3x3 conv (pad=1, stride=1, no bias) -------------------
    x = x153_ref[...]                                    # (CIN, HW) f32
    zpad = jnp.zeros((CIN, PADL), dtype=x.dtype)
    xbig = jnp.concatenate([zpad, x, zpad], axis=1)      # (CIN, HW + 2*PADL)

    # A tap (dy,dx) is a static lane shift of (dy-1)*W+(dx-1) on the flat HW
    # axis of the zero-extended copy.  Row-wrap at the left/right image edges
    # is fixed AFTER the matmuls with one mask per dx group (masks depend only
    # on the output column, so they commute with the channel contraction).
    acc_c = jnp.zeros((CCONV, HW), dtype=jnp.float32)    # dx == 1 (center)
    acc_l = jnp.zeros((CCONV, HW), dtype=jnp.float32)    # dx == 0 (reads x-1)
    acc_r = jnp.zeros((CCONV, HW), dtype=jnp.float32)    # dx == 2 (reads x+1)
    for dy in range(3):
        for dx in range(3):
            t = dy * 3 + dx
            start = PADL + (dy - 1) * W + (dx - 1)       # static, in [0, 30]
            shifted = xbig[:, start:start + HW]          # (CIN, HW)
            prod = jnp.dot(w_ref[t], shifted,
                           preferred_element_type=jnp.float32)  # (CCONV, HW)
            if dx == 0:
                acc_l = acc_l + prod
            elif dx == 2:
                acc_r = acc_r + prod
            else:
                acc_c = acc_c + prod

    xpos = jax.lax.broadcasted_iota(jnp.int32, (1, HW), 1) % W
    not_left_edge = xpos >= 1        # dx == 0 taps are invalid at x == 0
    not_right_edge = xpos <= W - 2   # dx == 2 taps are invalid at x == W-1
    conv = (acc_c
            + jnp.where(not_left_edge, acc_l, 0.0)
            + jnp.where(not_right_edge, acc_r, 0.0))

    # -------------- concat + BatchNorm2d(352), training-mode stats ----------
    # Per-channel stats => each concat segment normalizes independently and is
    # written straight into its sublane-aligned row range of out_ref, so no
    # in-kernel concat is materialized.
    inv_n = jnp.float32(1.0 / HW)

    def bn_write(src, r0, rows):
        g = gb_ref[r0:r0 + rows, 0:1]                    # (rows, 1)
        b = gb_ref[r0:r0 + rows, 1:2]
        mean = jnp.sum(src, axis=1, keepdims=True) * inv_n
        centered = src - mean
        var = jnp.sum(centered * centered, axis=1, keepdims=True) * inv_n
        scale = jax.lax.rsqrt(var + EPS) * g
        out_ref[r0:r0 + rows, :] = centered * scale + b

    bn_write(x147_ref[...], C140, C147)                  # cat segment 1
    bn_write(conv, C140 + C147, CCONV)                   # cat segment 2 (conv)
    bn_write(x161_ref[...], C140 + C147 + CCONV, C161)   # cat segment 3
    x140_cp.wait()                                       # hidden behind conv
    bn_write(x140_vmem[...], 0, C140)                    # cat segment 0


def prepare_params(w_oihw, gamma, beta):
    """One-time parameter prep (init time, NOT on the per-forward path)."""
    w_taps = jnp.transpose(w_oihw, (2, 3, 0, 1)).reshape(9, CCONV, CIN)
    gb = jnp.stack([gamma, beta], axis=1)                # (CTOT, 2)
    return w_taps, gb


@jax.jit
def run_module(x153, x140, x147, x161, w_taps, gb):
    # NCHW (N=1) -> (C, H*W): pure metadata reshapes, no transposes/pads.
    x153f = x153.reshape(CIN, HW)
    x140f = x140.reshape(C140, HW)
    x147f = x147.reshape(C147, HW)
    x161f = x161.reshape(C161, HW)

    vmem = pl.BlockSpec(memory_space=pltpu.MemorySpace.VMEM)
    out = pl.pallas_call(
        fused_kernel,
        out_shape=jax.ShapeDtypeStruct((CTOT, HW), jnp.float32),
        in_specs=[vmem, vmem, vmem, vmem, vmem,
                  pl.BlockSpec(memory_space=pl.ANY)],    # x140 stays in HBM
        out_specs=vmem,
        scratch_shapes=[pltpu.VMEM((C140, HW), jnp.float32),
                        pltpu.SemaphoreType.DMA],
    )(x153f, w_taps, gb, x147f, x161f, x140f)

    # (352, 196) -> NCHW, again a free reshape.
    return out.reshape(1, CTOT, H, W)


def reference(x153, x140, x147, x161, w_oihw, gamma, beta):
    conv = jax.lax.conv_general_dilated(
        x153, w_oihw, window_strides=(1, 1), padding=((1, 1), (1, 1)),
        dimension_numbers=("NCHW", "OIHW", "NCHW"))
    cat = jnp.concatenate([x140, x147, conv, x161], axis=1)
    mean = jnp.mean(cat, axis=(0, 2, 3), keepdims=True)
    var = jnp.mean((cat - mean) ** 2, axis=(0, 2, 3), keepdims=True)
    g = gamma.reshape(1, CTOT, 1, 1)
    b = beta.reshape(1, CTOT, 1, 1)
    return (cat - mean) * jax.lax.rsqrt(var + EPS) * g + b


if __name__ == "__main__":
    key = jax.random.PRNGKey(0)
    k = jax.random.split(key, 7)
    x140 = jax.random.normal(k[0], (1, C140, H, W), jnp.float32)
    x147 = jax.random.normal(k[1], (1, C147, H, W), jnp.float32)
    x153 = jax.random.normal(k[2], (1, CIN, H, W), jnp.float32)
    x161 = jax.random.normal(k[3], (1, C161, H, W), jnp.float32)
    # deterministic parameter init (synthetic, not a checkpoint)
    w_oihw = jax.random.normal(k[4], (CCONV, CIN, 3, 3), jnp.float32) * 0.05
    gamma = jax.random.normal(k[5], (CTOT,), jnp.float32) * 0.1 + 1.0
    beta = jax.random.normal(k[6], (CTOT,), jnp.float32) * 0.1

    # Init-time prep (not part of the measured forward path).
    w_taps, gb = prepare_params(w_oihw, gamma, beta)
    w_taps = jax.block_until_ready(w_taps)
    gb = jax.block_until_ready(gb)

    out = jax.block_until_ready(
        run_module(x153, x140, x147, x161, w_taps, gb))
    ref = reference(x153, x140, x147, x161, w_oihw, gamma, beta)
    assert out.shape == (1, CTOT, H, W)
    err = float(jnp.max(jnp.abs(out - ref)))
    assert jnp.allclose(out, ref, atol=1e-3, rtol=1e-3), err
    print("KERNEL_OK")
</pallas_src>

<mosaic_0001>
module attributes {stable_mosaic.version = 11 : i64} {
  func.func @fused_kernel(%arg0: memref<128x196xf32, #tpu.memory_space<vmem>>, %arg1: memref<9x32x128xf32, #tpu.memory_space<vmem>>, %arg2: memref<352x2xf32, #tpu.memory_space<vmem>>, %arg3: memref<32x196xf32, #tpu.memory_space<vmem>>, %arg4: memref<32x196xf32, #tpu.memory_space<vmem>>, %arg5: memref<256x196xf32, #tpu.memory_space<any>>, %arg6: memref<352x196xf32, #tpu.memory_space<vmem>>, %arg7: memref<256x196xf32, #tpu.memory_space<vmem>>, %arg8: memref<!tpu.dma_semaphore, #tpu.memory_space<semaphore_mem>>) attributes {dimension_semantics = [], scalar_prefetch = 0 : i64, scratch_operands = 2 : i64, tpu.core_type = #tpu.core_type<tc>} {
    tpu.enqueue_dma source(%arg5 : memref<256x196xf32, #tpu.memory_space<any>>) target(%arg7 : memref<256x196xf32, #tpu.memory_space<vmem>>) target_semaphore(%arg8 : memref<!tpu.dma_semaphore, #tpu.memory_space<semaphore_mem>>)
    %c0 = arith.constant 0 : index
    %c0_0 = arith.constant 0 : index
    %0 = vector.load %arg0[%c0, %c0_0] : memref<128x196xf32, #tpu.memory_space<vmem>>, vector<128x196xf32>
    %cst = arith.constant 0.000000e+00 : f32
    %1 = vector.broadcast %cst : f32 to vector<128x15xf32>
    %2 = tpu.concatenate %1, %0, %1 in 1 : vector<128x15xf32>, vector<128x196xf32>, vector<128x15xf32> -> vector<128x226xf32>
    %cst_1 = arith.constant 0.000000e+00 : f32
    %3 = vector.broadcast %cst_1 : f32 to vector<32x196xf32>
    %cst_2 = arith.constant 0.000000e+00 : f32
    %4 = vector.broadcast %cst_2 : f32 to vector<32x196xf32>
    %cst_3 = arith.constant 0.000000e+00 : f32
    %5 = vector.broadcast %cst_3 : f32 to vector<32x196xf32>
    %6 = vector.extract_strided_slice %2 {offsets = [0, 0], sizes = [128, 196], strides = [1, 1]} : vector<128x226xf32> to vector<128x196xf32>
    %c0_4 = arith.constant 0 : index
    %c0_5 = arith.constant 0 : index
    %c0_6 = arith.constant 0 : index
    %7 = vector.load %arg1[%c0_4, %c0_5, %c0_6] : memref<9x32x128xf32, #tpu.memory_space<vmem>>, vector<1x32x128xf32>
    %8 = vector.shape_cast %7 : vector<1x32x128xf32> to vector<32x128xf32>
    %cst_7 = arith.constant dense<0.000000e+00> : vector<32x196xf32>
    %9 = tpu.matmul %8, %6, %cst_7 {dimension_numbers = #tpu.dot_dimension_numbers<[1], [0], [0], [1], [0, 0, 1, 1], [], []>} : vector<32x128xf32>, vector<128x196xf32>, vector<32x196xf32> -> vector<32x196xf32>
    %10 = arith.addf %4, %9 : vector<32x196xf32>
    %11 = vector.extract_strided_slice %2 {offsets = [0, 1], sizes = [128, 196], strides = [1, 1]} : vector<128x226xf32> to vector<128x196xf32>
    %c1 = arith.constant 1 : index
    %c0_8 = arith.constant 0 : index
    %c0_9 = arith.constant 0 : index
    %12 = vector.load %arg1[%c1, %c0_8, %c0_9] : memref<9x32x128xf32, #tpu.memory_space<vmem>>, vector<1x32x128xf32>
    %13 = vector.shape_cast %12 : vector<1x32x128xf32> to vector<32x128xf32>
    %cst_10 = arith.constant dense<0.000000e+00> : vector<32x196xf32>
    %14 = tpu.matmul %13, %11, %cst_10 {dimension_numbers = #tpu.dot_dimension_numbers<[1], [0], [0], [1], [0, 0, 1, 1], [], []>} : vector<32x128xf32>, vector<128x196xf32>, vector<32x196xf32> -> vector<32x196xf32>
    %15 = arith.addf %3, %14 : vector<32x196xf32>
    %16 = vector.extract_strided_slice %2 {offsets = [0, 2], sizes = [128, 196], strides = [1, 1]} : vector<128x226xf32> to vector<128x196xf32>
    %c2 = arith.constant 2 : index
    %c0_11 = arith.constant 0 : index
    %c0_12 = arith.constant 0 : index
    %17 = vector.load %arg1[%c2, %c0_11, %c0_12] : memref<9x32x128xf32, #tpu.memory_space<vmem>>, vector<1x32x128xf32>
    %18 = vector.shape_cast %17 : vector<1x32x128xf32> to vector<32x128xf32>
    %cst_13 = arith.constant dense<0.000000e+00> : vector<32x196xf32>
    %19 = tpu.matmul %18, %16, %cst_13 {dimension_numbers = #tpu.dot_dimension_numbers<[1], [0], [0], [1], [0, 0, 1, 1], [], []>} : vector<32x128xf32>, vector<128x196xf32>, vector<32x196xf32> -> vector<32x196xf32>
    %20 = arith.addf %5, %19 : vector<32x196xf32>
    %21 = vector.extract_strided_slice %2 {offsets = [0, 14], sizes = [128, 196], strides = [1, 1]} : vector<128x226xf32> to vector<128x196xf32>
    %c3 = arith.constant 3 : index
    %c0_14 = arith.constant 0 : index
    %c0_15 = arith.constant 0 : index
    %22 = vector.load %arg1[%c3, %c0_14, %c0_15] : memref<9x32x128xf32, #tpu.memory_space<vmem>>, vector<1x32x128xf32>
    %23 = vector.shape_cast %22 : vector<1x32x128xf32> to vector<32x128xf32>
    %cst_16 = arith.constant dense<0.000000e+00> : vector<32x196xf32>
    %24 = tpu.matmul %23, %21, %cst_16 {dimension_numbers = #tpu.dot_dimension_numbers<[1], [0], [0], [1], [0, 0, 1, 1], [], []>} : vector<32x128xf32>, vector<128x196xf32>, vector<32x196xf32> -> vector<32x196xf32>
    %25 = arith.addf %10, %24 : vector<32x196xf32>
    %26 = vector.extract_strided_slice %2 {offsets = [0, 15], sizes = [128, 196], strides = [1, 1]} : vector<128x226xf32> to vector<128x196xf32>
    %c4 = arith.constant 4 : index
    %c0_17 = arith.constant 0 : index
    %c0_18 = arith.constant 0 : index
    %27 = vector.load %arg1[%c4, %c0_17, %c0_18] : memref<9x32x128xf32, #tpu.memory_space<vmem>>, vector<1x32x128xf32>
    %28 = vector.shape_cast %27 : vector<1x32x128xf32> to vector<32x128xf32>
    %cst_19 = arith.constant dense<0.000000e+00> : vector<32x196xf32>
    %29 = tpu.matmul %28, %26, %cst_19 {dimension_numbers = #tpu.dot_dimension_numbers<[1], [0], [0], [1], [0, 0, 1, 1], [], []>} : vector<32x128xf32>, vector<128x196xf32>, vector<32x196xf32> -> vector<32x196xf32>
    %30 = arith.addf %15, %29 : vector<32x196xf32>
    %31 = vector.extract_strided_slice %2 {offsets = [0, 16], sizes = [128, 196], strides = [1, 1]} : vector<128x226xf32> to vector<128x196xf32>
    %c5 = arith.constant 5 : index
    %c0_20 = arith.constant 0 : index
    %c0_21 = arith.constant 0 : index
    %32 = vector.load %arg1[%c5, %c0_20, %c0_21] : memref<9x32x128xf32, #tpu.memory_space<vmem>>, vector<1x32x128xf32>
    %33 = vector.shape_cast %32 : vector<1x32x128xf32> to vector<32x128xf32>
    %cst_22 = arith.constant dense<0.000000e+00> : vector<32x196xf32>
    %34 = tpu.matmul %33, %31, %cst_22 {dimension_numbers = #tpu.dot_dimension_numbers<[1], [0], [0], [1], [0, 0, 1, 1], [], []>} : vector<32x128xf32>, vector<128x196xf32>, vector<32x196xf32> -> vector<32x196xf32>
    %35 = arith.addf %20, %34 : vector<32x196xf32>
    %36 = vector.extract_strided_slice %2 {offsets = [0, 28], sizes = [128, 196], strides = [1, 1]} : vector<128x226xf32> to vector<128x196xf32>
    %c6 = arith.constant 6 : index
    %c0_23 = arith.constant 0 : index
    %c0_24 = arith.constant 0 : index
    %37 = vector.load %arg1[%c6, %c0_23, %c0_24] : memref<9x32x128xf32, #tpu.memory_space<vmem>>, vector<1x32x128xf32>
    %38 = vector.shape_cast %37 : vector<1x32x128xf32> to vector<32x128xf32>
    %cst_25 = arith.constant dense<0.000000e+00> : vector<32x196xf32>
    %39 = tpu.matmul %38, %36, %cst_25 {dimension_numbers = #tpu.dot_dimension_numbers<[1], [0], [0], [1], [0, 0, 1, 1], [], []>} : vector<32x128xf32>, vector<128x196xf32>, vector<32x196xf32> -> vector<32x196xf32>
    %40 = arith.addf %25, %39 : vector<32x196xf32>
    %41 = vector.extract_strided_slice %2 {offsets = [0, 29], sizes = [128, 196], strides = [1, 1]} : vector<128x226xf32> to vector<128x196xf32>
    %c7 = arith.constant 7 : index
    %c0_26 = arith.constant 0 : index
    %c0_27 = arith.constant 0 : index
    %42 = vector.load %arg1[%c7, %c0_26, %c0_27] : memref<9x32x128xf32, #tpu.memory_space<vmem>>, vector<1x32x128xf32>
    %43 = vector.shape_cast %42 : vector<1x32x128xf32> to vector<32x128xf32>
    %cst_28 = arith.constant dense<0.000000e+00> : vector<32x196xf32>
    %44 = tpu.matmul %43, %41, %cst_28 {dimension_numbers = #tpu.dot_dimension_numbers<[1], [0], [0], [1], [0, 0, 1, 1], [], []>} : vector<32x128xf32>, vector<128x196xf32>, vector<32x196xf32> -> vector<32x196xf32>
    %45 = arith.addf %30, %44 : vector<32x196xf32>
    %46 = vector.extract_strided_slice %2 {offsets = [0, 30], sizes = [128, 196], strides = [1, 1]} : vector<128x226xf32> to vector<128x196xf32>
    %c8 = arith.constant 8 : index
    %c0_29 = arith.constant 0 : index
    %c0_30 = arith.constant 0 : index
    %47 = vector.load %arg1[%c8, %c0_29, %c0_30] : memref<9x32x128xf32, #tpu.memory_space<vmem>>, vector<1x32x128xf32>
    %48 = vector.shape_cast %47 : vector<1x32x128xf32> to vector<32x128xf32>
    %cst_31 = arith.constant dense<0.000000e+00> : vector<32x196xf32>
    %49 = tpu.matmul %48, %46, %cst_31 {dimension_numbers = #tpu.dot_dimension_numbers<[1], [0], [0], [1], [0, 0, 1, 1], [], []>} : vector<32x128xf32>, vector<128x196xf32>, vector<32x196xf32> -> vector<32x196xf32>
    %50 = arith.addf %35, %49 : vector<32x196xf32>
    %51 = tpu.iota {dimensions = array<i32: 1>} : vector<1x196xi32>
    %c14_i32 = arith.constant 14 : i32
    %c0_i32 = arith.constant 0 : i32
    %52 = arith.cmpi eq, %c14_i32, %c0_i32 : i32
    %c1_i32 = arith.constant 1 : i32
    %53 = arith.select %52, %c1_i32, %c14_i32 : i32
    %54 = vector.broadcast %53 : i32 to vector<1x196xi32>
    %55 = arith.remsi %51, %54 : vector<1x196xi32>
    %c0_i32_32 = arith.constant 0 : i32
    %56 = vector.broadcast %c0_i32_32 : i32 to vector<1x196xi32>
    %57 = arith.cmpi ne, %55, %56 : vector<1x196xi32>
    %c0_i32_33 = arith.constant 0 : i32
    %58 = vector.broadcast %c0_i32_33 : i32 to vector<1x196xi32>
    %59 = arith.cmpi slt, %55, %58 : vector<1x196xi32>
    %c0_i32_34 = arith.constant 0 : i32
    %60 = arith.cmpi slt, %53, %c0_i32_34 : i32
    %61 = vector.broadcast %60 : i1 to vector<1x196xi1>
    %62 = vector.broadcast %61 : vector<1x196xi1> to vector<1x196xi1>
    %63 = arith.xori %59, %62 : vector<1x196xi1>
    %64 = arith.andi %63, %57 : vector<1x196xi1>
    %65 = vector.broadcast %53 : i32 to vector<1x196xi32>
    %66 = arith.addi %55, %65 : vector<1x196xi32>
    %67 = arith.select %64, %66, %55 : vector<1x196xi1>, vector<1x196xi32>
    %c1_i32_35 = arith.constant 1 : i32
    %68 = vector.broadcast %c1_i32_35 : i32 to vector<1x196xi32>
    %69 = arith.cmpi sge, %67, %68 : vector<1x196xi32>
    %c12_i32 = arith.constant 12 : i32
    %70 = vector.broadcast %c12_i32 : i32 to vector<1x196xi32>
    %71 = arith.cmpi sle, %67, %70 : vector<1x196xi32>
    %cst_36 = arith.constant 0.000000e+00 : f32
    %72 = vector.shape_cast %69 : vector<1x196xi1> to vector<1x196xi1>
    %73 = vector.broadcast %72 : vector<1x196xi1> to vector<32x196xi1>
    %74 = vector.broadcast %cst_36 : f32 to vector<32x196xf32>
    %75 = arith.select %73, %40, %74 : vector<32x196xi1>, vector<32x196xf32>
    %76 = arith.addf %45, %75 : vector<32x196xf32>
    %cst_37 = arith.constant 0.000000e+00 : f32
    %77 = vector.shape_cast %71 : vector<1x196xi1> to vector<1x196xi1>
    %78 = vector.broadcast %77 : vector<1x196xi1> to vector<32x196xi1>
    %79 = vector.broadcast %cst_37 : f32 to vector<32x196xf32>
    %80 = arith.select %78, %50, %79 : vector<32x196xi1>, vector<32x196xf32>
    %81 = arith.addf %76, %80 : vector<32x196xf32>
    %c0_38 = arith.constant 0 : index
    %c0_39 = arith.constant 0 : index
    %82 = vector.load %arg3[%c0_38, %c0_39] : memref<32x196xf32, #tpu.memory_space<vmem>>, vector<32x196xf32>
    %c256 = arith.constant 256 : index
    %c0_40 = arith.constant 0 : index
    %83 = vector.load %arg2[%c256, %c0_40] : memref<352x2xf32, #tpu.memory_space<vmem>>, vector<32x1xf32>
    %c256_41 = arith.constant 256 : index
    %c1_42 = arith.constant 1 : index
    %84 = vector.load %arg2[%c256_41, %c1_42] : memref<352x2xf32, #tpu.memory_space<vmem>>, vector<32x1xf32>
    %cst_43 = arith.constant dense<0.000000e+00> : vector<32xf32>
    %85 = vector.multi_reduction <add>, %82, %cst_43 [1] : vector<32x196xf32> to vector<32xf32>
    %86 = vector.shape_cast %85 : vector<32xf32> to vector<32x1xf32>
    %cst_44 = arith.constant 0.00510204071 : f32
    %87 = vector.broadcast %cst_44 : f32 to vector<32x1xf32>
    %88 = arith.mulf %86, %87 : vector<32x1xf32>
    %89 = vector.broadcast %88 : vector<32x1xf32> to vector<32x196xf32>
    %90 = arith.subf %82, %89 : vector<32x196xf32>
    %91 = arith.mulf %90, %90 : vector<32x196xf32>
    %cst_45 = arith.constant dense<0.000000e+00> : vector<32xf32>
    %92 = vector.multi_reduction <add>, %91, %cst_45 [1] : vector<32x196xf32> to vector<32xf32>
    %93 = vector.shape_cast %92 : vector<32xf32> to vector<32x1xf32>
    %cst_46 = arith.constant 0.00510204071 : f32
    %94 = vector.broadcast %cst_46 : f32 to vector<32x1xf32>
    %95 = arith.mulf %93, %94 : vector<32x1xf32>
    %cst_47 = arith.constant 9.99999974E-6 : f32
    %96 = vector.broadcast %cst_47 : f32 to vector<32x1xf32>
    %97 = arith.addf %95, %96 : vector<32x1xf32>
    %98 = math.rsqrt %97 : vector<32x1xf32>
    %99 = arith.mulf %98, %83 : vector<32x1xf32>
    %100 = vector.broadcast %99 : vector<32x1xf32> to vector<32x196xf32>
    %101 = arith.mulf %90, %100 : vector<32x196xf32>
    %102 = vector.broadcast %84 : vector<32x1xf32> to vector<32x196xf32>
    %103 = arith.addf %101, %102 : vector<32x196xf32>
    %c256_48 = arith.constant 256 : index
    %c0_49 = arith.constant 0 : index
    %104 = vector.load %arg6[%c256_48, %c0_49] : memref<352x196xf32, #tpu.memory_space<vmem>>, vector<32x196xf32>
    tpu.vector_store %arg6[%c256_48, %c0_49], %103 {strides = array<i32>} : memref<352x196xf32, #tpu.memory_space<vmem>>, vector<32x196xf32>,
    %c288 = arith.constant 288 : index
    %c0_50 = arith.constant 0 : index
    %105 = vector.load %arg2[%c288, %c0_50] : memref<352x2xf32, #tpu.memory_space<vmem>>, vector<32x1xf32>
    %c288_51 = arith.constant 288 : index
    %c1_52 = arith.constant 1 : index
    %106 = vector.load %arg2[%c288_51, %c1_52] : memref<352x2xf32, #tpu.memory_space<vmem>>, vector<32x1xf32>
    %cst_53 = arith.constant dense<0.000000e+00> : vector<32xf32>
    %107 = vector.multi_reduction <add>, %81, %cst_53 [1] : vector<32x196xf32> to vector<32xf32>
    %108 = vector.shape_cast %107 : vector<32xf32> to vector<32x1xf32>
    %cst_54 = arith.constant 0.00510204071 : f32
    %109 = vector.broadcast %cst_54 : f32 to vector<32x1xf32>
    %110 = arith.mulf %108, %109 : vector<32x1xf32>
    %111 = vector.broadcast %110 : vector<32x1xf32> to vector<32x196xf32>
    %112 = arith.subf %81, %111 : vector<32x196xf32>
    %113 = arith.mulf %112, %112 : vector<32x196xf32>
    %cst_55 = arith.constant dense<0.000000e+00> : vector<32xf32>
    %114 = vector.multi_reduction <add>, %113, %cst_55 [1] : vector<32x196xf32> to vector<32xf32>
    %115 = vector.shape_cast %114 : vector<32xf32> to vector<32x1xf32>
    %cst_56 = arith.constant 0.00510204071 : f32
    %116 = vector.broadcast %cst_56 : f32 to vector<32x1xf32>
    %117 = arith.mulf %115, %116 : vector<32x1xf32>
    %cst_57 = arith.constant 9.99999974E-6 : f32
    %118 = vector.broadcast %cst_57 : f32 to vector<32x1xf32>
    %119 = arith.addf %117, %118 : vector<32x1xf32>
    %120 = math.rsqrt %119 : vector<32x1xf32>
    %121 = arith.mulf %120, %105 : vector<32x1xf32>
    %122 = vector.broadcast %121 : vector<32x1xf32> to vector<32x196xf32>
    %123 = arith.mulf %112, %122 : vector<32x196xf32>
    %124 = vector.broadcast %106 : vector<32x1xf32> to vector<32x196xf32>
    %125 = arith.addf %123, %124 : vector<32x196xf32>
    %c288_58 = arith.constant 288 : index
    %c0_59 = arith.constant 0 : index
    %126 = vector.load %arg6[%c288_58, %c0_59] : memref<352x196xf32, #tpu.memory_space<vmem>>, vector<32x196xf32>
    tpu.vector_store %arg6[%c288_58, %c0_59], %125 {strides = array<i32>} : memref<352x196xf32, #tpu.memory_space<vmem>>, vector<32x196xf32>,
    %c0_60 = arith.constant 0 : index
    %c0_61 = arith.constant 0 : index
    %127 = vector.load %arg4[%c0_60, %c0_61] : memref<32x196xf32, #tpu.memory_space<vmem>>, vector<32x196xf32>
    %c320 = arith.constant 320 : index
    %c0_62 = arith.constant 0 : index
    %128 = vector.load %arg2[%c320, %c0_62] : memref<352x2xf32, #tpu.memory_space<vmem>>, vector<32x1xf32>
    %c320_63 = arith.constant 320 : index
    %c1_64 = arith.constant 1 : index
    %129 = vector.load %arg2[%c320_63, %c1_64] : memref<352x2xf32, #tpu.memory_space<vmem>>, vector<32x1xf32>
    %cst_65 = arith.constant dense<0.000000e+00> : vector<32xf32>
    %130 = vector.multi_reduction <add>, %127, %cst_65 [1] : vector<32x196xf32> to vector<32xf32>
    %131 = vector.shape_cast %130 : vector<32xf32> to vector<32x1xf32>
    %cst_66 = arith.constant 0.00510204071 : f32
    %132 = vector.broadcast %cst_66 : f32 to vector<32x1xf32>
    %133 = arith.mulf %131, %132 : vector<32x1xf32>
    %134 = vector.broadcast %133 : vector<32x1xf32> to vector<32x196xf32>
    %135 = arith.subf %127, %134 : vector<32x196xf32>
    %136 = arith.mulf %135, %135 : vector<32x196xf32>
    %cst_67 = arith.constant dense<0.000000e+00> : vector<32xf32>
    %137 = vector.multi_reduction <add>, %136, %cst_67 [1] : vector<32x196xf32> to vector<32xf32>
    %138 = vector.shape_cast %137 : vector<32xf32> to vector<32x1xf32>
    %cst_68 = arith.constant 0.00510204071 : f32
    %139 = vector.broadcast %cst_68 : f32 to vector<32x1xf32>
    %140 = arith.mulf %138, %139 : vector<32x1xf32>
    %cst_69 = arith.constant 9.99999974E-6 : f32
    %141 = vector.broadcast %cst_69 : f32 to vector<32x1xf32>
    %142 = arith.addf %140, %141 : vector<32x1xf32>
    %143 = math.rsqrt %142 : vector<32x1xf32>
    %144 = arith.mulf %143, %128 : vector<32x1xf32>
    %145 = vector.broadcast %144 : vector<32x1xf32> to vector<32x196xf32>
    %146 = arith.mulf %135, %145 : vector<32x196xf32>
    %147 = vector.broadcast %129 : vector<32x1xf32> to vector<32x196xf32>
    %148 = arith.addf %146, %147 : vector<32x196xf32>
    %c320_70 = arith.constant 320 : index
    %c0_71 = arith.constant 0 : index
    %149 = vector.load %arg6[%c320_70, %c0_71] : memref<352x196xf32, #tpu.memory_space<vmem>>, vector<32x196xf32>
    tpu.vector_store %arg6[%c320_70, %c0_71], %148 {strides = array<i32>} : memref<352x196xf32, #tpu.memory_space<vmem>>, vector<32x196xf32>,
    tpu.wait_dma2 semaphore(%arg8 : memref<!tpu.dma_semaphore, #tpu.memory_space<semaphore_mem>>) src(%arg5 : memref<256x196xf32, #tpu.memory_space<any>>) dst(%arg7 : memref<256x196xf32, #tpu.memory_space<vmem>>)
    %c0_72 = arith.constant 0 : index
    %c0_73 = arith.constant 0 : index
    %150 = vector.load %arg7[%c0_72, %c0_73] : memref<256x196xf32, #tpu.memory_space<vmem>>, vector<256x196xf32>
    %c0_74 = arith.constant 0 : index
    %c0_75 = arith.constant 0 : index
    %151 = vector.load %arg2[%c0_74, %c0_75] : memref<352x2xf32, #tpu.memory_space<vmem>>, vector<256x1xf32>
    %c0_76 = arith.constant 0 : index
    %c1_77 = arith.constant 1 : index
    %152 = vector.load %arg2[%c0_76, %c1_77] : memref<352x2xf32, #tpu.memory_space<vmem>>, vector<256x1xf32>
    %cst_78 = arith.constant dense<0.000000e+00> : vector<256xf32>
    %153 = vector.multi_reduction <add>, %150, %cst_78 [1] : vector<256x196xf32> to vector<256xf32>
    %154 = vector.shape_cast %153 : vector<256xf32> to vector<256x1xf32>
    %cst_79 = arith.constant 0.00510204071 : f32
    %155 = vector.broadcast %cst_79 : f32 to vector<256x1xf32>
    %156 = arith.mulf %154, %155 : vector<256x1xf32>
    %157 = vector.broadcast %156 : vector<256x1xf32> to vector<256x196xf32>
    %158 = arith.subf %150, %157 : vector<256x196xf32>
    %159 = arith.mulf %158, %158 : vector<256x196xf32>
    %cst_80 = arith.constant dense<0.000000e+00> : vector<256xf32>
    %160 = vector.multi_reduction <add>, %159, %cst_80 [1] : vector<256x196xf32> to vector<256xf32>
    %161 = vector.shape_cast %160 : vector<256xf32> to vector<256x1xf32>
    %cst_81 = arith.constant 0.00510204071 : f32
    %162 = vector.broadcast %cst_81 : f32 to vector<256x1xf32>
    %163 = arith.mulf %161, %162 : vector<256x1xf32>
    %cst_82 = arith.constant 9.99999974E-6 : f32
    %164 = vector.broadcast %cst_82 : f32 to vector<256x1xf32>
    %165 = arith.addf %163, %164 : vector<256x1xf32>
    %166 = math.rsqrt %165 : vector<256x1xf32>
    %167 = arith.mulf %166, %151 : vector<256x1xf32>
    %168 = vector.broadcast %167 : vector<256x1xf32> to vector<256x196xf32>
    %169 = arith.mulf %158, %168 : vector<256x196xf32>
    %170 = vector.broadcast %152 : vector<256x1xf32> to vector<256x196xf32>
    %171 = arith.addf %169, %170 : vector<256x196xf32>
    %c0_83 = arith.constant 0 : index
    %c0_84 = arith.constant 0 : index
    %172 = vector.load %arg6[%c0_83, %c0_84] : memref<352x196xf32, #tpu.memory_space<vmem>>, vector<256x196xf32>
    tpu.vector_store %arg6[%c0_83, %c0_84], %171 {strides = array<i32>} : memref<352x196xf32, #tpu.memory_space<vmem>>, vector<256x196xf32>,
    return
  }
}

</mosaic_0001>

<bundles_post_ra>
// kernel: run_module.1
= control target key start
LH: loop header
LB: loop body
LE: loop exit
PB: predicated region body
PF: predicated region fallthrough
CT: control target
= control target key end

     0   :  { %s5177_s20 = smov 15   ;;  %s7909_s0 = inlined_call_operand.vmem [shape: f32[128,196], index: 0, kind: input, shape index: {}]   ;;  %s7910_s1 = inlined_call_operand.vmem [shape: f32[9,32,128], index: 1, kind: input, shape index: {}]   ;;  %s7911_s2 = inlined_call_operand.vmem [shape: f32[352,2], index: 2, kind: input, shape index: {}]   ;;  %s7912_s3 = inlined_call_operand.vmem [shape: f32[32,196], index: 3, kind: input, shape index: {}]   ;;  %s7913_s4 = inlined_call_operand.vmem [shape: f32[32,196], index: 4, kind: input, shape index: {}]   ;;  %s7914_s5 = inlined_call_operand.vmem [shape: f32[256,196], index: 5, kind: input, shape index: {}]   ;;  %s7915_s6 = inlined_call_operand.vmem [shape: f32[352,196], index: 6, kind: output, shape index: {}]  }
   0x1   :  { %v5227_v0 = vld [vmem:[%s7914_s5] sm:$0xff]  ;;  %v5232_v1 = vld [vmem:[%s7914_s5 + $0x8] sm:$0xff]  ;;  %v5237_v2 = vld [vmem:[%s7914_s5 + $0x10] sm:$0xff] }
   0x2   :  { %v5242_v3 = vld [vmem:[%s7914_s5 + $0x18] sm:$0xff]  ;;  %v5247_v4 = vld [vmem:[%s7914_s5 + $0x20] sm:$0xff]  ;;  %v5252_v5 = vld [vmem:[%s7914_s5 + $0x28] sm:$0xff] }
   0x3   :  { %v5257_v6 = vld [vmem:[%s7914_s5 + $0x30] sm:$0xff]  ;;  %v5262_v7 = vld [vmem:[%s7914_s5 + $0x38] sm:$0xff]  ;;  %v5267_v8 = vld [vmem:[%s7914_s5 + $0x40] sm:$0xff] }
   0x4   :  { %v5272_v9 = vld [vmem:[%s7914_s5 + $0x48] sm:$0xff]  ;;  %v5277_v10 = vld [vmem:[%s7914_s5 + $0x50] sm:$0xff]  ;;  %v5282_v11 = vld [vmem:[%s7914_s5 + $0x58] sm:$0xff] }
   0x5   :  { %v5287_v12 = vld [vmem:[%s7914_s5 + $0x60] sm:$0xff]  ;;  %v5292_v13 = vld [vmem:[%s7914_s5 + $0x68] sm:$0xff]  ;;  %v5297_v14 = vld [vmem:[%s7914_s5 + $0x70] sm:$0xff] }
   0x6   :  { %8042 = vst [vmem:[#allocation6_spill] sm:$0xff] %v5287_v12  ;;  %8043 = vst [vmem:[#allocation7_spill] sm:$0xff] %v5292_v13  ;;  %v5302_v15 = vld [vmem:[%s7914_s5 + $0x78] sm:$0xff]  ;;  %v5307_v16 = vld [vmem:[%s7914_s5 + $0x80] sm:$0xff] }
   0x7   :  { %8044 = vst [vmem:[#allocation8_spill] sm:$0xff] %v5297_v14  ;;  %8045 = vst [vmem:[#allocation9_spill] sm:$0xff] %v5302_v15  ;;  %v5312_v17 = vld [vmem:[%s7914_s5 + $0x88] sm:$0xff]  ;;  %v5317_v18 = vld [vmem:[%s7914_s5 + $0x90] sm:$0xff] }
   0x8   :  { %8046 = vst [vmem:[#allocation10_spill] sm:$0xff] %v5307_v16  ;;  %8047 = vst [vmem:[#allocation11_spill] sm:$0xff] %v5312_v17  ;;  %v5322_v19 = vld [vmem:[%s7914_s5 + $0x98] sm:$0xff]  ;;  %v5327_v20 = vld [vmem:[%s7914_s5 + $0xa0] sm:$0xff] }
   0x9   :  { %8048 = vst [vmem:[#allocation12_spill] sm:$0xff] %v5317_v18  ;;  %8049 = vst [vmem:[#allocation13_spill] sm:$0xff] %v5322_v19  ;;  %v5332_v21 = vld [vmem:[%s7914_s5 + $0xa8] sm:$0xff]  ;;  %v5337_v22 = vld [vmem:[%s7914_s5 + $0xb0] sm:$0xff] }
   0xa   :  { %8050 = vst [vmem:[#allocation14_spill] sm:$0xff] %v5327_v20  ;;  %8051 = vst [vmem:[#allocation15_spill] sm:$0xff] %v5332_v21  ;;  %v5342_v23 = vld [vmem:[%s7914_s5 + $0xb8] sm:$0xff]  ;;  %v5347_v24 = vld [vmem:[%s7914_s5 + $0xc0] sm:$0xff] }
   0xb   :  { %8052 = vst [vmem:[#allocation16_spill] sm:$0xff] %v5337_v22  ;;  %8053 = vst [vmem:[#allocation17_spill] sm:$0xff] %v5342_v23  ;;  %v5352_v25 = vld [vmem:[%s7914_s5 + $0xc8] sm:$0xff]  ;;  %v5357_v26 = vld [vmem:[%s7914_s5 + $0xd0] sm:$0xff] }
   0xc   :  { %8054 = vst [vmem:[#allocation18_spill] sm:$0xff] %v5347_v24  ;;  %8055 = vst [vmem:[#allocation19_spill] sm:$0xff] %v5352_v25  ;;  %v5362_v27 = vld [vmem:[%s7914_s5 + $0xd8] sm:$0xff]  ;;  %v5367_v28 = vld [vmem:[%s7914_s5 + $0xe0] sm:$0xff] }
   0xd   :  { %8056 = vst [vmem:[#allocation20_spill] sm:$0xff] %v5357_v26  ;;  %8057 = vst [vmem:[#allocation21_spill] sm:$0xff] %v5362_v27  ;;  %v5372_v29 = vld [vmem:[%s7914_s5 + $0xe8] sm:$0xff]  ;;  %v5377_v30 = vld [vmem:[%s7914_s5 + $0xf0] sm:$0xff] }
   0xe   :  { %8058 = vst [vmem:[#allocation22_spill] sm:$0xff] %v5367_v28  ;;  %8059 = vst [vmem:[#allocation23_spill] sm:$0xff] %v5372_v29  ;;  %v5382_v31 = vld [vmem:[%s7914_s5 + $0xf8] sm:$0xff]  ;;  %v5387_v32 = vld [vmem:[%s7914_s5 + $0x100] sm:$0xff] }
   0xf   :  { %8060 = vst [vmem:[#allocation24_spill] sm:$0xff] %v5377_v30  ;;  %8061 = vst [vmem:[#allocation25_spill] sm:$0xff] %v5382_v31  ;;  %v5392_v33 = vld [vmem:[%s7914_s5 + $0x108] sm:$0xff]  ;;  %v5397_v34 = vld [vmem:[%s7914_s5 + $0x110] sm:$0xff] }
  0x10   :  { %8062 = vst [vmem:[#allocation26_spill] sm:$0xff] %v5387_v32  ;;  %8063 = vst [vmem:[#allocation27_spill] sm:$0xff] %v5392_v33  ;;  %v5402_v35 = vld [vmem:[%s7914_s5 + $0x118] sm:$0xff]  ;;  %v5407_v36 = vld [vmem:[%s7914_s5 + $0x120] sm:$0xff] }
  0x11   :  { %8064 = vst [vmem:[#allocation28_spill] sm:$0xff] %v5397_v34  ;;  %8065 = vst [vmem:[#allocation29_spill] sm:$0xff] %v5402_v35  ;;  %v5412_v37 = vld [vmem:[%s7914_s5 + $0x128] sm:$0xff]  ;;  %v5417_v38 = vld [vmem:[%s7914_s5 + $0x130] sm:$0xff] }
  0x12   :  { %8066 = vst [vmem:[#allocation30_spill] sm:$0xff] %v5407_v36  ;;  %8067 = vst [vmem:[#allocation31_spill] sm:$0xff] %v5412_v37  ;;  %v5422_v39 = vld [vmem:[%s7914_s5 + $0x138] sm:$0xff]  ;;  %v5427_v40 = vld [vmem:[%s7914_s5 + $0x140] sm:$0xff] }
  0x13   :  { %8068 = vst [vmem:[#allocation32_spill] sm:$0xff] %v5417_v38  ;;  %8069 = vst [vmem:[#allocation33_spill] sm:$0xff] %v5422_v39  ;;  %v5432_v41 = vld [vmem:[%s7914_s5 + $0x148] sm:$0xff]  ;;  %v5437_v42 = vld [vmem:[%s7914_s5 + $0x150] sm:$0xff] }
  0x14   :  { %8070 = vst [vmem:[#allocation34_spill] sm:$0xff] %v5427_v40  ;;  %8071 = vst [vmem:[#allocation35_spill] sm:$0xff] %v5432_v41  ;;  %v5442_v43 = vld [vmem:[%s7914_s5 + $0x158] sm:$0xff]  ;;  %v5447_v44 = vld [vmem:[%s7914_s5 + $0x160] sm:$0xff] }
  0x15   :  { %8072 = vst [vmem:[#allocation36_spill] sm:$0xff] %v5437_v42  ;;  %8073 = vst [vmem:[#allocation37_spill] sm:$0xff] %v5442_v43  ;;  %v5452_v45 = vld [vmem:[%s7914_s5 + $0x168] sm:$0xff]  ;;  %v5457_v46 = vld [vmem:[%s7914_s5 + $0x170] sm:$0xff] }
  0x16   :  { %8074 = vst [vmem:[#allocation38_spill] sm:$0xff] %v5447_v44  ;;  %8075 = vst [vmem:[#allocation39_spill] sm:$0xff] %v5452_v45  ;;  %v5462_v47 = vld [vmem:[%s7914_s5 + $0x178] sm:$0xff]  ;;  %v5467_v48 = vld [vmem:[%s7914_s5 + $0x180] sm:$0xff] }
  0x17   :  { %8076 = vst [vmem:[#allocation40_spill] sm:$0xff] %v5457_v46  ;;  %8077 = vst [vmem:[#allocation41_spill] sm:$0xff] %v5462_v47  ;;  %v5472_v49 = vld [vmem:[%s7914_s5 + $0x188] sm:$0xff]  ;;  %v5477_v50 = vld [vmem:[%s7914_s5 + $0x190] sm:$0xff] }
  0x18   :  { %8078 = vst [vmem:[#allocation42_spill] sm:$0xff] %v5467_v48  ;;  %8079 = vst [vmem:[#allocation43_spill] sm:$0xff] %v5472_v49  ;;  %v5482_v51 = vld [vmem:[%s7914_s5 + $0x198] sm:$0xff]  ;;  %v5487_v52 = vld [vmem:[%s7914_s5 + $0x1a0] sm:$0xff] }
  0x19   :  { %8080 = vst [vmem:[#allocation44_spill] sm:$0xff] %v5477_v50  ;;  %8081 = vst [vmem:[#allocation45_spill] sm:$0xff] %v5482_v51  ;;  %v5492_v53 = vld [vmem:[%s7914_s5 + $0x1a8] sm:$0xff]  ;;  %v5497_v54 = vld [vmem:[%s7914_s5 + $0x1b0] sm:$0xff] }
  0x1a   :  { %8082 = vst [vmem:[#allocation46_spill] sm:$0xff] %v5487_v52  ;;  %8083 = vst [vmem:[#allocation47_spill] sm:$0xff] %v5492_v53  ;;  %v5502_v55 = vld [vmem:[%s7914_s5 + $0x1b8] sm:$0xff]  ;;  %v5507_v56 = vld [vmem:[%s7914_s5 + $0x1c0] sm:$0xff] }
  0x1b   :  { %8084 = vst [vmem:[#allocation48_spill] sm:$0xff] %v5497_v54  ;;  %8085 = vst [vmem:[#allocation49_spill] sm:$0xff] %v5502_v55  ;;  %v5512_v57 = vld [vmem:[%s7914_s5 + $0x1c8] sm:$0xff]  ;;  %v5517_v58 = vld [vmem:[%s7914_s5 + $0x1d0] sm:$0xff] }
  0x1c   :  { %8086 = vst [vmem:[#allocation50_spill] sm:$0xff] %v5507_v56  ;;  %8087 = vst [vmem:[#allocation51_spill] sm:$0xff] %v5512_v57  ;;  %v5522_v59 = vld [vmem:[%s7914_s5 + $0x1d8] sm:$0xff]  ;;  %v5527_v60 = vld [vmem:[%s7914_s5 + $0x1e0] sm:$0xff] }
  0x1d   :  { %8088 = vst [vmem:[#allocation52_spill] sm:$0xff] %v5517_v58  ;;  %8089 = vst [vmem:[#allocation53_spill] sm:$0xff] %v5522_v59  ;;  %v5532_v61 = vld [vmem:[%s7914_s5 + $0x1e8] sm:$0xff]  ;;  %v5537_v62 = vld [vmem:[%s7914_s5 + $0x1f0] sm:$0xff] }
  0x1e   :  { %8090 = vst [vmem:[#allocation54_spill] sm:$0xff] %v5527_v60  ;;  %8091 = vst [vmem:[#allocation55_spill] sm:$0xff] %v5532_v61  ;;  %v5542_v63 = vld [vmem:[%s7914_s5 + $0x1f8] sm:$0xff]  ;;  %v193_v56 = vld [vmem:[%s7909_s0 + $0x20] sm:$0xff] }
  0x1f   :  { %8092 = vst [vmem:[#allocation56_spill] sm:$0xff] %v5537_v62  ;;  %8093 = vst [vmem:[#allocation57_spill] sm:$0xff] %v5542_v63  ;;  %v194_v60 = vld [vmem:[%s7909_s0 + $0x28] sm:$0xff]  ;;  %v189_v61 = vld [vmem:[%s7909_s0] sm:$0xff] }
  0x20   :  { %v4363_v58 = vpack.i.bf16 %v194_v60, %v193_v56  ;;  %v190_v62 = vld [vmem:[%s7909_s0 + $0x8] sm:$0xff]  ;;  %v195_v63 = vld [vmem:[%s7909_s0 + $0x30] sm:$0xff]  ;;  %v196_v57 = vld [vmem:[%s7909_s0 + $0x38] sm:$0xff] }
  0x21   :  { %v4353_v59 = vpack.i.bf16 %v190_v62, %v189_v61  ;;  %v191_v52 = vld [vmem:[%s7909_s0 + $0x10] sm:$0xff]  ;;  %v192_v56 = vld [vmem:[%s7909_s0 + $0x18] sm:$0xff]  ;;  %v4368_v60 = vpack.i.bf16 %v196_v57, %v195_v63  ;;  %v197_v62 = vld [vmem:[%s7909_s0 + $0x40] sm:$0xff] }
  0x22   :  { %4364 = vrot.lane.b32.xlu1 %v4363_v58, %s5177_s20  ;;  %v4358_v54 = vpack.i.bf16 %v192_v56, %v191_v52  ;;  %v199_v53 = vld [vmem:[%s7909_s0 + $0x50] sm:$0xff]  ;;  %v200_v61 = vld [vmem:[%s7909_s0 + $0x58] sm:$0xff]  ;;  %v198_v58 = vld [vmem:[%s7909_s0 + $0x48] sm:$0xff] }
  0x23   :  { %4354 = vrot.lane.b32.xlu0 %v4353_v59, %s5177_s20  ;;  %v4378_v57 = vpack.i.bf16 %v200_v61, %v199_v53  ;;  %v4373_v52 = vpack.i.bf16 %v198_v58, %v197_v62  ;;  %v203_v59 = vld [vmem:[%s7909_s0 + $0x70] sm:$0xff]  ;;  %v204_v63 = vld [vmem:[%s7909_s0 + $0x78] sm:$0xff]  ;;  %v201_v56 = vld [vmem:[%s7909_s0 + $0x60] sm:$0xff] }
  0x24   :  { %v4388_v53 = vpack.i.bf16 %v204_v63, %v203_v59  ;;  %v207_v61 = vld [vmem:[%s7909_s0 + $0x90] sm:$0xff]  ;;  %v208_v62 = vld [vmem:[%s7909_s0 + $0x98] sm:$0xff]  ;;  %v205_v58 = vld [vmem:[%s7909_s0 + $0x80] sm:$0xff] }
  0x26   :  { %4369 = vrot.lane.b32.xlu1 %v4368_v60, %s5177_s20  ;;  %v202_v60 = vld [vmem:[%s7909_s0 + $0x68] sm:$0xff] }
  0x27   :  { %4359 = vrot.lane.b32.xlu0 %v4358_v54, %s5177_s20  ;;  %v4383_v54 = vpack.i.bf16 %v202_v60, %v201_v56 }
  0x2a   :  { %4379 = vrot.lane.b32.xlu1 %v4378_v57, %s5177_s20  ;;  %v206_v57 = vld [vmem:[%s7909_s0 + $0x88] sm:$0xff] }
  0x2b   :  { %4374 = vrot.lane.b32.xlu0 %v4373_v52, %s5177_s20 }
  0x2c   :  { %188 = vsyncadd [#allocation3], 8192  ;;  %v4398_v52 = vpack.i.bf16 %v208_v62, %v207_v61  ;;  %v4393_v59 = vpack.i.bf16 %v206_v57, %v205_v58  ;;  %v211_v63 = vld [vmem:[%s7909_s0 + $0xb0] sm:$0xff]  ;;  %v212_v56 = vld [vmem:[%s7909_s0 + $0xb8] sm:$0xff]  ;;  %vm317_vm0 = vcmask 121856   ;;  %vm382_vm1 = vcmask 678912  }
  0x2d   :  { %v209_v60 = vld [vmem:[%s7909_s0 + $0xa0] sm:$0xff]  ;;  %v215_v62 = vld [vmem:[%s7909_s0 + $0xd0] sm:$0xff]  ;;  %v216_v58 = vld [vmem:[%s7909_s0 + $0xd8] sm:$0xff]  ;;  %s5181_s23 = smov 112   ;;  %s5182_s30 = smov 127   ;;  %vm514_vm5 = vcmask 932864  }
  0x2e   :  { %4389 = vrot.lane.b32.xlu1 %v4388_v53, %s5177_s20  ;;  %v210_v53 = vld [vmem:[%s7909_s0 + $0xa8] sm:$0xff]  ;;  %v213_v57 = vld [vmem:[%s7909_s0 + $0xc0] sm:$0xff]  ;;  %vm5669_vm2 = vmneg %vm317_vm0  ;;  %s5183_s7 = smov 126   ;;  %vm810_vm6 = vcmask 924672   ;;  %s5184_s5 = smov 99   ;;  %vm1219_vm7 = vcmask 916480  }
  0x2f   :  { %4384 = vrot.lane.b32.xlu0 %v4383_v54, %s5177_s20  ;;  %v4408_v54 = vpack.i.bf16 %v212_v56, %v211_v63  ;;  %v4403_v61 = vpack.i.bf16 %v210_v53, %v209_v60  ;;  %v219_v56 = vld [vmem:[%s7909_s0 + $0xf0] sm:$0xff]  ;;  %v220_v60 = vld [vmem:[%s7909_s0 + $0xf8] sm:$0xff]  ;;  %v217_v53 = vld [vmem:[%s7909_s0 + $0xe0] sm:$0xff]  ;;  %s5185_s16 = smov 100   ;;  %vm1012_vm8 = vcmask 1039360   ;;  %vm1421_vm9 = vcmask 1031168  }
  0x30   :  { %vm5684_vm3 = vmpackc.low %vm382_vm1, %vm382_vm1  ;;  %v399_v41 = vld [vmem:[%s7910_s1] sm:$0xff]  ;;  %s5186_s28 = smov 98   ;;  %vm2301_vm10 = vcmask 556032   ;;  %vm1843_vm11 = vcmask 809984   ;;  %vm1628_vm12 = vcmask 818176   ;;  %vm2058_vm13 = vcmask 801792  }
  0x31   :  { %vm5692_vm4 = vmpackc.low %vm5669_vm2, %vm5669_vm2  ;;  %v6702_v19 = vld [vmem:[%s7911_s2 + $0x150] sm:$0xff] }
  0x32   :  { %4399 = vrot.lane.b32.xlu1 %v4398_v52, %s5177_s20  ;;  %v214_v52 = vld [vmem:[%s7909_s0 + $0xc8] sm:$0xff] }
  0x33   :  { %4394 = vrot.lane.b32.xlu0 %v4393_v59, %s5177_s20  ;;  %v4418_v59 = vpack.i.bf16 %v216_v58, %v215_v62  ;;  %v4413_v63 = vpack.i.bf16 %v214_v52, %v213_v57 }
  0x36   :  { %4409 = vrot.lane.b32.xlu1 %v4408_v54, %s5177_s20  ;;  %v218_v54 = vld [vmem:[%s7909_s0 + $0xe8] sm:$0xff]  ;;  %s5178_s0 = smov 114  }
  0x37   :  { %4404 = vrot.lane.b32.xlu0 %v4403_v61, %s5177_s20  ;;  %v4428_v61 = vpack.i.bf16 %v220_v60, %v219_v56  ;;  %v4423_v62 = vpack.i.bf16 %v218_v54, %v217_v53 }
  0x3a   :  { %4419 = vrot.lane.b32.xlu1 %v4418_v59, %s5177_s20 }
  0x3b   :  { %4414 = vrot.lane.b32.xlu0 %v4413_v63, %s5177_s20 }
  0x3e   :  { %4429 = vrot.lane.b32.xlu1 %v4428_v61, %s5177_s20 }
  0x3f   :  { %4424 = vrot.lane.b32.xlu0 %v4423_v62, %s5177_s20  ;;  %s5179_s20 = smov 113  }
  0x94   :  { %v4365_v58 = vpop.permute.xlu1 %4364 }
  0x95   :  { %v4367_v57 = vunpack.i.h.bf16 %v4365_v58  ;;  %v5656_v52 = vunpack.i.l.bf16 %v4365_v58  ;;  %v4355_v55 = vpop.permute.xlu0 %4354 }
  0x96   :  { %v4357_v48 = vunpack.i.h.bf16 %v4355_v55  ;;  %v4356_v50 = vunpack.i.l.bf16 %v4355_v55 }
  0x97   :  { %v320_v59 = vsel %vm317_vm0, %v5656_v52, %v4367_v57  ;;  %v368_v63 = vsel %vm317_vm0, 0.0, %v5656_v52 }
  0x98   :  { %v385_v56 = vsel %vm382_vm1, %v320_v59, 0.0  ;;  %v318_v60 = vsel %vm317_vm0, %v4356_v50, %v4357_v48  ;;  %v366_v53 = vsel %vm317_vm0, 0.0, %v4356_v50  ;;  %v4370_v54 = vpop.permute.xlu1 %4369 }
  0x99   :  { %v383_v61 = vsel %vm382_vm1, %v318_v60, 0.0  ;;  %v4372_v62 = vunpack.i.h.bf16 %v4370_v54  ;;  %v4371_v58 = vunpack.i.l.bf16 %v4370_v54  ;;  %v4360_v49 = vpop.permute.xlu0 %4359  ;;  %v5674_v48 = vpack.i.bf16 %v385_v56, %v368_v63 }
  0x9a   :  { %v4362_v51 = vunpack.i.h.bf16 %v4360_v49  ;;  %v4361_v55 = vunpack.i.l.bf16 %v4360_v49  ;;  %v5666_v44 = vpack.i.bf16 %v383_v61, %v366_v53  ;;  %v400_v53 = vld [vmem:[%s7910_s1 + $0x8] sm:$0xff] }
  0x9b   :  { %v321_v46 = vsel %vm317_vm0, %v4371_v58, %v4372_v62  ;;  %v369_v45 = vsel %vm317_vm0, 0.0, %v4371_v58 }
  0x9c   :  { %v386_v47 = vsel %vm382_vm1, %v321_v46, 0.0  ;;  %v367_v54 = vsel %vm317_vm0, 0.0, %v4361_v55  ;;  %4434 = vrot.lane.b32.xlu0 %v5666_v44, %s5178_s0  ;;  %v319_v49 = vsel %vm317_vm0, %v4361_v55, %v4362_v51  ;;  %v4380_v63 = vpop.permute.xlu1 %4379  ;;  %v4004_v38 = vpack.c.bf16 %v4361_v55, %v4356_v50 }
  0x9d   :  { %v4375_v56 = vpop.permute.xlu0 %4374  ;;  %v384_v61 = vsel %vm382_vm1, %v319_v49, 0.0  ;;  %v4001_v62 = vpack.c.bf16 %v319_v49, %v318_v60  ;;  %v4382_v40 = vunpack.i.h.bf16 %v4380_v63  ;;  %v4381_v42 = vunpack.i.l.bf16 %v4380_v63 }
  0x9e   :  { %v4377_v51 = vunpack.i.h.bf16 %v4375_v56  ;;  %v4376_v43 = vunpack.i.l.bf16 %v4375_v56  ;;  %v5696_v36 = vpack.i.bf16 %v384_v61, %v367_v54  ;;  %v4007_v49 = vpack.c.bf16 %v321_v46, %v320_v59 }
  0x9f   :  { %4003 = vmatprep.subr.msk.bf16.mxu0 %vm5684_vm3, %v4001_v62  ;;  %v323_v37 = vsel %vm317_vm0, %v4381_v42, %v4382_v40  ;;  %v371_v60 = vsel %vm317_vm0, 0.0, %v4381_v42  ;;  %v5709_v55 = vpack.i.bf16 %v386_v47, %v369_v45 }
  0xa0   :  { %v322_v57 = vsel %vm317_vm0, %v4376_v43, %v4377_v51  ;;  %v370_v63 = vsel %vm317_vm0, 0.0, %v4376_v43  ;;  %v388_v39 = vsel %vm382_vm1, %v323_v37, 0.0  ;;  %4439 = vrot.lane.b32.xlu1 %v5696_v36, %s5178_s0  ;;  %4006 = vmatpush1.bf16.msk.msra.mxu0 %vm5692_vm4, %v4004_v38  ;;  %v4390_v50 = vpop.permute.xlu1 %4389  ;;  %v4010_v51 = vpack.c.bf16 %v4371_v58, %v5656_v52 }
  0xa1   :  { %v387_v40 = vsel %vm382_vm1, %v322_v57, 0.0  ;;  %4444 = vrot.lane.b32.xlu0 %v5674_v48, %s5178_s0  ;;  %v4385_v46 = vpop.permute.xlu0 %4384  ;;  %4009 = vmatprep.subr.msk.bf16.mxu0 %vm5684_vm3, %v4007_v49  ;;  %v4392_v59 = vunpack.i.h.bf16 %v4390_v50  ;;  %v4391_v54 = vunpack.i.l.bf16 %v4390_v50  ;;  %v4013_v56 = vpack.c.bf16 %v323_v37, %v322_v57 }
  0xa2   :  { %v4387_v61 = vunpack.i.h.bf16 %v4385_v46  ;;  %v4386_v62 = vunpack.i.l.bf16 %v4385_v46  ;;  %v5717_v38 = vpack.i.bf16 %v387_v40, %v370_v63  ;;  %v5720_v47 = vpack.i.bf16 %v388_v39, %v371_v60 }
  0xa3   :  { %v325_v45 = vsel %vm317_vm0, %v4391_v54, %v4392_v59  ;;  %v373_v33 = vsel %vm317_vm0, 0.0, %v4391_v54  ;;  %v4016_v40 = vpack.c.bf16 %v4381_v42, %v4376_v43 }
  0xa4   :  { %v324_v32 = vsel %vm317_vm0, %v4386_v62, %v4387_v61  ;;  %v372_v34 = vsel %vm317_vm0, 0.0, %v4386_v62  ;;  %v390_v49 = vsel %vm382_vm1, %v325_v45, 0.0  ;;  %4449 = vrot.lane.b32.xlu1 %v5709_v55, %s5178_s0  ;;  %4012 = vmatpush1.bf16.msk.msra.mxu0 %vm5692_vm4, %v4010_v51  ;;  %v4400_v37 = vpop.permute.xlu1 %4399 }
  0xa5   :  { %v389_v52 = vsel %vm382_vm1, %v324_v32, 0.0  ;;  %4454 = vrot.lane.b32.xlu0 %v5717_v38, %s5178_s0  ;;  %v4395_v39 = vpop.permute.xlu0 %4394  ;;  %4015 = vmatprep.subr.msk.bf16.mxu0 %vm5684_vm3, %v4013_v56  ;;  %v4402_v58 = vunpack.i.h.bf16 %v4400_v37  ;;  %v4401_v60 = vunpack.i.l.bf16 %v4400_v37  ;;  %v4019_v57 = vpack.c.bf16 %v325_v45, %v324_v32 }
  0xa6   :  { %v4397_v63 = vunpack.i.h.bf16 %v4395_v39  ;;  %v4396_v50 = vunpack.i.l.bf16 %v4395_v39  ;;  %v5735_v46 = vpack.i.bf16 %v389_v52, %v372_v34  ;;  %v5738_v61 = vpack.i.bf16 %v390_v49, %v373_v33 }
  0xa7   :  { %v327_v59 = vsel %vm317_vm0, %v4401_v60, %v4402_v58  ;;  %v375_v28 = vsel %vm317_vm0, 0.0, %v4401_v60  ;;  %v4022_v52 = vpack.c.bf16 %v4391_v54, %v4386_v62 }
  0xa8   :  { %v326_v51 = vsel %vm317_vm0, %v4396_v50, %v4397_v63  ;;  %v374_v35 = vsel %vm317_vm0, 0.0, %v4396_v50  ;;  %v392_v56 = vsel %vm382_vm1, %v327_v59, 0.0  ;;  %4459 = vrot.lane.b32.xlu1 %v5720_v47, %s5178_s0  ;;  %4018 = vmatpush1.bf16.msk.msra.mxu0 %vm5692_vm4, %v4016_v40  ;;  %v4410_v32 = vpop.permute.xlu1 %4409 }
  0xa9   :  { %v391_v34 = vsel %vm382_vm1, %v326_v51, 0.0  ;;  %4464 = vrot.lane.b32.xlu0 %v5735_v46, %s5178_s0  ;;  %v4405_v33 = vpop.permute.xlu0 %4404  ;;  %4021 = vmatprep.subr.msk.bf16.mxu0 %vm5684_vm3, %v4019_v57  ;;  %v4412_v42 = vunpack.i.h.bf16 %v4410_v32  ;;  %v4411_v43 = vunpack.i.l.bf16 %v4410_v32  ;;  %v4025_v45 = vpack.c.bf16 %v327_v59, %v326_v51 }
  0xaa   :  { %v4407_v49 = vunpack.i.h.bf16 %v4405_v33  ;;  %v4406_v37 = vunpack.i.l.bf16 %v4405_v33  ;;  %v5753_v39 = vpack.i.bf16 %v391_v34, %v374_v35  ;;  %v5756_v63 = vpack.i.bf16 %v392_v56, %v375_v28 }
  0xab   :  { %v329_v58 = vsel %vm317_vm0, %v4411_v43, %v4412_v42  ;;  %v377_v29 = vsel %vm317_vm0, 0.0, %v4411_v43  ;;  %v4028_v34 = vpack.c.bf16 %v4401_v60, %v4396_v50 }
  0xac   :  { %v328_v40 = vsel %vm317_vm0, %v4406_v37, %v4407_v49  ;;  %v376_v30 = vsel %vm317_vm0, 0.0, %v4406_v37  ;;  %v394_v57 = vsel %vm382_vm1, %v329_v58, 0.0  ;;  %4469 = vrot.lane.b32.xlu1 %v5738_v61, %s5178_s0  ;;  %4024 = vmatpush1.bf16.msk.msra.mxu0 %vm5692_vm4, %v4022_v52  ;;  %v4420_v35 = vpop.permute.xlu1 %4419 }
  0xad   :  { %v393_v54 = vsel %vm382_vm1, %v328_v40, 0.0  ;;  %4474 = vrot.lane.b32.xlu0 %v5753_v39, %s5178_s0  ;;  %v4415_v28 = vpop.permute.xlu0 %4414  ;;  %4027 = vmatprep.subr.msk.bf16.mxu0 %vm5684_vm3, %v4025_v45  ;;  %v4422_v62 = vunpack.i.h.bf16 %v4420_v35  ;;  %v4421_v59 = vunpack.i.l.bf16 %v4420_v35  ;;  %v4031_v51 = vpack.c.bf16 %v329_v58, %v328_v40 }
  0xae   :  { %v4417_v56 = vunpack.i.h.bf16 %v4415_v28  ;;  %v4416_v32 = vunpack.i.l.bf16 %v4415_v28  ;;  %v5771_v33 = vpack.i.bf16 %v393_v54, %v376_v30  ;;  %v5774_v49 = vpack.i.bf16 %v394_v57, %v377_v29 }
  0xaf   :  { %v331_v42 = vsel %vm317_vm0, %v4421_v59, %v4422_v62  ;;  %v379_v24 = vsel %vm317_vm0, 0.0, %v4421_v59  ;;  %v4034_v54 = vpack.c.bf16 %v4411_v43, %v4406_v37 }
  0xb0   :  { %v330_v52 = vsel %vm317_vm0, %v4416_v32, %v4417_v56  ;;  %v378_v31 = vsel %vm317_vm0, 0.0, %v4416_v32  ;;  %v396_v45 = vsel %vm382_vm1, %v331_v42, 0.0  ;;  %4479 = vrot.lane.b32.xlu1 %v5756_v63, %s5178_s0  ;;  %4030 = vmatpush1.bf16.msk.msra.mxu0 %vm5692_vm4, %v4028_v34  ;;  %v4430_v30 = vpop.permute.xlu1 %4429 }
  0xb1   :  { %v395_v60 = vsel %vm382_vm1, %v330_v52, 0.0  ;;  %4484 = vrot.lane.b32.xlu0 %v5771_v33, %s5178_s0  ;;  %v4425_v29 = vpop.permute.xlu0 %4424  ;;  %4033 = vmatprep.subr.msk.bf16.mxu0 %vm5684_vm3, %v4031_v51  ;;  %v4432_v50 = vunpack.i.h.bf16 %v4430_v30  ;;  %v4431_v58 = vunpack.i.l.bf16 %v4430_v30  ;;  %v4037_v40 = vpack.c.bf16 %v331_v42, %v330_v52 }
  0xb2   :  { %v4427_v57 = vunpack.i.h.bf16 %v4425_v29  ;;  %v4426_v35 = vunpack.i.l.bf16 %v4425_v29  ;;  %v5789_v28 = vpack.i.bf16 %v395_v60, %v378_v31  ;;  %v5798_v51 = vpack.i.bf16 %v396_v45, %v379_v24  ;;  %v402_v60 = vld [vmem:[%s7910_s1 + $0x18] sm:$0xff] }
  0xb3   :  { %v333_v62 = vsel %vm317_vm0, %v4431_v58, %v4432_v50  ;;  %v381_v43 = vsel %vm317_vm0, 0.0, %v4431_v58  ;;  %v4040_v52 = vpack.c.bf16 %v4421_v59, %v4416_v32  ;;  %v5180_v59 = vmov 0.0   ;;  %v401_v32 = vld [vmem:[%s7910_s1 + $0x10] sm:$0xff] }
  0xb4   :  { %v332_v56 = vsel %vm317_vm0, %v4426_v35, %v4427_v57  ;;  %v380_v34 = vsel %vm317_vm0, 0.0, %v4426_v35  ;;  %4489 = vrot.lane.b32.xlu1 %v5774_v49, %s5178_s0  ;;  %4036 = vmatpush1.bf16.msk.msra.mxu0 %vm5692_vm4, %v4034_v54  ;;  %v398_v31 = vsel %vm382_vm1, %v333_v62, 0.0  ;;  %v4046_v45 = vpack.c.bf16 %v4431_v58, %v4426_v35 }
  0xb5   :  { %v397_v42 = vsel %vm382_vm1, %v332_v56, 0.0  ;;  %4494 = vrot.lane.b32.xlu0 %v5789_v28, %s5178_s0  ;;  %4039 = vmatprep.subr.msk.bf16.mxu0 %vm5684_vm3, %v4037_v40  ;;  %v4043_v37 = vpack.c.bf16 %v333_v62, %v332_v56  ;;  %v5813_v24 = vpack.i.bf16 %v398_v31, %v381_v43 }
  0xb6   :  { %v5807_v30 = vpack.i.bf16 %v397_v42, %v380_v34  ;;  %627 = vmatprep.mubr.f32.mxu1 %v5180_v59  ;;  %716 = vmatprep.mubr.f32.mxu0 %v5180_v59 }
  0xb8   :  { %4499 = vrot.lane.b32.xlu1 %v5798_v51, %s5178_s0  ;;  %4042 = vmatpush1.bf16.msk.msra.mxu0 %vm5692_vm4, %v4040_v52 }
  0xb9   :  { %4504 = vrot.lane.b32.xlu0 %v5807_v30, %s5178_s0  ;;  %4045 = vmatprep.subr.msk.bf16.mxu0 %vm5684_vm3, %v4043_v37 }
  0xbc   :  { %4509 = vrot.lane.b32.xlu1 %v5813_v24, %s5178_s0  ;;  %4048 = vmatpush1.bf16.msk.msra.mxu0 %vm5692_vm4, %v4046_v45 }
  0xbd   :  { %4514 = vrot.lane.b32.xlu0 %v5666_v44, %s5179_s20 }
  0xbf   :  { %717 = vmatmul.mubr.f32.vlgmr.msra.gmra.mrb[0].mxu0 %v399_v41 }
  0xc0   :  { %4519 = vrot.lane.b32.xlu1 %v5696_v36, %s5179_s20  ;;  %722 = vmatprep.mubr.f32.mxu0 %v5180_v59 }
  0xc1   :  { %4524 = vrot.lane.b32.xlu0 %v5674_v48, %s5179_s20 }
  0xc3   :  { %723 = vmatmul.mubr.f32.gmra.mrb[2].mxu0 %v400_v53 }
  0xc4   :  { %4529 = vrot.lane.b32.xlu1 %v5709_v55, %s5179_s20  ;;  %728 = vmatprep.mubr.f32.mxu0 %v5180_v59 }
  0xc5   :  { %4534 = vrot.lane.b32.xlu0 %v5717_v38, %s5179_s20 }
  0xc7   :  { %729 = vmatmul.mubr.f32.gmra.mrb[4].mxu0 %v401_v32 }
  0xc8   :  { %4539 = vrot.lane.b32.xlu1 %v5720_v47, %s5179_s20  ;;  %734 = vmatprep.mubr.f32.mxu0 %v5180_v59 }
  0xc9   :  { %4544 = vrot.lane.b32.xlu0 %v5735_v46, %s5179_s20 }
  0xcb   :  { %735 = vmatmul.mubr.f32.gmra.mrb[6].mxu0 %v402_v60 }
  0xcc   :  { %4549 = vrot.lane.b32.xlu1 %v5738_v61, %s5179_s20  ;;  %1332 = vmatprep.mubr.f32.mxu0 %v5180_v59 }
  0xcd   :  { %4554 = vrot.lane.b32.xlu0 %v5753_v39, %s5179_s20 }
  0xd0   :  { %4559 = vrot.lane.b32.xlu1 %v5756_v63, %s5179_s20 }
  0xd1   :  { %4564 = vrot.lane.b32.xlu0 %v5666_v44, %s5181_s23 }
  0xd4   :  { %4569 = vrot.lane.b32.xlu1 %v5696_v36, %s5181_s23 }
  0xd5   :  { %4574 = vrot.lane.b32.xlu0 %v5674_v48, %s5181_s23 }
  0xd8   :  { %4579 = vrot.lane.b32.xlu1 %v5709_v55, %s5181_s23 }
  0xd9   :  { %4584 = vrot.lane.b32.xlu0 %v5717_v38, %s5181_s23 }
  0xdc   :  { %4589 = vrot.lane.b32.xlu1 %v5720_v47, %s5181_s23 }
  0xdd   :  { %4594 = vrot.lane.b32.xlu0 %v5735_v46, %s5181_s23 }
  0xe0   :  { %4599 = vrot.lane.b32.xlu1 %v5738_v61, %s5181_s23 }
  0xe1   :  { %4604 = vrot.lane.b32.xlu0 %v5753_v39, %s5181_s23 }
  0xe4   :  { %4609 = vrot.lane.b32.xlu1 %v5756_v63, %s5181_s23 }
  0xe5   :  { %4614 = vrot.lane.b32.xlu0 %v5771_v33, %s5179_s20 }
  0xe8   :  { %4619 = vrot.lane.b32.xlu1 %v5774_v49, %s5179_s20 }
  0xe9   :  { %4624 = vrot.lane.b32.xlu0 %v5771_v33, %s5181_s23 }
  0xec   :  { %4629 = vrot.lane.b32.xlu1 %v5774_v49, %s5181_s23 }
  0xed   :  { %4634 = vrot.lane.b32.xlu0 %v5789_v28, %s5179_s20 }
  0xf0   :  { %4639 = vrot.lane.b32.xlu1 %v5798_v51, %s5179_s20 }
  0xf1   :  { %4644 = vrot.lane.b32.xlu0 %v5789_v28, %s5181_s23 }
  0xf4   :  { %4649 = vrot.lane.b32.xlu1 %v5798_v51, %s5181_s23 }
  0xf5   :  { %4654 = vrot.lane.b32.xlu0 %v5807_v30, %s5179_s20 }
  0xf8   :  { %4659 = vrot.lane.b32.xlu1 %v5813_v24, %s5179_s20 }
  0xf9   :  { %4664 = vrot.lane.b32.xlu0 %v5807_v30, %s5181_s23 }
  0xfc   :  { %4669 = vrot.lane.b32.xlu1 %v5813_v24, %s5181_s23 }
  0xfd   :  { %4674 = vrot.lane.b32.xlu0 %v5666_v44, %s5182_s30 }
 0x100   :  { %4679 = vrot.lane.b32.xlu1 %v5696_v36, %s5182_s30 }
 0x101   :  { %4684 = vrot.lane.b32.xlu0 %v5666_v44, %s5183_s7 }
 0x104   :  { %4689 = vrot.lane.b32.xlu1 %v5696_v36, %s5183_s7 }
 0x105   :  { %4694 = vrot.lane.b32.xlu0 %v5674_v48, %s5182_s30 }
 0x108   :  { %4699 = vrot.lane.b32.xlu1 %v5709_v55, %s5182_s30 }
 0x109   :  { %4704 = vrot.lane.b32.xlu0 %v5674_v48, %s5183_s7 }
 0x10c   :  { %4709 = vrot.lane.b32.xlu1 %v5709_v55, %s5183_s7 }
 0x10d   :  { %4714 = vrot.lane.b32.xlu0 %v5717_v38, %s5182_s30 }
 0x10e   :  { %v4435_v29 = vpop.permute.xlu0 %4434 }
 0x10f   :  { %v4436_v50 = vunpack.i.l.bf16 %v4435_v29  ;;  %v4437_v58 = vunpack.i.h.bf16 %v4435_v29 }
 0x110   :  { %4719 = vrot.lane.b32.xlu1 %v5720_v47, %s5182_s30 }
 0x111   :  { %4724 = vrot.lane.b32.xlu0 %v5717_v38, %s5183_s7  ;;  %v515_v62 = vsel %vm514_vm5, %v4436_v50, %v4437_v58 }
 0x112   :  { %v4440_v40 = vpop.permute.xlu1 %4439 }
 0x113   :  { %v4441_v57 = vunpack.i.l.bf16 %v4440_v40  ;;  %v4445_v35 = vpop.permute.xlu0 %4444  ;;  %v4442_v54 = vunpack.i.h.bf16 %v4440_v40 }
 0x114   :  { %4729 = vrot.lane.b32.xlu1 %v5720_v47, %s5183_s7  ;;  %v4447_v56 = vunpack.i.h.bf16 %v4445_v35  ;;  %v4446_v34 = vunpack.i.l.bf16 %v4445_v35 }
 0x115   :  { %4734 = vrot.lane.b32.xlu0 %v5735_v46, %s5182_s30  ;;  %v3969_v42 = vpack.c.bf16 %v4442_v54, %v4437_v58  ;;  %v516_v43 = vsel %vm514_vm5, %v4441_v57, %v4442_v54 }
 0x116   :  { %v4450_v31 = vpop.permute.xlu1 %4449  ;;  %v3971_v37 = vpack.c.bf16 %v516_v43, %v515_v62  ;;  %v517_v29 = vsel %vm514_vm5, %v4446_v34, %v4447_v56 }
 0x117   :  { %v4452_v52 = vunpack.i.h.bf16 %v4450_v31  ;;  %v4451_v45 = vunpack.i.l.bf16 %v4450_v31  ;;  %v4455_v41 = vpop.permute.xlu0 %4454  ;;  %3970 = vmatprep.subr.bf16.mxu1 %v3969_v42 }
 0x118   :  { %v4457_v53 = vunpack.i.h.bf16 %v4455_v41  ;;  %v4456_v32 = vunpack.i.l.bf16 %v4455_v41  ;;  %4739 = vrot.lane.b32.xlu1 %v5738_v61, %s5182_s30  ;;  %3972 = vmatpush1.bf16.msra.mxu1 %v3971_v37 }
 0x119   :  { %4744 = vrot.lane.b32.xlu0 %v5735_v46, %s5183_s7  ;;  %v3973_v60 = vpack.c.bf16 %v4452_v52, %v4447_v56  ;;  %v518_v50 = vsel %vm514_vm5, %v4451_v45, %v4452_v52 }
 0x11a   :  { %v4460_v58 = vpop.permute.xlu1 %4459  ;;  %v3975_v40 = vpack.c.bf16 %v518_v50, %v517_v29  ;;  %v519_v62 = vsel %vm514_vm5, %v4456_v32, %v4457_v53 }
 0x11b   :  { %v4462_v57 = vunpack.i.h.bf16 %v4460_v58  ;;  %v4461_v35 = vunpack.i.l.bf16 %v4460_v58  ;;  %v4465_v54 = vpop.permute.xlu0 %4464  ;;  %3974 = vmatprep.subr.bf16.mxu1 %v3973_v60 }
 0x11c   :  { %v4467_v42 = vunpack.i.h.bf16 %v4465_v54  ;;  %v4466_v43 = vunpack.i.l.bf16 %v4465_v54  ;;  %4749 = vrot.lane.b32.xlu1 %v5738_v61, %s5183_s7  ;;  %3976 = vmatpush1.bf16.msra.mxu1 %v3975_v40 }
 0x11d   :  { %4754 = vrot.lane.b32.xlu0 %v5753_v39, %s5182_s30  ;;  %v3977_v56 = vpack.c.bf16 %v4462_v57, %v4457_v53  ;;  %v520_v34 = vsel %vm514_vm5, %v4461_v35, %v4462_v57 }
 0x11e   :  { %v4470_v31 = vpop.permute.xlu1 %4469  ;;  %v3979_v37 = vpack.c.bf16 %v520_v34, %v519_v62  ;;  %v521_v32 = vsel %vm514_vm5, %v4466_v43, %v4467_v42 }
 0x11f   :  { %v4472_v52 = vunpack.i.h.bf16 %v4470_v31  ;;  %v4471_v45 = vunpack.i.l.bf16 %v4470_v31  ;;  %v4475_v41 = vpop.permute.xlu0 %4474  ;;  %3978 = vmatprep.subr.bf16.mxu1 %v3977_v56 }
 0x120   :  { %v4477_v60 = vunpack.i.h.bf16 %v4475_v41  ;;  %v4476_v29 = vunpack.i.l.bf16 %v4475_v41  ;;  %4759 = vrot.lane.b32.xlu1 %v5756_v63, %s5182_s30  ;;  %3980 = vmatpush1.bf16.msra.mxu1 %v3979_v37 }
 0x121   :  { %4764 = vrot.lane.b32.xlu0 %v5753_v39, %s5183_s7  ;;  %v3981_v53 = vpack.c.bf16 %v4472_v52, %v4467_v42  ;;  %v522_v50 = vsel %vm514_vm5, %v4471_v45, %v4472_v52 }
 0x122   :  { %v4480_v58 = vpop.permute.xlu1 %4479  ;;  %v3983_v40 = vpack.c.bf16 %v522_v50, %v521_v32  ;;  %v523_v62 = vsel %vm514_vm5, %v4476_v29, %v4477_v60 }
 0x123   :  { %v4482_v57 = vunpack.i.h.bf16 %v4480_v58  ;;  %v4481_v35 = vunpack.i.l.bf16 %v4480_v58  ;;  %v4485_v54 = vpop.permute.xlu0 %4484  ;;  %3982 = vmatprep.subr.bf16.mxu1 %v3981_v53 }
 0x124   :  { %v4487_v43 = vunpack.i.h.bf16 %v4485_v54  ;;  %v4486_v56 = vunpack.i.l.bf16 %v4485_v54  ;;  %4769 = vrot.lane.b32.xlu1 %v5756_v63, %s5183_s7  ;;  %3984 = vmatpush1.bf16.msra.mxu1 %v3983_v40 }
 0x125   :  { %4774 = vrot.lane.b32.xlu0 %v5771_v33, %s5182_s30  ;;  %v3985_v42 = vpack.c.bf16 %v4482_v57, %v4477_v60  ;;  %v524_v34 = vsel %vm514_vm5, %v4481_v35, %v4482_v57 }
 0x126   :  { %v4490_v31 = vpop.permute.xlu1 %4489  ;;  %v3987_v37 = vpack.c.bf16 %v524_v34, %v523_v62  ;;  %v525_v32 = vsel %vm514_vm5, %v4486_v56, %v4487_v43 }
 0x127   :  { %v4492_v52 = vunpack.i.h.bf16 %v4490_v31  ;;  %v4491_v45 = vunpack.i.l.bf16 %v4490_v31  ;;  %v4495_v41 = vpop.permute.xlu0 %4494  ;;  %3986 = vmatprep.subr.bf16.mxu1 %v3985_v42 }
 0x128   :  { %v4497_v29 = vunpack.i.h.bf16 %v4495_v41  ;;  %v4496_v53 = vunpack.i.l.bf16 %v4495_v41  ;;  %4779 = vrot.lane.b32.xlu1 %v5774_v49, %s5182_s30  ;;  %3988 = vmatpush1.bf16.msra.mxu1 %v3987_v37 }
 0x129   :  { %4784 = vrot.lane.b32.xlu0 %v5771_v33, %s5183_s7  ;;  %v3989_v60 = vpack.c.bf16 %v4492_v52, %v4487_v43  ;;  %v526_v50 = vsel %vm514_vm5, %v4491_v45, %v4492_v52 }
 0x12a   :  { %v4500_v58 = vpop.permute.xlu1 %4499  ;;  %v3991_v40 = vpack.c.bf16 %v526_v50, %v525_v32  ;;  %v527_v62 = vsel %vm514_vm5, %v4496_v53, %v4497_v29 }
 0x12b   :  { %v4502_v57 = vunpack.i.h.bf16 %v4500_v58  ;;  %v4501_v35 = vunpack.i.l.bf16 %v4500_v58  ;;  %v4505_v54 = vpop.permute.xlu0 %4504  ;;  %3990 = vmatprep.subr.bf16.mxu1 %v3989_v60 }
 0x12c   :  { %v4507_v56 = vunpack.i.h.bf16 %v4505_v54  ;;  %v4506_v42 = vunpack.i.l.bf16 %v4505_v54  ;;  %4789 = vrot.lane.b32.xlu1 %v5774_v49, %s5183_s7  ;;  %3992 = vmatpush1.bf16.msra.mxu1 %v3991_v40 }
 0x12d   :  { %4794 = vrot.lane.b32.xlu0 %v5789_v28, %s5182_s30  ;;  %v3993_v43 = vpack.c.bf16 %v4502_v57, %v4497_v29  ;;  %v528_v34 = vsel %vm514_vm5, %v4501_v35, %v4502_v57 }
 0x12e   :  { %v4510_v31 = vpop.permute.xlu1 %4509  ;;  %v3995_v37 = vpack.c.bf16 %v528_v34, %v527_v62  ;;  %v529_v32 = vsel %vm514_vm5, %v4506_v42, %v4507_v56  ;;  %v3896_v42 = vld [vmem:[%s7910_s1 + $0x60] sm:$0xff] }
 0x12f   :  { %v4512_v52 = vunpack.i.h.bf16 %v4510_v31  ;;  %v4511_v45 = vunpack.i.l.bf16 %v4510_v31  ;;  %v4515_v41 = vpop.permute.xlu0 %4514  ;;  %3994 = vmatprep.subr.bf16.mxu1 %v3993_v43 }
 0x130   :  { %v4517_v53 = vunpack.i.h.bf16 %v4515_v41  ;;  %v4516_v60 = vunpack.i.l.bf16 %v4515_v41  ;;  %4799 = vrot.lane.b32.xlu1 %v5798_v51, %s5182_s30  ;;  %3996 = vmatpush1.bf16.msra.mxu1 %v3995_v37 }
 0x131   :  { %4804 = vrot.lane.b32.xlu0 %v5789_v28, %s5183_s7  ;;  %v3997_v29 = vpack.c.bf16 %v4512_v52, %v4507_v56  ;;  %v530_v50 = vsel %vm514_vm5, %v4511_v45, %v4512_v52 }
 0x132   :  { %v4520_v58 = vpop.permute.xlu1 %4519  ;;  %v3999_v40 = vpack.c.bf16 %v530_v50, %v529_v32  ;;  %v811_v62 = vsel %vm810_vm6, %v4516_v60, %v4517_v53  ;;  %v3897_v50 = vld [vmem:[%s7910_s1 + $0x68] sm:$0xff] }
 0x133   :  { %v4522_v57 = vunpack.i.h.bf16 %v4520_v58  ;;  %v4521_v35 = vunpack.i.l.bf16 %v4520_v58  ;;  %v4525_v54 = vpop.permute.xlu0 %4524  ;;  %3998 = vmatprep.subr.bf16.mxu1 %v3997_v29 }
 0x134   :  { %4809 = vrot.lane.b32.xlu1 %v5798_v51, %s5183_s7  ;;  %4000 = vmatpush1.bf16.msra.mxu1 %v3999_v40  ;;  %v4527_v43 = vunpack.i.h.bf16 %v4525_v54  ;;  %v4526_v34 = vunpack.i.l.bf16 %v4525_v54 }
 0x135   :  { %v812_v56 = vsel %vm810_vm6, %v4521_v35, %v4522_v57  ;;  %4814 = vrot.lane.b32.xlu0 %v5807_v30, %s5182_s30  ;;  %v4049_v31 = vpack.c.bf16 %v4522_v57, %v4517_v53 }
 0x136   :  { %v4530_v37 = vpop.permute.xlu1 %4529  ;;  %v4051_v52 = vpack.c.bf16 %v812_v56, %v811_v62  ;;  %v813_v58 = vsel %vm810_vm6, %v4526_v34, %v4527_v43  ;;  %v3898_v34 = vld [vmem:[%s7910_s1 + $0x70] sm:$0xff] }
 0x137   :  { %v4532_v45 = vunpack.i.h.bf16 %v4530_v37  ;;  %v4531_v41 = vunpack.i.l.bf16 %v4530_v37  ;;  %v4535_v32 = vpop.permute.xlu0 %4534  ;;  %4050 = vmatprep.subr.bf16.mxu1 %v4049_v31  ;;  %628 = vmatmul.mubr.f32.vlgmr.msra.gmra.mrb[0].mxu1 %v3896_v42 }
 0x138   :  { %v4537_v60 = vunpack.i.h.bf16 %v4535_v32  ;;  %v4536_v29 = vunpack.i.l.bf16 %v4535_v32  ;;  %4819 = vrot.lane.b32.xlu1 %v5813_v24, %s5182_s30  ;;  %4052 = vmatpush1.bf16.msra.mxu1 %v4051_v52 }
 0x139   :  { %v814_v53 = vsel %vm810_vm6, %v4531_v41, %v4532_v45  ;;  %4824 = vrot.lane.b32.xlu0 %v5807_v30, %s5183_s7  ;;  %v4053_v40 = vpack.c.bf16 %v4532_v45, %v4527_v43  ;;  %633 = vmatprep.mubr.f32.mxu1 %v5180_v59 }
 0x13a   :  { %v4540_v57 = vpop.permute.xlu1 %4539  ;;  %v4055_v35 = vpack.c.bf16 %v814_v53, %v813_v58  ;;  %v815_v56 = vsel %vm810_vm6, %v4536_v29, %v4537_v60 }
 0x13b   :  { %v4542_v54 = vunpack.i.h.bf16 %v4540_v57  ;;  %v4541_v62 = vunpack.i.l.bf16 %v4540_v57  ;;  %v4545_v42 = vpop.permute.xlu0 %4544  ;;  %4054 = vmatprep.subr.bf16.mxu1 %v4053_v40  ;;  %634 = vmatmul.mubr.f32.gmra.mrb[2].mxu1 %v3897_v50  ;;  %v3899_v40 = vld [vmem:[%s7910_s1 + $0x78] sm:$0xff] }
 0x13c   :  { %4829 = vrot.lane.b32.xlu1 %v5813_v24, %s5183_s7  ;;  %4056 = vmatpush1.bf16.msra.mxu1 %v4055_v35  ;;  %v4547_v31 = vunpack.i.h.bf16 %v4545_v42  ;;  %v4546_v37 = vunpack.i.l.bf16 %v4545_v42 }
 0x13d   :  { %v816_v43 = vsel %vm810_vm6, %v4541_v62, %v4542_v54  ;;  %4834 = vrot.lane.b32.xlu0 %v5666_v44, %s5184_s5  ;;  %v4057_v52 = vpack.c.bf16 %v4542_v54, %v4537_v60  ;;  %639 = vmatprep.mubr.f32.mxu1 %v5180_v59 }
 0x13e   :  { %v4550_v45 = vpop.permute.xlu1 %4549  ;;  %v4059_v41 = vpack.c.bf16 %v816_v43, %v815_v56  ;;  %v817_v60 = vsel %vm810_vm6, %v4546_v37, %v4547_v31 }
 0x13f   :  { %v4552_v32 = vunpack.i.h.bf16 %v4550_v45  ;;  %v4551_v29 = vunpack.i.l.bf16 %v4550_v45  ;;  %v4555_v50 = vpop.permute.xlu0 %4554  ;;  %4058 = vmatprep.subr.bf16.mxu1 %v4057_v52  ;;  %640 = vmatmul.mubr.f32.gmra.mrb[4].mxu1 %v3898_v34 }
 0x140   :  { %v4557_v58 = vunpack.i.h.bf16 %v4555_v50  ;;  %v4556_v53 = vunpack.i.l.bf16 %v4555_v50  ;;  %4839 = vrot.lane.b32.xlu1 %v5696_v36, %s5184_s5  ;;  %4060 = vmatpush1.bf16.msra.mxu1 %v4059_v41 }
 0x141   :  { %v818_v57 = vsel %vm810_vm6, %v4551_v29, %v4552_v32  ;;  %4844 = vrot.lane.b32.xlu0 %v5666_v44, %s5185_s16  ;;  %v4061_v35 = vpack.c.bf16 %v4552_v32, %v4547_v31  ;;  %645 = vmatprep.mubr.f32.mxu1 %v5180_v59 }
 0x142   :  { %v4560_v54 = vpop.permute.xlu1 %4559  ;;  %v4063_v62 = vpack.c.bf16 %v818_v57, %v817_v60  ;;  %v819_v43 = vsel %vm810_vm6, %v4556_v53, %v4557_v58 }
 0x143   :  { %v4562_v42 = vunpack.i.h.bf16 %v4560_v54  ;;  %v4561_v56 = vunpack.i.l.bf16 %v4560_v54  ;;  %v4565_v34 = vpop.permute.xlu0 %4564  ;;  %4062 = vmatprep.subr.bf16.mxu1 %v4061_v35  ;;  %646 = vmatmul.mubr.f32.gmra.mrb[6].mxu1 %v3899_v40 }
 0x144   :  { %4849 = vrot.lane.b32.xlu1 %v5696_v36, %s5185_s16  ;;  %4064 = vmatpush1.bf16.msra.mxu1 %v4063_v62  ;;  %v4567_v52 = vunpack.i.h.bf16 %v4565_v34  ;;  %v4566_v45 = vunpack.i.l.bf16 %v4565_v34 }
 0x145   :  { %v820_v37 = vsel %vm810_vm6, %v4561_v56, %v4562_v42  ;;  %4854 = vrot.lane.b32.xlu0 %v5674_v48, %s5184_s5  ;;  %v4065_v31 = vpack.c.bf16 %v4562_v42, %v4557_v58  ;;  %923 = vmatprep.mubr.f32.mxu1 %v5180_v59 }
 0x146   :  { %v4570_v41 = vpop.permute.xlu1 %4569  ;;  %v4067_v32 = vpack.c.bf16 %v820_v37, %v819_v43  ;;  %v1220_v57 = vsel %vm1219_vm7, %v4566_v45, %v4567_v52 }
 0x147   :  { %v4572_v29 = vunpack.i.h.bf16 %v4570_v41  ;;  %v4571_v50 = vunpack.i.l.bf16 %v4570_v41  ;;  %v4575_v53 = vpop.permute.xlu0 %4574  ;;  %4066 = vmatprep.subr.bf16.mxu1 %v4065_v31 }
 0x148   :  { %v4577_v40 = vunpack.i.h.bf16 %v4575_v53  ;;  %v4576_v60 = vunpack.i.l.bf16 %v4575_v53  ;;  %4859 = vrot.lane.b32.xlu1 %v5709_v55, %s5184_s5  ;;  %4068 = vmatpush1.bf16.msra.mxu1 %v4067_v32 }
 0x149   :  { %v1221_v35 = vsel %vm1219_vm7, %v4571_v50, %v4572_v29  ;;  %4864 = vrot.lane.b32.xlu0 %v5674_v48, %s5185_s16  ;;  %v4113_v58 = vpack.c.bf16 %v4572_v29, %v4567_v52 }
 0x14a   :  { %v4580_v54 = vpop.permute.xlu1 %4579  ;;  %v4115_v62 = vpack.c.bf16 %v1221_v35, %v1220_v57  ;;  %v1222_v43 = vsel %vm1219_vm7, %v4576_v60, %v4577_v40 }
 0x14b   :  { %v4582_v42 = vunpack.i.h.bf16 %v4580_v54  ;;  %v4581_v56 = vunpack.i.l.bf16 %v4580_v54  ;;  %v4585_v34 = vpop.permute.xlu0 %4584  ;;  %4114 = vmatprep.subr.bf16.mxu0 %v4113_v58 }
 0x14c   :  { %4869 = vrot.lane.b32.xlu1 %v5709_v55, %s5185_s16  ;;  %4116 = vmatpush1.bf16.msra.mxu0 %v4115_v62  ;;  %v4587_v45 = vunpack.i.h.bf16 %v4585_v34  ;;  %v4586_v31 = vunpack.i.l.bf16 %v4585_v34 }
 0x14d   :  { %v1223_v37 = vsel %vm1219_vm7, %v4581_v56, %v4582_v42  ;;  %4874 = vrot.lane.b32.xlu0 %v5717_v38, %s5184_s5  ;;  %v4117_v52 = vpack.c.bf16 %v4582_v42, %v4577_v40 }
 0x14e   :  { %v4590_v41 = vpop.permute.xlu1 %4589  ;;  %v4119_v32 = vpack.c.bf16 %v1223_v37, %v1222_v43  ;;  %v1224_v35 = vsel %vm1219_vm7, %v4586_v31, %v4587_v45 }
 0x14f   :  { %v4592_v29 = vunpack.i.h.bf16 %v4590_v41  ;;  %v4591_v50 = vunpack.i.l.bf16 %v4590_v41  ;;  %v4595_v53 = vpop.permute.xlu0 %4594  ;;  %4118 = vmatprep.subr.bf16.mxu0 %v4117_v52 }
 0x150   :  { %v4597_v57 = vunpack.i.h.bf16 %v4595_v53  ;;  %v4596_v60 = vunpack.i.l.bf16 %v4595_v53  ;;  %4879 = vrot.lane.b32.xlu1 %v5720_v47, %s5184_s5  ;;  %4120 = vmatpush1.bf16.msra.mxu0 %v4119_v32 }
 0x151   :  { %v1225_v58 = vsel %vm1219_vm7, %v4591_v50, %v4592_v29  ;;  %4884 = vrot.lane.b32.xlu0 %v5717_v38, %s5185_s16  ;;  %v4121_v40 = vpack.c.bf16 %v4592_v29, %v4587_v45 }
 0x152   :  { %v4600_v54 = vpop.permute.xlu1 %4599  ;;  %v4123_v62 = vpack.c.bf16 %v1225_v58, %v1224_v35  ;;  %v1226_v43 = vsel %vm1219_vm7, %v4596_v60, %v4597_v57 }
 0x153   :  { %v4602_v42 = vunpack.i.h.bf16 %v4600_v54  ;;  %v4601_v56 = vunpack.i.l.bf16 %v4600_v54  ;;  %v4605_v34 = vpop.permute.xlu0 %4604  ;;  %4122 = vmatprep.subr.bf16.mxu0 %v4121_v40 }
 0x154   :  { %4889 = vrot.lane.b32.xlu1 %v5720_v47, %s5185_s16  ;;  %4124 = vmatpush1.bf16.msra.mxu0 %v4123_v62  ;;  %v4607_v31 = vunpack.i.h.bf16 %v4605_v34  ;;  %v4606_v52 = vunpack.i.l.bf16 %v4605_v34 }
 0x155   :  { %v1227_v37 = vsel %vm1219_vm7, %v4601_v56, %v4602_v42  ;;  %4894 = vrot.lane.b32.xlu0 %v5735_v46, %s5184_s5  ;;  %v4125_v45 = vpack.c.bf16 %v4602_v42, %v4597_v57 }
 0x156   :  { %v4610_v41 = vpop.permute.xlu1 %4609  ;;  %v4127_v32 = vpack.c.bf16 %v1227_v37, %v1226_v43  ;;  %v1228_v58 = vsel %vm1219_vm7, %v4606_v52, %v4607_v31 }
 0x157   :  { %v4612_v29 = vunpack.i.h.bf16 %v4610_v41  ;;  %v4611_v50 = vunpack.i.l.bf16 %v4610_v41  ;;  %v4615_v53 = vpop.permute.xlu0 %4614  ;;  %4126 = vmatprep.subr.bf16.mxu0 %v4125_v45 }
 0x158   :  { %v4617_v35 = vunpack.i.h.bf16 %v4615_v53  ;;  %v4616_v60 = vunpack.i.l.bf16 %v4615_v53  ;;  %4899 = vrot.lane.b32.xlu1 %v5738_v61, %s5184_s5  ;;  %4128 = vmatpush1.bf16.msra.mxu0 %v4127_v32 }
 0x159   :  { %v1229_v40 = vsel %vm1219_vm7, %v4611_v50, %v4612_v29  ;;  %4904 = vrot.lane.b32.xlu0 %v5735_v46, %s5185_s16  ;;  %v4129_v57 = vpack.c.bf16 %v4612_v29, %v4607_v31 }
 0x15a   :  { %v4620_v54 = vpop.permute.xlu1 %4619  ;;  %v4131_v62 = vpack.c.bf16 %v1229_v40, %v1228_v58  ;;  %v821_v43 = vsel %vm810_vm6, %v4616_v60, %v4617_v35 }
 0x15b   :  { %v4622_v42 = vunpack.i.h.bf16 %v4620_v54  ;;  %v4621_v56 = vunpack.i.l.bf16 %v4620_v54  ;;  %v4625_v34 = vpop.permute.xlu0 %4624  ;;  %4130 = vmatprep.subr.bf16.mxu0 %v4129_v57 }
 0x15c   :  { %4909 = vrot.lane.b32.xlu1 %v5738_v61, %s5185_s16  ;;  %4132 = vmatpush1.bf16.msra.mxu0 %v4131_v62  ;;  %v4627_v52 = vunpack.i.h.bf16 %v4625_v34  ;;  %v4626_v45 = vunpack.i.l.bf16 %v4625_v34 }
 0x15d   :  { %v822_v37 = vsel %vm810_vm6, %v4621_v56, %v4622_v42  ;;  %4914 = vrot.lane.b32.xlu0 %v5753_v39, %s5184_s5  ;;  %v4069_v31 = vpack.c.bf16 %v4622_v42, %v4617_v35 }
 0x15e   :  { %v4630_v41 = vpop.permute.xlu1 %4629  ;;  %v4071_v32 = vpack.c.bf16 %v822_v37, %v821_v43  ;;  %v1230_v40 = vsel %vm1219_vm7, %v4626_v45, %v4627_v52 }
 0x15f   :  { %v4632_v29 = vunpack.i.h.bf16 %v4630_v41  ;;  %v4631_v50 = vunpack.i.l.bf16 %v4630_v41  ;;  %v4635_v53 = vpop.permute.xlu0 %4634  ;;  %4070 = vmatprep.subr.bf16.mxu1 %v4069_v31 }
 0x160   :  { %v4637_v58 = vunpack.i.h.bf16 %v4635_v53  ;;  %v4636_v60 = vunpack.i.l.bf16 %v4635_v53  ;;  %4919 = vrot.lane.b32.xlu1 %v5756_v63, %s5184_s5  ;;  %4072 = vmatpush1.bf16.msra.mxu1 %v4071_v32 }
 0x161   :  { %v1231_v57 = vsel %vm1219_vm7, %v4631_v50, %v4632_v29  ;;  %4924 = vrot.lane.b32.xlu0 %v5753_v39, %s5185_s16  ;;  %v4133_v35 = vpack.c.bf16 %v4632_v29, %v4627_v52 }
 0x162   :  { %v4640_v54 = vpop.permute.xlu1 %4639  ;;  %v4135_v62 = vpack.c.bf16 %v1231_v57, %v1230_v40  ;;  %v823_v43 = vsel %vm810_vm6, %v4636_v60, %v4637_v58 }
 0x163   :  { %v4642_v42 = vunpack.i.h.bf16 %v4640_v54  ;;  %v4641_v56 = vunpack.i.l.bf16 %v4640_v54  ;;  %v4645_v34 = vpop.permute.xlu0 %4644  ;;  %4134 = vmatprep.subr.bf16.mxu0 %v4133_v35 }
 0x164   :  { %4929 = vrot.lane.b32.xlu1 %v5756_v63, %s5185_s16  ;;  %4136 = vmatpush1.bf16.msra.mxu0 %v4135_v62  ;;  %v4647_v45 = vunpack.i.h.bf16 %v4645_v34  ;;  %v4646_v31 = vunpack.i.l.bf16 %v4645_v34 }
 0x165   :  { %v824_v37 = vsel %vm810_vm6, %v4641_v56, %v4642_v42  ;;  %4934 = vrot.lane.b32.xlu0 %v5771_v33, %s5184_s5  ;;  %v4073_v52 = vpack.c.bf16 %v4642_v42, %v4637_v58 }
 0x166   :  { %v4650_v41 = vpop.permute.xlu1 %4649  ;;  %v4075_v32 = vpack.c.bf16 %v824_v37, %v823_v43  ;;  %v1232_v57 = vsel %vm1219_vm7, %v4646_v31, %v4647_v45 }
 0x167   :  { %v4652_v29 = vunpack.i.h.bf16 %v4650_v41  ;;  %v4651_v50 = vunpack.i.l.bf16 %v4650_v41  ;;  %v4655_v53 = vpop.permute.xlu0 %4654  ;;  %4074 = vmatprep.subr.bf16.mxu1 %v4073_v52 }
 0x168   :  { %v4657_v40 = vunpack.i.h.bf16 %v4655_v53  ;;  %v4656_v60 = vunpack.i.l.bf16 %v4655_v53  ;;  %4939 = vrot.lane.b32.xlu1 %v5774_v49, %s5184_s5  ;;  %4076 = vmatpush1.bf16.msra.mxu1 %v4075_v32 }
 0x169   :  { %v1233_v35 = vsel %vm1219_vm7, %v4651_v50, %v4652_v29  ;;  %4944 = vrot.lane.b32.xlu0 %v5771_v33, %s5185_s16  ;;  %v4137_v58 = vpack.c.bf16 %v4652_v29, %v4647_v45 }
 0x16a   :  { %v4660_v54 = vpop.permute.xlu1 %4659  ;;  %v4139_v62 = vpack.c.bf16 %v1233_v35, %v1232_v57  ;;  %v825_v43 = vsel %vm810_vm6, %v4656_v60, %v4657_v40  ;;  %v3948_v35 = vld [vmem:[%s7910_s1 + $0x80] sm:$0xff] }
 0x16b   :  { %v4662_v42 = vunpack.i.h.bf16 %v4660_v54  ;;  %v4661_v56 = vunpack.i.l.bf16 %v4660_v54  ;;  %v4665_v34 = vpop.permute.xlu0 %4664  ;;  %4138 = vmatprep.subr.bf16.mxu0 %v4137_v58 }
 0x16c   :  { %4949 = vrot.lane.b32.xlu1 %v5774_v49, %s5185_s16  ;;  %4140 = vmatpush1.bf16.msra.mxu0 %v4139_v62  ;;  %v4667_v31 = vunpack.i.h.bf16 %v4665_v34  ;;  %v4666_v52 = vunpack.i.l.bf16 %v4665_v34 }
 0x16d   :  { %v826_v37 = vsel %vm810_vm6, %v4661_v56, %v4662_v42  ;;  %4954 = vrot.lane.b32.xlu0 %v5789_v28, %s5184_s5  ;;  %v4077_v45 = vpack.c.bf16 %v4662_v42, %v4657_v40 }
 0x16e   :  { %v4670_v41 = vpop.permute.xlu1 %4669  ;;  %v4079_v32 = vpack.c.bf16 %v826_v37, %v825_v43  ;;  %v1234_v58 = vsel %vm1219_vm7, %v4666_v52, %v4667_v31  ;;  %v3952_v52 = vld [vmem:[%s7910_s1 + $0xa0] sm:$0xff] }
 0x16f   :  { %v4672_v29 = vunpack.i.h.bf16 %v4670_v41  ;;  %v4671_v50 = vunpack.i.l.bf16 %v4670_v41  ;;  %v4675_v53 = vpop.permute.xlu0 %4674  ;;  %4078 = vmatprep.subr.bf16.mxu1 %v4077_v45 }
 0x170   :  { %v4677_v57 = vunpack.i.h.bf16 %v4675_v53  ;;  %v4676_v60 = vunpack.i.l.bf16 %v4675_v53  ;;  %4959 = vrot.lane.b32.xlu1 %v5798_v51, %s5184_s5  ;;  %4080 = vmatpush1.bf16.msra.mxu1 %v4079_v32  ;;  %v3949_v53 = vld [vmem:[%s7910_s1 + $0x88] sm:$0xff] }
 0x171   :  { %v1235_v40 = vsel %vm1219_vm7, %v4671_v50, %v4672_v29  ;;  %4964 = vrot.lane.b32.xlu0 %v5789_v28, %s5185_s16  ;;  %v4141_v54 = vpack.c.bf16 %v4672_v29, %v4667_v31 }
 0x172   :  { %v4680_v62 = vpop.permute.xlu1 %4679  ;;  %v4143_v42 = vpack.c.bf16 %v1235_v40, %v1234_v58  ;;  %v1013_v37 = vsel %vm1012_vm8, %v4676_v60, %v4677_v57 }
 0x173   :  { %v4682_v56 = vunpack.i.h.bf16 %v4680_v62  ;;  %v4681_v34 = vunpack.i.l.bf16 %v4680_v62  ;;  %v4685_v43 = vpop.permute.xlu0 %4684  ;;  %4142 = vmatprep.subr.bf16.mxu0 %v4141_v54  ;;  %924 = vmatmul.mubr.f32.vlgmr.msra.gmra.mrb[8].mxu1 %v3948_v35 }
 0x174   :  { %4969 = vrot.lane.b32.xlu1 %v5798_v51, %s5185_s16  ;;  %4144 = vmatpush1.bf16.msra.mxu0 %v4143_v42  ;;  %v4687_v31 = vunpack.i.h.bf16 %v4685_v43  ;;  %v4686_v41 = vunpack.i.l.bf16 %v4685_v43 }
 0x175   :  { %v1014_v45 = vsel %vm1012_vm8, %v4681_v34, %v4682_v56  ;;  %4974 = vrot.lane.b32.xlu0 %v5807_v30, %s5184_s5  ;;  %v4081_v32 = vpack.c.bf16 %v4682_v56, %v4677_v57  ;;  %929 = vmatprep.mubr.f32.mxu1 %v5180_v59  ;;  %v3953_v57 = vld [vmem:[%s7910_s1 + $0xa8] sm:$0xff] }
 0x176   :  { %v4690_v29 = vpop.permute.xlu1 %4689  ;;  %v4083_v50 = vpack.c.bf16 %v1014_v45, %v1013_v37  ;;  %v1422_v62 = vsel %vm1421_vm9, %v4686_v41, %v4687_v31  ;;  %v3950_v37 = vld [vmem:[%s7910_s1 + $0x90] sm:$0xff] }
 0x177   :  { %v4692_v60 = vunpack.i.h.bf16 %v4690_v29  ;;  %v4691_v35 = vunpack.i.l.bf16 %v4690_v29  ;;  %v4695_v58 = vpop.permute.xlu0 %4694  ;;  %4082 = vmatprep.subr.bf16.mxu1 %v4081_v32  ;;  %1333 = vmatmul.mubr.f32.vlgmr.msra.gmra.mrb[8].mxu0 %v3952_v52 }
 0x178   :  { %v4697_v40 = vunpack.i.h.bf16 %v4695_v58  ;;  %v4696_v54 = vunpack.i.l.bf16 %v4695_v58  ;;  %4979 = vrot.lane.b32.xlu1 %v5813_v24, %s5184_s5  ;;  %4084 = vmatpush1.bf16.msra.mxu1 %v4083_v50 }
 0x179   :  { %v1423_v42 = vsel %vm1421_vm9, %v4691_v35, %v4692_v60  ;;  %4984 = vrot.lane.b32.xlu0 %v5807_v30, %s5185_s16  ;;  %v4145_v56 = vpack.c.bf16 %v4692_v60, %v4687_v31  ;;  %930 = vmatmul.mubr.f32.gmra.mrb[10].mxu1 %v3949_v53  ;;  %v3954_v31 = vld [vmem:[%s7910_s1 + $0xb0] sm:$0xff] }
 0x17a   :  { %v4700_v34 = vpop.permute.xlu1 %4699  ;;  %v4147_v43 = vpack.c.bf16 %v1423_v42, %v1422_v62  ;;  %935 = vmatprep.mubr.f32.mxu1 %v5180_v59  ;;  %1338 = vmatprep.mubr.f32.mxu0 %v5180_v59  ;;  %v1015_v32 = vsel %vm1012_vm8, %v4696_v54, %v4697_v40  ;;  %v3951_v54 = vld [vmem:[%s7910_s1 + $0x98] sm:$0xff] }
 0x17b   :  { %v4702_v52 = vunpack.i.h.bf16 %v4700_v34  ;;  %v4701_v45 = vunpack.i.l.bf16 %v4700_v34  ;;  %v4705_v41 = vpop.permute.xlu0 %4704  ;;  %4146 = vmatprep.subr.bf16.mxu0 %v4145_v56  ;;  %1339 = vmatmul.mubr.f32.gmra.mrb[10].mxu0 %v3953_v57 }
 0x17c   :  { %4989 = vrot.lane.b32.xlu1 %v5813_v24, %s5185_s16  ;;  %4148 = vmatpush1.bf16.msra.mxu0 %v4147_v43  ;;  %v4707_v50 = vunpack.i.h.bf16 %v4705_v41  ;;  %v4706_v53 = vunpack.i.l.bf16 %v4705_v41 }
 0x17d   :  { %v1016_v29 = vsel %vm1012_vm8, %v4701_v45, %v4702_v52  ;;  %4994 = vrot.lane.b32.xlu0 %v5666_v44, %s5186_s28  ;;  %v4085_v60 = vpack.c.bf16 %v4702_v52, %v4697_v40  ;;  %936 = vmatmul.mubr.f32.gmra.mrb[12].mxu1 %v3950_v37  ;;  %v3955_v44 = vld [vmem:[%s7910_s1 + $0xb8] sm:$0xff] }
 0x17e   :  { %v4710_v35 = vpop.permute.xlu1 %4709  ;;  %v4087_v58 = vpack.c.bf16 %v1016_v29, %v1015_v32  ;;  %941 = vmatprep.mubr.f32.mxu1 %v5180_v59  ;;  %1344 = vmatprep.mubr.f32.mxu0 %v5180_v59  ;;  %v1424_v40 = vsel %vm1421_vm9, %v4706_v53, %v4707_v50 }
 0x17f   :  { %v4712_v57 = vunpack.i.h.bf16 %v4710_v35  ;;  %v4711_v62 = vunpack.i.l.bf16 %v4710_v35  ;;  %v4715_v42 = vpop.permute.xlu0 %4714  ;;  %4086 = vmatprep.subr.bf16.mxu1 %v4085_v60  ;;  %1345 = vmatmul.mubr.f32.gmra.mrb[12].mxu0 %v3954_v31 }
 0x180   :  { %v4717_v56 = vunpack.i.h.bf16 %v4715_v42  ;;  %v4716_v34 = vunpack.i.l.bf16 %v4715_v42  ;;  %4999 = vrot.lane.b32.xlu1 %v5696_v36, %s5186_s28  ;;  %4088 = vmatpush1.bf16.msra.mxu1 %v4087_v58 }
 0x181   :  { %v1425_v43 = vsel %vm1421_vm9, %v4711_v62, %v4712_v57  ;;  %5004 = vrot.lane.b32.xlu0 %v5674_v48, %s5186_s28  ;;  %v4149_v37 = vpack.c.bf16 %v4712_v57, %v4707_v50  ;;  %942 = vmatmul.mubr.f32.gmra.mrb[14].mxu1 %v3951_v54 }
 0x182   :  { %v4720_v52 = vpop.permute.xlu1 %4719  ;;  %v4151_v45 = vpack.c.bf16 %v1425_v43, %v1424_v40  ;;  %1125 = vmatprep.mubr.f32.mxu1 %v5180_v59  ;;  %1350 = vmatprep.mubr.f32.mxu0 %v5180_v59  ;;  %v1017_v31 = vsel %vm1012_vm8, %v4716_v34, %v4717_v56 }
 0x183   :  { %v4722_v36 = vunpack.i.h.bf16 %v4720_v52  ;;  %v4721_v41 = vunpack.i.l.bf16 %v4720_v52  ;;  %v4725_v32 = vpop.permute.xlu0 %4724  ;;  %4150 = vmatprep.subr.bf16.mxu0 %v4149_v37  ;;  %1351 = vmatmul.mubr.f32.gmra.mrb[14].mxu0 %v3955_v44 }
 0x184   :  { %5009 = vrot.lane.b32.xlu1 %v5709_v55, %s5186_s28  ;;  %4152 = vmatpush1.bf16.msra.mxu0 %v4151_v45  ;;  %v4727_v29 = vunpack.i.h.bf16 %v4725_v32  ;;  %v4726_v50 = vunpack.i.l.bf16 %v4725_v32 }
 0x185   :  { %v1018_v48 = vsel %vm1012_vm8, %v4721_v41, %v4722_v36  ;;  %5014 = vrot.lane.b32.xlu0 %v5717_v38, %s5186_s28  ;;  %v4089_v53 = vpack.c.bf16 %v4722_v36, %v4717_v56  ;;  %1534 = vmatprep.mubr.f32.mxu0 %v5180_v59 }
 0x186   :  { %v4730_v60 = vpop.permute.xlu1 %4729  ;;  %v4091_v35 = vpack.c.bf16 %v1018_v48, %v1017_v31  ;;  %v1426_v55 = vsel %vm1421_vm9, %v4726_v50, %v4727_v29 }
 0x187   :  { %v4732_v58 = vunpack.i.h.bf16 %v4730_v60  ;;  %v4731_v54 = vunpack.i.l.bf16 %v4730_v60  ;;  %v4735_v57 = vpop.permute.xlu0 %4734  ;;  %4090 = vmatprep.subr.bf16.mxu1 %v4089_v53 }
 0x188   :  { %v4737_v62 = vunpack.i.h.bf16 %v4735_v57  ;;  %v4736_v42 = vunpack.i.l.bf16 %v4735_v57  ;;  %5019 = vrot.lane.b32.xlu1 %v5720_v47, %s5186_s28  ;;  %4092 = vmatpush1.bf16.msra.mxu1 %v4091_v35 }
 0x189   :  { %v1427_v34 = vsel %vm1421_vm9, %v4731_v54, %v4732_v58  ;;  %5024 = vrot.lane.b32.xlu0 %v5735_v46, %s5186_s28  ;;  %v4153_v38 = vpack.c.bf16 %v4732_v58, %v4727_v29 }
 0x18a   :  { %v4740_v56 = vpop.permute.xlu1 %4739  ;;  %v4155_v44 = vpack.c.bf16 %v1427_v34, %v1426_v55  ;;  %v1019_v52 = vsel %vm1012_vm8, %v4736_v42, %v4737_v62 }
 0x18b   :  { %v4742_v40 = vunpack.i.h.bf16 %v4740_v56  ;;  %v4741_v43 = vunpack.i.l.bf16 %v4740_v56  ;;  %v4745_v37 = vpop.permute.xlu0 %4744  ;;  %4154 = vmatprep.subr.bf16.mxu0 %v4153_v38 }
 0x18c   :  { %5029 = vrot.lane.b32.xlu1 %v5738_v61, %s5186_s28  ;;  %4156 = vmatpush1.bf16.msra.mxu0 %v4155_v44  ;;  %v4747_v45 = vunpack.i.h.bf16 %v4745_v37  ;;  %v4746_v36 = vunpack.i.l.bf16 %v4745_v37 }
 0x18d   :  { %v1020_v47 = vsel %vm1012_vm8, %v4741_v43, %v4742_v40  ;;  %5034 = vrot.lane.b32.xlu0 %v5753_v39, %s5186_s28  ;;  %v4093_v46 = vpack.c.bf16 %v4742_v40, %v4737_v62 }
 0x18e   :  { %v4750_v41 = vpop.permute.xlu1 %4749  ;;  %v4095_v32 = vpack.c.bf16 %v1020_v47, %v1019_v52  ;;  %v1428_v61 = vsel %vm1421_vm9, %v4746_v36, %v4747_v45 }
 0x18f   :  { %v4752_v31 = vunpack.i.h.bf16 %v4750_v41  ;;  %v4751_v48 = vunpack.i.l.bf16 %v4750_v41  ;;  %v4755_v29 = vpop.permute.xlu0 %4754  ;;  %4094 = vmatprep.subr.bf16.mxu1 %v4093_v46 }
 0x190   :  { %v4757_v50 = vunpack.i.h.bf16 %v4755_v29  ;;  %v4756_v53 = vunpack.i.l.bf16 %v4755_v29  ;;  %5039 = vrot.lane.b32.xlu1 %v5756_v63, %s5186_s28  ;;  %4096 = vmatpush1.bf16.msra.mxu1 %v4095_v32 }
 0x191   :  { %v1429_v60 = vsel %vm1421_vm9, %v4751_v48, %v4752_v31  ;;  %5044 = vrot.lane.b32.xlu0 %v5771_v33, %s5186_s28  ;;  %v4157_v39 = vpack.c.bf16 %v4752_v31, %v4747_v45 }
 0x192   :  { %v4760_v35 = vpop.permute.xlu1 %4759  ;;  %v4159_v58 = vpack.c.bf16 %v1429_v60, %v1428_v61  ;;  %v1021_v42 = vsel %vm1012_vm8, %v4756_v53, %v4757_v50 }
 0x193   :  { %v4762_v54 = vunpack.i.h.bf16 %v4760_v35  ;;  %v4761_v57 = vunpack.i.l.bf16 %v4760_v35  ;;  %v4765_v62 = vpop.permute.xlu0 %4764  ;;  %4158 = vmatprep.subr.bf16.mxu0 %v4157_v39 }
 0x194   :  { %5049 = vrot.lane.b32.xlu1 %v5774_v49, %s5186_s28  ;;  %4160 = vmatpush1.bf16.msra.mxu0 %v4159_v58  ;;  %v4767_v55 = vunpack.i.h.bf16 %v4765_v62  ;;  %v4766_v34 = vunpack.i.l.bf16 %v4765_v62 }
 0x195   :  { %v1022_v63 = vsel %vm1012_vm8, %v4761_v57, %v4762_v54  ;;  %5054 = vrot.lane.b32.xlu0 %v5789_v28, %s5186_s28  ;;  %v4097_v33 = vpack.c.bf16 %v4762_v54, %v4757_v50 }
 0x196   :  { %v4770_v38 = vpop.permute.xlu1 %4769  ;;  %v4099_v56 = vpack.c.bf16 %v1022_v63, %v1021_v42  ;;  %v1430_v49 = vsel %vm1421_vm9, %v4766_v34, %v4767_v55 }
 0x197   :  { %v4772_v44 = vunpack.i.h.bf16 %v4770_v38  ;;  %v4771_v40 = vunpack.i.l.bf16 %v4770_v38  ;;  %v4775_v43 = vpop.permute.xlu0 %4774  ;;  %4098 = vmatprep.subr.bf16.mxu1 %v4097_v33 }
 0x198   :  { %v4777_v37 = vunpack.i.h.bf16 %v4775_v43  ;;  %v4776_v52 = vunpack.i.l.bf16 %v4775_v43  ;;  %5059 = vrot.lane.b32.xlu1 %v5798_v51, %s5186_s28  ;;  %4100 = vmatpush1.bf16.msra.mxu1 %v4099_v56 }
 0x199   :  { %v1431_v47 = vsel %vm1421_vm9, %v4771_v40, %v4772_v44  ;;  %5064 = vrot.lane.b32.xlu0 %v5807_v30, %s5186_s28  ;;  %v4161_v28 = vpack.c.bf16 %v4772_v44, %v4767_v55 }
 0x19a   :  { %v4780_v45 = vpop.permute.xlu1 %4779  ;;  %v4163_v36 = vpack.c.bf16 %v1431_v47, %v1430_v49  ;;  %v1023_v31 = vsel %vm1012_vm8, %v4776_v52, %v4777_v37 }
 0x19b   :  { %v4782_v46 = vunpack.i.h.bf16 %v4780_v45  ;;  %v4781_v41 = vunpack.i.l.bf16 %v4780_v45  ;;  %v4785_v32 = vpop.permute.xlu0 %4784  ;;  %4162 = vmatprep.subr.bf16.mxu0 %v4161_v28 }
 0x19c   :  { %5069 = vrot.lane.b32.xlu1 %v5813_v24, %s5186_s28  ;;  %4164 = vmatpush1.bf16.msra.mxu0 %v4163_v36  ;;  %v4787_v48 = vunpack.i.h.bf16 %v4785_v32  ;;  %v4786_v29 = vunpack.i.l.bf16 %v4785_v32 }
 0x19d   :  { %v1024_v51 = vsel %vm1012_vm8, %v4781_v41, %v4782_v46  ;;  %v4101_v50 = vpack.c.bf16 %v4782_v46, %v4777_v37 }
 0x19e   :  { %v4790_v53 = vpop.permute.xlu1 %4789  ;;  %v4103_v30 = vpack.c.bf16 %v1024_v51, %v1023_v31  ;;  %v1432_v54 = vsel %vm1421_vm9, %v4786_v29, %v4787_v48 }
 0x19f   :  { %v4792_v61 = vunpack.i.h.bf16 %v4790_v53  ;;  %v4791_v60 = vunpack.i.l.bf16 %v4790_v53  ;;  %v4795_v39 = vpop.permute.xlu0 %4794  ;;  %4102 = vmatprep.subr.bf16.mxu1 %v4101_v50 }
 0x1a0   :  { %v4797_v35 = vunpack.i.h.bf16 %v4795_v39  ;;  %v4796_v58 = vunpack.i.l.bf16 %v4795_v39  ;;  %4104 = vmatpush1.bf16.msra.mxu1 %v4103_v30 }
 0x1a1   :  { %v1433_v57 = vsel %vm1421_vm9, %v4791_v60, %v4792_v61  ;;  %v4165_v24 = vpack.c.bf16 %v4792_v61, %v4787_v48 }
 0x1a2   :  { %v4800_v62 = vpop.permute.xlu1 %4799  ;;  %v4167_v42 = vpack.c.bf16 %v1433_v57, %v1432_v54  ;;  %v1025_v33 = vsel %vm1012_vm8, %v4796_v58, %v4797_v35  ;;  %v6178_v58 = vld [vmem:[%s7912_s3 + $0x8] sm:$0xff] }
 0x1a3   :  { %v4802_v63 = vunpack.i.h.bf16 %v4800_v62  ;;  %v4801_v55 = vunpack.i.l.bf16 %v4800_v62  ;;  %v4805_v34 = vpop.permute.xlu0 %4804  ;;  %4166 = vmatprep.subr.bf16.mxu0 %v4165_v24 }
 0x1a4   :  { %4168 = vmatpush1.bf16.msra.mxu0 %v4167_v42  ;;  %v4807_v56 = vunpack.i.h.bf16 %v4805_v34  ;;  %v4806_v44 = vunpack.i.l.bf16 %v4805_v34 }
 0x1a5   :  { %v1026_v38 = vsel %vm1012_vm8, %v4801_v55, %v4802_v63  ;;  %v4105_v40 = vpack.c.bf16 %v4802_v63, %v4797_v35  ;;  %v3888_v63 = vld [vmem:[%s7910_s1 + $0x20] sm:$0xff] }
 0x1a6   :  { %v4810_v43 = vpop.permute.xlu1 %4809  ;;  %v4107_v37 = vpack.c.bf16 %v1026_v38, %v1025_v33  ;;  %v1434_v36 = vsel %vm1421_vm9, %v4806_v44, %v4807_v56  ;;  %v6188_v38 = vld [vmem:[%s7912_s3] sm:$0xff]  ;;  %v6195_v44 = vld [vmem:[%s7912_s3 + $0x28] sm:$0xff] }
 0x1a7   :  { %v4812_v52 = vunpack.i.h.bf16 %v4810_v43  ;;  %v4811_v49 = vunpack.i.l.bf16 %v4810_v43  ;;  %v4815_v47 = vpop.permute.xlu0 %4814  ;;  %4106 = vmatprep.subr.bf16.mxu1 %v4105_v40 }
 0x1a8   :  { %v4817_v28 = vunpack.i.h.bf16 %v4815_v47  ;;  %v4816_v45 = vunpack.i.l.bf16 %v4815_v47  ;;  %4108 = vmatpush1.bf16.msra.mxu1 %v4107_v37 }
 0x1a9   :  { %v1435_v46 = vsel %vm1421_vm9, %v4811_v49, %v4812_v52  ;;  %v4169_v41 = vpack.c.bf16 %v4812_v52, %v4807_v56  ;;  %v2302_v56 = vsel %vm2301_vm10, %v6178_v58, 0.0 }
 0x1aa   :  { %v4820_v32 = vpop.permute.xlu1 %4819  ;;  %v4171_v31 = vpack.c.bf16 %v1435_v46, %v1434_v36  ;;  %v1027_v50 = vsel %vm1012_vm8, %v4816_v45, %v4817_v28  ;;  %v2303_v45 = vadd.f32 %v2302_v56, %v6188_v38  ;;  %v2310_v36 = vsel %vm2301_vm10, %v6195_v44, 0.0 }
 0x1ab   :  { %v4822_v51 = vunpack.i.h.bf16 %v4820_v32  ;;  %v4821_v48 = vunpack.i.l.bf16 %v4820_v32  ;;  %v4825_v29 = vpop.permute.xlu0 %4824  ;;  %4170 = vmatprep.subr.bf16.mxu0 %v4169_v41 }
 0x1ac   :  { %4172 = vmatpush1.bf16.msra.mxu0 %v4171_v31  ;;  %v4827_v30 = vunpack.i.h.bf16 %v4825_v29  ;;  %v4826_v61 = vunpack.i.l.bf16 %v4825_v29 }
 0x1ad   :  { %v1028_v53 = vsel %vm1012_vm8, %v4821_v48, %v4822_v51  ;;  %v4109_v60 = vpack.c.bf16 %v4822_v51, %v4817_v28  ;;  %v3892_v28 = vld [vmem:[%s7910_s1 + $0x40] sm:$0xff] }
 0x1ae   :  { %v4830_v39 = vpop.permute.xlu1 %4829  ;;  %v4111_v35 = vpack.c.bf16 %v1028_v53, %v1027_v50  ;;  %v1436_v55 = vsel %vm1421_vm9, %v4826_v61, %v4827_v30  ;;  %v6209_v51 = vld [vmem:[%s7912_s3 + $0x20] sm:$0xff]  ;;  %v3889_v50 = vld [vmem:[%s7910_s1 + $0x28] sm:$0xff]  ;;  %v6217_v53 = vld [vmem:[%s7912_s3 + $0x18] sm:$0xff] }
 0x1af   :  { %v4832_v54 = vunpack.i.h.bf16 %v4830_v39  ;;  %v4831_v57 = vunpack.i.l.bf16 %v4830_v39  ;;  %v4835_v24 = vpop.permute.xlu0 %4834  ;;  %4110 = vmatprep.subr.bf16.mxu1 %v4109_v60 }
 0x1b0   :  { %v4837_v62 = vunpack.i.h.bf16 %v4835_v24  ;;  %v4836_v42 = vunpack.i.l.bf16 %v4835_v24  ;;  %4112 = vmatpush1.bf16.msra.mxu1 %v4111_v35  ;;  %v6227_v24 = vld [vmem:[%s7912_s3 + $0x38] sm:$0xff] }
 0x1b1   :  { %v1437_v34 = vsel %vm1421_vm9, %v4831_v57, %v4832_v54  ;;  %v4173_v33 = vpack.c.bf16 %v4832_v54, %v4827_v30  ;;  %v3893_v54 = vld [vmem:[%s7910_s1 + $0x48] sm:$0xff]  ;;  %v2311_v57 = vadd.f32 %v2310_v36, %v6209_v51 }
 0x1b2   :  { %v4840_v40 = vpop.permute.xlu1 %4839  ;;  %v4175_v43 = vpack.c.bf16 %v1437_v34, %v1436_v55  ;;  %v1844_v47 = vsel %vm1843_vm11, %v4836_v42, %v4837_v62  ;;  %v6234_v55 = vld [vmem:[%s7912_s3 + $0x10] sm:$0xff]  ;;  %v2306_v34 = vsel %vm2301_vm10, %v6217_v53, 0.0 }
 0x1b3   :  { %v4842_v37 = vunpack.i.h.bf16 %v4840_v40  ;;  %v4841_v52 = vunpack.i.l.bf16 %v4840_v40  ;;  %v4845_v49 = vpop.permute.xlu0 %4844  ;;  %4174 = vmatprep.subr.bf16.mxu0 %v4173_v33  ;;  %1126 = vmatmul.mubr.f32.vlgmr.msra.gmra.mrb[8].mxu1 %v3888_v63  ;;  %v3890_v40 = vld [vmem:[%s7910_s1 + $0x30] sm:$0xff]  ;;  %v2307_v36 = vadd.f32 %v2306_v34, %v6234_v55 }
 0x1b4   :  { %4176 = vmatpush1.bf16.msra.mxu0 %v4175_v43  ;;  %1131 = vmatprep.mubr.f32.mxu1 %v5180_v59  ;;  %v4847_v41 = vunpack.i.h.bf16 %v4845_v49  ;;  %v4846_v32 = vunpack.i.l.bf16 %v4845_v49  ;;  %v6245_v49 = vld [vmem:[%s7912_s3 + $0x30] sm:$0xff] }
 0x1b5   :  { %v1845_v46 = vsel %vm1843_vm11, %v4841_v52, %v4842_v37  ;;  %v4209_v31 = vpack.c.bf16 %v4842_v37, %v4837_v62 }
 0x1b6   :  { %v4850_v48 = vpop.permute.xlu1 %4849  ;;  %v4211_v29 = vpack.c.bf16 %v1845_v46, %v1844_v47  ;;  %v1629_v62 = vsel %vm1628_vm12, %v4846_v32, %v4847_v41  ;;  %v2314_v47 = vsel %vm2301_vm10, %v6227_v24, 0.0 }
 0x1b7   :  { %v4852_v30 = vunpack.i.h.bf16 %v4850_v48  ;;  %v4851_v61 = vunpack.i.l.bf16 %v4850_v48  ;;  %v4855_v60 = vpop.permute.xlu0 %4854  ;;  %4210 = vmatprep.subr.bf16.mxu1 %v4209_v31  ;;  %1535 = vmatmul.mubr.f32.vlgmr.msra.gmra.mrb[8].mxu0 %v3892_v28 }
 0x1b8   :  { %v4857_v39 = vunpack.i.h.bf16 %v4855_v60  ;;  %v4856_v35 = vunpack.i.l.bf16 %v4855_v60  ;;  %4212 = vmatpush1.bf16.msra.mxu1 %v4211_v29  ;;  %1540 = vmatprep.mubr.f32.mxu0 %v5180_v59 }
 0x1b9   :  { %v1630_v42 = vsel %vm1628_vm12, %v4851_v61, %v4852_v30  ;;  %v4177_v63 = vpack.c.bf16 %v4852_v30, %v4847_v41  ;;  %1132 = vmatmul.mubr.f32.gmra.mrb[10].mxu1 %v3889_v50  ;;  %2304 = vadd.xlane.f32.xlu0 %v2303_v45  ;;  %v3894_v45 = vld [vmem:[%s7910_s1 + $0x50] sm:$0xff]  ;;  %v3891_v50 = vld [vmem:[%s7910_s1 + $0x38] sm:$0xff]  ;;  %v2315_v30 = vadd.f32 %v2314_v47, %v6245_v49 }
 0x1ba   :  { %v4860_v33 = vpop.permute.xlu1 %4859  ;;  %v4179_v56 = vpack.c.bf16 %v1630_v42, %v1629_v62  ;;  %1137 = vmatprep.mubr.f32.mxu1 %v5180_v59  ;;  %v1846_v28 = vsel %vm1843_vm11, %v4856_v35, %v4857_v39 }
 0x1bb   :  { %v4862_v43 = vunpack.i.h.bf16 %v4860_v33  ;;  %v4861_v37 = vunpack.i.l.bf16 %v4860_v33  ;;  %v4865_v52 = vpop.permute.xlu0 %4864  ;;  %4178 = vmatprep.subr.bf16.mxu0 %v4177_v63  ;;  %1541 = vmatmul.mubr.f32.gmra.mrb[10].mxu0 %v3893_v54 }
 0x1bc   :  { %4180 = vmatpush1.bf16.msra.mxu0 %v4179_v56  ;;  %1546 = vmatprep.mubr.f32.mxu0 %v5180_v59  ;;  %v4867_v41 = vunpack.i.h.bf16 %v4865_v52  ;;  %v4866_v32 = vunpack.i.l.bf16 %v4865_v52 }
 0x1bd   :  { %v1847_v46 = vsel %vm1843_vm11, %v4861_v37, %v4862_v43  ;;  %v4213_v31 = vpack.c.bf16 %v4862_v43, %v4857_v39  ;;  %1138 = vmatmul.mubr.f32.gmra.mrb[12].mxu1 %v3890_v40  ;;  %2312 = vadd.xlane.f32.xlu0 %v2311_v57  ;;  %v3895_v39 = vld [vmem:[%s7910_s1 + $0x58] sm:$0xff] }
 0x1be   :  { %v4870_v48 = vpop.permute.xlu1 %4869  ;;  %v4215_v29 = vpack.c.bf16 %v1847_v46, %v1846_v28  ;;  %1143 = vmatprep.mubr.f32.mxu1 %v5180_v59  ;;  %v1631_v57 = vsel %vm1628_vm12, %v4866_v32, %v4867_v41 }
 0x1bf   :  { %v4872_v61 = vunpack.i.h.bf16 %v4870_v48  ;;  %v4871_v60 = vunpack.i.l.bf16 %v4870_v48  ;;  %v4875_v35 = vpop.permute.xlu0 %4874  ;;  %4214 = vmatprep.subr.bf16.mxu1 %v4213_v31  ;;  %1547 = vmatmul.mubr.f32.gmra.mrb[12].mxu0 %v3894_v45 }
 0x1c0   :  { %v4877_v54 = vunpack.i.h.bf16 %v4875_v35  ;;  %v4876_v62 = vunpack.i.l.bf16 %v4875_v35  ;;  %4216 = vmatpush1.bf16.msra.mxu1 %v4215_v29  ;;  %1552 = vmatprep.mubr.f32.mxu0 %v5180_v59 }
 0x1c1   :  { %v1632_v42 = vsel %vm1628_vm12, %v4871_v60, %v4872_v61  ;;  %v4181_v63 = vpack.c.bf16 %v4872_v61, %v4867_v41  ;;  %1144 = vmatmul.mubr.f32.gmra.mrb[14].mxu1 %v3891_v50  ;;  %2308 = vadd.xlane.f32.xlu1 %v2307_v36 }
 0x1c2   :  { %v4880_v34 = vpop.permute.xlu1 %4879  ;;  %v4183_v33 = vpack.c.bf16 %v1632_v42, %v1631_v57  ;;  %1956 = vmatprep.mubr.f32.mxu1 %v5180_v59  ;;  %2316 = vadd.xlane.f32.xlu0 %v2315_v30  ;;  %v1848_v37 = vsel %vm1843_vm11, %v4876_v62, %v4877_v54 }
 0x1c3   :  { %v4882_v56 = vunpack.i.h.bf16 %v4880_v34  ;;  %v4881_v40 = vunpack.i.l.bf16 %v4880_v34  ;;  %v4885_v43 = vpop.permute.xlu0 %4884  ;;  %4182 = vmatprep.subr.bf16.mxu0 %v4181_v63  ;;  %1553 = vmatmul.mubr.f32.gmra.mrb[14].mxu0 %v3895_v39 }
 0x1c4   :  { %4184 = vmatpush1.bf16.msra.mxu0 %v4183_v33  ;;  %1741 = vmatprep.mubr.f32.mxu0 %v5180_v59  ;;  %v4887_v47 = vunpack.i.h.bf16 %v4885_v43  ;;  %v4886_v28 = vunpack.i.l.bf16 %v4885_v43 }
 0x1c5   :  { %v1849_v52 = vsel %vm1843_vm11, %v4881_v40, %v4882_v56  ;;  %v4217_v45 = vpack.c.bf16 %v4882_v56, %v4877_v54 }
 0x1c6   :  { %v4890_v36 = vpop.permute.xlu1 %4889  ;;  %v4219_v46 = vpack.c.bf16 %v1849_v52, %v1848_v37  ;;  %v1633_v50 = vsel %vm1628_vm12, %v4886_v28, %v4887_v47 }
 0x1c7   :  { %v4892_v41 = vunpack.i.h.bf16 %v4890_v36  ;;  %v4891_v32 = vunpack.i.l.bf16 %v4890_v36  ;;  %v4895_v31 = vpop.permute.xlu0 %4894  ;;  %4218 = vmatprep.subr.bf16.mxu1 %v4217_v45 }
 0x1c8   :  { %v4897_v48 = vunpack.i.h.bf16 %v4895_v31  ;;  %v4896_v29 = vunpack.i.l.bf16 %v4895_v31  ;;  %4220 = vmatpush1.bf16.msra.mxu1 %v4219_v46 }
 0x1c9   :  { %v1634_v30 = vsel %vm1628_vm12, %v4891_v32, %v4892_v41  ;;  %v4185_v61 = vpack.c.bf16 %v4892_v41, %v4887_v47 }
 0x1ca   :  { %v4187_v60 = vpack.c.bf16 %v1634_v30, %v1633_v50  ;;  %v4900_v35 = vpop.permute.xlu1 %4899  ;;  %v1850_v54 = vsel %vm1843_vm11, %v4896_v29, %v4897_v48 }
 0x1cb   :  { %v4902_v62 = vunpack.i.h.bf16 %v4900_v35  ;;  %v4901_v39 = vunpack.i.l.bf16 %v4900_v35  ;;  %v4905_v57 = vpop.permute.xlu0 %4904  ;;  %4186 = vmatprep.subr.bf16.mxu0 %v4185_v61 }
 0x1cc   :  { %4188 = vmatpush1.bf16.msra.mxu0 %v4187_v60  ;;  %v4907_v34 = vunpack.i.h.bf16 %v4905_v57  ;;  %v4906_v33 = vunpack.i.l.bf16 %v4905_v57 }
 0x1cd   :  { %v1851_v42 = vsel %vm1843_vm11, %v4901_v39, %v4902_v62  ;;  %v4221_v63 = vpack.c.bf16 %v4902_v62, %v4897_v48 }
 0x1ce   :  { %v4223_v56 = vpack.c.bf16 %v1851_v42, %v1850_v54  ;;  %v4910_v40 = vpop.permute.xlu1 %4909  ;;  %v1635_v45 = vsel %vm1628_vm12, %v4906_v33, %v4907_v34 }
 0x1cf   :  { %v4912_v43 = vunpack.i.h.bf16 %v4910_v40  ;;  %v4911_v37 = vunpack.i.l.bf16 %v4910_v40  ;;  %v4915_v52 = vpop.permute.xlu0 %4914  ;;  %4222 = vmatprep.subr.bf16.mxu1 %v4221_v63 }
 0x1d0   :  { %v4917_v47 = vunpack.i.h.bf16 %v4915_v52  ;;  %v4916_v28 = vunpack.i.l.bf16 %v4915_v52  ;;  %4224 = vmatpush1.bf16.msra.mxu1 %v4223_v56 }
 0x1d1   :  { %v1636_v36 = vsel %vm1628_vm12, %v4911_v37, %v4912_v43  ;;  %v4189_v46 = vpack.c.bf16 %v4912_v43, %v4907_v34 }
 0x1d2   :  { %v4191_v41 = vpack.c.bf16 %v1636_v36, %v1635_v45  ;;  %v4920_v32 = vpop.permute.xlu1 %4919  ;;  %v1852_v50 = vsel %vm1843_vm11, %v4916_v28, %v4917_v47 }
 0x1d3   :  { %v4922_v31 = vunpack.i.h.bf16 %v4920_v32  ;;  %v4921_v48 = vunpack.i.l.bf16 %v4920_v32  ;;  %v4925_v29 = vpop.permute.xlu0 %4924  ;;  %4190 = vmatprep.subr.bf16.mxu0 %v4189_v46 }
 0x1d4   :  { %4192 = vmatpush1.bf16.msra.mxu0 %v4191_v41  ;;  %v4927_v60 = vunpack.i.h.bf16 %v4925_v29  ;;  %v4926_v35 = vunpack.i.l.bf16 %v4925_v29 }
 0x1d5   :  { %v1853_v30 = vsel %vm1843_vm11, %v4921_v48, %v4922_v31  ;;  %v4225_v61 = vpack.c.bf16 %v4922_v31, %v4917_v47 }
 0x1d6   :  { %v4227_v62 = vpack.c.bf16 %v1853_v30, %v1852_v50  ;;  %v4930_v39 = vpop.permute.xlu1 %4929  ;;  %v1637_v33 = vsel %vm1628_vm12, %v4926_v35, %v4927_v60 }
 0x1d7   :  { %v4932_v57 = vunpack.i.h.bf16 %v4930_v39  ;;  %v4931_v54 = vunpack.i.l.bf16 %v4930_v39  ;;  %v4935_v42 = vpop.permute.xlu0 %4934  ;;  %4226 = vmatprep.subr.bf16.mxu1 %v4225_v61 }
 0x1d8   :  { %v4937_v63 = vunpack.i.h.bf16 %v4935_v42  ;;  %v4936_v34 = vunpack.i.l.bf16 %v4935_v42  ;;  %4228 = vmatpush1.bf16.msra.mxu1 %v4227_v62 }
 0x1d9   :  { %v1638_v56 = vsel %vm1628_vm12, %v4931_v54, %v4932_v57  ;;  %v4193_v40 = vpack.c.bf16 %v4932_v57, %v4927_v60 }
 0x1da   :  { %v4195_v43 = vpack.c.bf16 %v1638_v56, %v1637_v33  ;;  %v4940_v37 = vpop.permute.xlu1 %4939  ;;  %v1854_v45 = vsel %vm1843_vm11, %v4936_v34, %v4937_v63 }
 0x1db   :  { %v4942_v52 = vunpack.i.h.bf16 %v4940_v37  ;;  %v4941_v47 = vunpack.i.l.bf16 %v4940_v37  ;;  %v4945_v28 = vpop.permute.xlu0 %4944  ;;  %4194 = vmatprep.subr.bf16.mxu0 %v4193_v40 }
 0x1dc   :  { %4196 = vmatpush1.bf16.msra.mxu0 %v4195_v43  ;;  %v4947_v41 = vunpack.i.h.bf16 %v4945_v28  ;;  %v4946_v32 = vunpack.i.l.bf16 %v4945_v28 }
 0x1dd   :  { %v1855_v36 = vsel %vm1843_vm11, %v4941_v47, %v4942_v52  ;;  %v4229_v46 = vpack.c.bf16 %v4942_v52, %v4937_v63 }
 0x1de   :  { %v4231_v31 = vpack.c.bf16 %v1855_v36, %v1854_v45  ;;  %v4950_v48 = vpop.permute.xlu1 %4949  ;;  %v1639_v35 = vsel %vm1628_vm12, %v4946_v32, %v4947_v41 }
 0x1df   :  { %v4952_v29 = vunpack.i.h.bf16 %v4950_v48  ;;  %v4951_v50 = vunpack.i.l.bf16 %v4950_v48  ;;  %v4955_v30 = vpop.permute.xlu0 %4954  ;;  %4230 = vmatprep.subr.bf16.mxu1 %v4229_v46 }
 0x1e0   :  { %v4957_v61 = vunpack.i.h.bf16 %v4955_v30  ;;  %v4956_v60 = vunpack.i.l.bf16 %v4955_v30  ;;  %4232 = vmatpush1.bf16.msra.mxu1 %v4231_v31 }
 0x1e1   :  { %v1640_v62 = vsel %vm1628_vm12, %v4951_v50, %v4952_v29  ;;  %v4197_v39 = vpack.c.bf16 %v4952_v29, %v4947_v41 }
 0x1e2   :  { %v4199_v57 = vpack.c.bf16 %v1640_v62, %v1639_v35  ;;  %v4960_v54 = vpop.permute.xlu1 %4959  ;;  %v1856_v33 = vsel %vm1843_vm11, %v4956_v60, %v4957_v61 }
 0x1e3   :  { %v4962_v42 = vunpack.i.h.bf16 %v4960_v54  ;;  %v4961_v63 = vunpack.i.l.bf16 %v4960_v54  ;;  %v4965_v34 = vpop.permute.xlu0 %4964  ;;  %4198 = vmatprep.subr.bf16.mxu0 %v4197_v39 }
 0x1e4   :  { %4200 = vmatpush1.bf16.msra.mxu0 %v4199_v57  ;;  %v4967_v43 = vunpack.i.h.bf16 %v4965_v34  ;;  %v4966_v37 = vunpack.i.l.bf16 %v4965_v34 }
 0x1e5   :  { %v1857_v56 = vsel %vm1843_vm11, %v4961_v63, %v4962_v42  ;;  %v4233_v40 = vpack.c.bf16 %v4962_v42, %v4957_v61 }
 0x1e6   :  { %v4235_v52 = vpack.c.bf16 %v1857_v56, %v1856_v33  ;;  %v4970_v47 = vpop.permute.xlu1 %4969  ;;  %v1641_v32 = vsel %vm1628_vm12, %v4966_v37, %v4967_v43  ;;  %v3960_v37 = vld [vmem:[%s7910_s1 + $0xe0] sm:$0xff] }
 0x1e7   :  { %v4972_v28 = vunpack.i.h.bf16 %v4970_v47  ;;  %v4971_v45 = vunpack.i.l.bf16 %v4970_v47  ;;  %v4975_v36 = vpop.permute.xlu0 %4974  ;;  %4234 = vmatprep.subr.bf16.mxu1 %v4233_v40 }
 0x1e8   :  { %v4977_v46 = vunpack.i.h.bf16 %v4975_v36  ;;  %v4976_v41 = vunpack.i.l.bf16 %v4975_v36  ;;  %4236 = vmatpush1.bf16.msra.mxu1 %v4235_v52 }
 0x1e9   :  { %v1642_v31 = vsel %vm1628_vm12, %v4971_v45, %v4972_v28  ;;  %v4201_v48 = vpack.c.bf16 %v4972_v28, %v4967_v43 }
 0x1ea   :  { %v4203_v29 = vpack.c.bf16 %v1642_v31, %v1641_v32  ;;  %v4980_v50 = vpop.permute.xlu1 %4979  ;;  %v1858_v35 = vsel %vm1843_vm11, %v4976_v41, %v4977_v46 }
 0x1eb   :  { %v4982_v30 = vunpack.i.h.bf16 %v4980_v50  ;;  %v4981_v61 = vunpack.i.l.bf16 %v4980_v50  ;;  %v4985_v60 = vpop.permute.xlu0 %4984  ;;  %4202 = vmatprep.subr.bf16.mxu0 %v4201_v48  ;;  %v3956_v48 = vld [vmem:[%s7910_s1 + $0xc0] sm:$0xff] }
 0x1ec   :  { %4204 = vmatpush1.bf16.msra.mxu0 %v4203_v29  ;;  %v4987_v57 = vunpack.i.h.bf16 %v4985_v60  ;;  %v4986_v54 = vunpack.i.l.bf16 %v4985_v60  ;;  %v3961_v29 = vld [vmem:[%s7910_s1 + $0xe8] sm:$0xff] }
 0x1ed   :  { %v1859_v62 = vsel %vm1843_vm11, %v4981_v61, %v4982_v30  ;;  %v4237_v39 = vpack.c.bf16 %v4982_v30, %v4977_v46 }
 0x1ee   :  { %v4239_v42 = vpack.c.bf16 %v1859_v62, %v1858_v35  ;;  %v4990_v63 = vpop.permute.xlu1 %4989  ;;  %v1643_v52 = vsel %vm1628_vm12, %v4986_v54, %v4987_v57 }
 0x1ef   :  { %v4992_v34 = vunpack.i.h.bf16 %v4990_v63  ;;  %v4991_v33 = vunpack.i.l.bf16 %v4990_v63  ;;  %v4995_v56 = vpop.permute.xlu0 %4994  ;;  %4238 = vmatprep.subr.bf16.mxu1 %v4237_v39 }
 0x1f0   :  { %v4997_v40 = vunpack.i.h.bf16 %v4995_v56  ;;  %v4996_v43 = vunpack.i.l.bf16 %v4995_v56  ;;  %4240 = vmatpush1.bf16.msra.mxu1 %v4239_v42 }
 0x1f1   :  { %v1644_v47 = vsel %vm1628_vm12, %v4991_v33, %v4992_v34  ;;  %v4205_v28 = vpack.c.bf16 %v4992_v34, %v4987_v57  ;;  %v3957_v34 = vld [vmem:[%s7910_s1 + $0xc8] sm:$0xff]  ;;  %v3962_v33 = vld [vmem:[%s7910_s1 + $0xf0] sm:$0xff] }
 0x1f2   :  { %v4207_v45 = vpack.c.bf16 %v1644_v47, %v1643_v52  ;;  %v5000_v36 = vpop.permute.xlu1 %4999  ;;  %v2059_v31 = vsel %vm2058_vm13, %v4996_v43, %v4997_v40 }
 0x1f3   :  { %v5002_v46 = vunpack.i.h.bf16 %v5000_v36  ;;  %v5001_v41 = vunpack.i.l.bf16 %v5000_v36  ;;  %v5005_v32 = vpop.permute.xlu0 %5004  ;;  %4206 = vmatprep.subr.bf16.mxu0 %v4205_v28  ;;  %1957 = vmatmul.mubr.f32.vlgmr.msra.gmra.mrb[8].mxu1 %v3960_v37 }
 0x1f4   :  { %4208 = vmatpush1.bf16.msra.mxu0 %v4207_v45  ;;  %1962 = vmatprep.mubr.f32.mxu1 %v5180_v59  ;;  %v5007_v61 = vunpack.i.h.bf16 %v5005_v32  ;;  %v5006_v60 = vunpack.i.l.bf16 %v5005_v32 }
 0x1f5   :  { %v2060_v50 = vsel %vm2058_vm13, %v5001_v41, %v5002_v46  ;;  %v4241_v30 = vpack.c.bf16 %v5002_v46, %v4997_v40  ;;  %v3958_v46 = vld [vmem:[%s7910_s1 + $0xd0] sm:$0xff]  ;;  %v3963_v41 = vld [vmem:[%s7910_s1 + $0xf8] sm:$0xff] }
 0x1f6   :  { %v4243_v35 = vpack.c.bf16 %v2060_v50, %v2059_v31  ;;  %v5010_v62 = vpop.permute.xlu1 %5009  ;;  %v2061_v56 = vsel %vm2058_vm13, %v5006_v60, %v5007_v61 }
 0x1f7   :  { %v5012_v39 = vunpack.i.h.bf16 %v5010_v62  ;;  %v5011_v57 = vunpack.i.l.bf16 %v5010_v62  ;;  %v5015_v54 = vpop.permute.xlu0 %5014  ;;  %1742 = vmatmul.mubr.f32.vlgmr.msra.gmra.mrb[0].mxu0 %v3956_v48  ;;  %1963 = vmatmul.mubr.f32.gmra.mrb[10].mxu1 %v3961_v29 }
 0x1f8   :  { %v5017_v42 = vunpack.i.h.bf16 %v5015_v54  ;;  %v5016_v63 = vunpack.i.l.bf16 %v5015_v54  ;;  %4242 = vmatprep.subr.bf16.mxu0 %v4241_v30  ;;  %4273 = vmatprep.subr.bf16.mxu1 %v4241_v30 }
 0x1f9   :  { %v2062_v40 = vsel %vm2058_vm13, %v5011_v57, %v5012_v39  ;;  %v4245_v43 = vpack.c.bf16 %v5012_v39, %v5007_v61  ;;  %4244 = vmatpush1.bf16.msra.mxu0 %v4243_v35  ;;  %4281 = vmatpush1.bf16.msra.mxu1 %v4243_v35  ;;  %v3959_v57 = vld [vmem:[%s7910_s1 + $0xd8] sm:$0xff] }
 0x1fa   :  { %v4247_v37 = vpack.c.bf16 %v2062_v40, %v2061_v56  ;;  %v5020_v52 = vpop.permute.xlu1 %5019  ;;  %1747 = vmatprep.mubr.f32.mxu0 %v5180_v59  ;;  %1968 = vmatprep.mubr.f32.mxu1 %v5180_v59  ;;  %v2063_v36 = vsel %vm2058_vm13, %v5016_v63, %v5017_v42 }
 0x1fb   :  { %v5022_v47 = vunpack.i.h.bf16 %v5020_v52  ;;  %v5021_v28 = vunpack.i.l.bf16 %v5020_v52  ;;  %v5025_v45 = vpop.permute.xlu0 %5024  ;;  %1748 = vmatmul.mubr.f32.gmra.mrb[2].mxu0 %v3957_v34  ;;  %1969 = vmatmul.mubr.f32.gmra.mrb[12].mxu1 %v3962_v33 }
 0x1fc   :  { %4246 = vmatprep.subr.bf16.mxu0 %v4245_v43  ;;  %4274 = vmatprep.subr.bf16.mxu1 %v4245_v43  ;;  %v5027_v48 = vunpack.i.h.bf16 %v5025_v45  ;;  %v5026_v29 = vunpack.i.l.bf16 %v5025_v45 }
 0x1fd   :  { %v2064_v32 = vsel %vm2058_vm13, %v5021_v28, %v5022_v47  ;;  %v4249_v31 = vpack.c.bf16 %v5022_v47, %v5017_v42  ;;  %4248 = vmatpush1.bf16.msra.mxu0 %v4247_v37  ;;  %4282 = vmatpush1.bf16.msra.mxu1 %v4247_v37 }
 0x1fe   :  { %v4251_v50 = vpack.c.bf16 %v2064_v32, %v2063_v36  ;;  %v5030_v30 = vpop.permute.xlu1 %5029  ;;  %1753 = vmatprep.mubr.f32.mxu0 %v5180_v59  ;;  %1974 = vmatprep.mubr.f32.mxu1 %v5180_v59  ;;  %v2065_v54 = vsel %vm2058_vm13, %v5026_v29, %v5027_v48 }
 0x1ff   :  { %v5032_v61 = vunpack.i.h.bf16 %v5030_v30  ;;  %v5031_v60 = vunpack.i.l.bf16 %v5030_v30  ;;  %v5035_v35 = vpop.permute.xlu0 %5034  ;;  %1754 = vmatmul.mubr.f32.gmra.mrb[4].mxu0 %v3958_v46  ;;  %1975 = vmatmul.mubr.f32.gmra.mrb[14].mxu1 %v3963_v41 }
 0x200   :  { %v5037_v62 = vunpack.i.h.bf16 %v5035_v35  ;;  %v5036_v39 = vunpack.i.l.bf16 %v5035_v35  ;;  %4250 = vmatprep.subr.bf16.mxu0 %v4249_v31  ;;  %4275 = vmatprep.subr.bf16.mxu1 %v4249_v31 }
 0x201   :  { %v2066_v42 = vsel %vm2058_vm13, %v5031_v60, %v5032_v61  ;;  %v4253_v63 = vpack.c.bf16 %v5032_v61, %v5027_v48  ;;  %4252 = vmatpush1.bf16.msra.mxu0 %v4251_v50  ;;  %4283 = vmatpush1.bf16.msra.mxu1 %v4251_v50 }
 0x202   :  { %v4255_v34 = vpack.c.bf16 %v2066_v42, %v2065_v54  ;;  %v5040_v33 = vpop.permute.xlu1 %5039  ;;  %1759 = vmatprep.mubr.f32.mxu0 %v5180_v59  ;;  %2183 = vmatprep.mubr.f32.mxu1 %v5180_v59  ;;  %v2067_v37 = vsel %vm2058_vm13, %v5036_v39, %v5037_v62 }
 0x203   :  { %v5042_v56 = vunpack.i.h.bf16 %v5040_v33  ;;  %v5041_v40 = vunpack.i.l.bf16 %v5040_v33  ;;  %v5045_v43 = vpop.permute.xlu0 %5044  ;;  %1760 = vmatmul.mubr.f32.gmra.mrb[6].mxu0 %v3959_v57  ;;  %4254 = vmatprep.subr.bf16.mxu0 %v4253_v63 }
 0x204   :  { %4276 = vmatprep.subr.bf16.mxu1 %v4253_v63  ;;  %2171 = vmatprep.mubr.f32.mxu0 %v5180_v59  ;;  %v5047_v28 = vunpack.i.h.bf16 %v5045_v43  ;;  %v5046_v45 = vunpack.i.l.bf16 %v5045_v43 }
 0x205   :  { %v2068_v52 = vsel %vm2058_vm13, %v5041_v40, %v5042_v56  ;;  %v4257_v47 = vpack.c.bf16 %v5042_v56, %v5037_v62  ;;  %4256 = vmatpush1.bf16.msra.mxu0 %v4255_v34  ;;  %4284 = vmatpush1.bf16.msra.mxu1 %v4255_v34 }
 0x206   :  { %v4259_v36 = vpack.c.bf16 %v2068_v52, %v2067_v37  ;;  %v5050_v46 = vpop.permute.xlu1 %5049  ;;  %v2069_v50 = vsel %vm2058_vm13, %v5046_v45, %v5047_v28 }
 0x207   :  { %v5052_v41 = vunpack.i.h.bf16 %v5050_v46  ;;  %v5051_v32 = vunpack.i.l.bf16 %v5050_v46  ;;  %v5055_v31 = vpop.permute.xlu0 %5054  ;;  %4258 = vmatprep.subr.bf16.mxu0 %v4257_v47  ;;  %4277 = vmatprep.subr.bf16.mxu1 %v4257_v47 }
 0x208   :  { %v5057_v48 = vunpack.i.h.bf16 %v5055_v31  ;;  %v5056_v29 = vunpack.i.l.bf16 %v5055_v31 }
 0x209   :  { %v2070_v30 = vsel %vm2058_vm13, %v5051_v32, %v5052_v41  ;;  %v4261_v61 = vpack.c.bf16 %v5052_v41, %v5047_v28  ;;  %4260 = vmatpush1.bf16.msra.mxu0 %v4259_v36  ;;  %4285 = vmatpush1.bf16.msra.mxu1 %v4259_v36 }
 0x20a   :  { %v4263_v60 = vpack.c.bf16 %v2070_v30, %v2069_v50  ;;  %v5060_v35 = vpop.permute.xlu1 %5059  ;;  %v6337_v62 = vpop.f32.mrb[0].mxu1  ;;  %v2071_v63 = vsel %vm2058_vm13, %v5056_v29, %v5057_v48  ;;  %v3964_v29 = vld [vmem:[%s7910_s1 + $0x100] sm:$0xff]  ;;  %v3966_v50 = vld [vmem:[%s7910_s1 + $0x110] sm:$0xff] }
 0x20b   :  { %v5062_v39 = vunpack.i.h.bf16 %v5060_v35  ;;  %v5061_v57 = vunpack.i.l.bf16 %v5060_v35  ;;  %v5065_v54 = vpop.permute.xlu0 %5064  ;;  %4262 = vmatprep.subr.bf16.mxu0 %v4261_v61  ;;  %4278 = vmatprep.subr.bf16.mxu1 %v4261_v61  ;;  %v6339_v42 = vpop.f32.mrb[1].mxu1  ;;  %v3967_v35 = vld [vmem:[%s7910_s1 + $0x118] sm:$0xff] }
 0x20c   :  { %v5067_v56 = vunpack.i.h.bf16 %v5065_v54  ;;  %v5066_v40 = vunpack.i.l.bf16 %v5065_v54 }
 0x20d   :  { %v2072_v34 = vsel %vm2058_vm13, %v5061_v57, %v5062_v39  ;;  %v4265_v33 = vpack.c.bf16 %v5062_v39, %v5057_v48  ;;  %4264 = vmatpush1.bf16.msra.mxu0 %v4263_v60  ;;  %4286 = vmatpush1.bf16.msra.mxu1 %v4263_v60  ;;  %v3965_v60 = vld [vmem:[%s7910_s1 + $0x108] sm:$0xff]  ;;  %v7960_v39 = vmov 0   ;;  %v6376_v57 = vld [vmem:[%s7913_s4] sm:$0xff] }
 0x20e   :  { %v4267_v43 = vpack.c.bf16 %v2072_v34, %v2071_v63  ;;  %v5070_v37 = vpop.permute.xlu1 %5069  ;;  %v6343_v52 = vpop.f32.mrb[2].mxu1  ;;  %v2073_v36 = vsel %vm2058_vm13, %v5066_v40, %v5067_v56  ;;  %5073 = vset.pattern.permute.xlu1 %v7960_v39  ;;  %5074 = vset.pattern.permute.xlu0 %v7960_v39  ;;  %v6389_v34 = vld [vmem:[%s7913_s4 + $0x20] sm:$0xff] }
 0x20f   :  { %v5072_v47 = vunpack.i.h.bf16 %v5070_v37  ;;  %v5071_v28 = vunpack.i.l.bf16 %v5070_v37  ;;  %4266 = vmatprep.subr.bf16.mxu0 %v4265_v33  ;;  %4279 = vmatprep.subr.bf16.mxu1 %v4265_v33  ;;  %v6345_v45 = vpop.f32.mrb[3].mxu1  ;;  %v6394_v33 = vld [vmem:[%s7913_s4 + $0x28] sm:$0xff]  ;;  %v6407_v37 = vld [vmem:[%s7913_s4 + $0x18] sm:$0xff] }
 0x211   :  { %v2074_v46 = vsel %vm2058_vm13, %v5071_v28, %v5072_v47  ;;  %v4269_v41 = vpack.c.bf16 %v5072_v47, %v5067_v56  ;;  %4268 = vmatpush1.bf16.msra.mxu0 %v4267_v43  ;;  %4287 = vmatpush1.bf16.msra.mxu1 %v4267_v43  ;;  %v2590_v56 = vsel %vm2301_vm10, %v6394_v33, 0.0  ;;  %v6402_v43 = vld [vmem:[%s7913_s4 + $0x10] sm:$0xff]  ;;  %v2586_v47 = vsel %vm2301_vm10, %v6407_v37, 0.0 }
 0x212   :  { %v4271_v32 = vpack.c.bf16 %v2074_v46, %v2073_v36  ;;  %v6349_v31 = vpop.f32.mrb[4].mxu1  ;;  %v2591_v40 = vadd.f32 %v2590_v56, %v6389_v34  ;;  %v2587_v28 = vadd.f32 %v2586_v47, %v6402_v43 }
 0x213   :  { %4270 = vmatprep.subr.bf16.mxu0 %v4269_v41  ;;  %4280 = vmatprep.subr.bf16.mxu1 %v4269_v41  ;;  %v6351_v48 = vpop.f32.mrb[5].mxu1 }
 0x214   :  { %2588 = vadd.xlane.f32.xlu0 %v2587_v28 }
 0x215   :  { %4272 = vmatpush1.bf16.msra.mxu0 %v4271_v32  ;;  %4288 = vmatpush1.bf16.msra.mxu1 %v4271_v32 }
 0x216   :  { %v6359_v30 = vpop.f32.mrb[6].mxu1 }
 0x217   :  { %v6361_v61 = vpop.f32.mrb[7].mxu1 }
 0x218   :  { %2172 = vmatmul.mubr.f32.vlgmr.msra.gmra.mrb[8].mxu0 %v3964_v29  ;;  %2184 = vmatmul.mubr.f32.vlgmr.msra.gmra.mrb[16].mxu1 %v3966_v50  ;;  %v2204_v29 = vlaneseq }
 0x219   :  { %2177 = vmatprep.mubr.f32.mxu0 %v5180_v59  ;;  %2189 = vmatprep.mubr.f32.mxu1 %v5180_v59  ;;  %v6381_v59 = vld [vmem:[%s7913_s4 + $0x8] sm:$0xff] }
 0x21a   :  { %v2582_v54 = vsel %vm2301_vm10, %v6381_v59, 0.0  ;;  %v2205_v50 = vand.u32 127, %v2204_v29 }
 0x21b   :  { %v2583_v63 = vadd.f32 %v2582_v54, %v6376_v57 }
 0x21c   :  { %2178 = vmatmul.mubr.f32.gmra.mrb[10].mxu0 %v3965_v60  ;;  %2190 = vmatmul.mubr.f32.gmra.mrb[18].mxu1 %v3967_v35  ;;  %v2206_v60 = vadd.s32 128, %v2205_v50  ;;  %v6420_v35 = vmul.u32.u64.low 2454267026, %v2205_v50  ;;  %v6421_v54 = vmul.u32.u64.high 2454267026, %v2205_v50, %v6420_v35 }
 0x21d   :  { %2584 = vadd.xlane.f32.xlu1 %v2583_v63 }
 0x21e   :  { %v6423_v63 = vmul.u32.u64.low 2454267026, %v2206_v60  ;;  %v6424_v56 = vmul.u32.u64.high 2454267026, %v2206_v60, %v6423_v63  ;;  %vm2213_vm14 = vc.u32 %v6420_v35, 2454267026 }
 0x220   :  { %vm2227_vm15 = vc.u32 %v6423_v63, 2454267026 }
 0x221   :  { %2592 = vadd.xlane.f32.xlu1 %v2591_v40  ;;  %v2214_v40 = vsel %vm2213_vm14, 1, %v7960_v39  ;;  %v2228_v47 = vsel %vm2227_vm15, 1, %v7960_v39 }
 0x222   :  { %v2215_v28 = vadd.s32 %v6421_v54, %v2214_v40  ;;  %v2229_v26 = vadd.s32 %v6424_v56, %v2228_v47 }
 0x224   :  { %v2216_v25 = vshrl.u32 %v2215_v28, 3  ;;  %v2230_v27 = vshrl.u32 %v2229_v26, 3 }
 0x226   :  { %v2217_v29 = vmul.u32 14, %v2216_v25  ;;  %v2231_v20 = vmul.u32 14, %v2230_v27 }
 0x228   :  { %v2218_v22 = vsub.s32 %v2205_v50, %v2217_v29  ;;  %v2232_v21 = vsub.s32 %v2206_v60, %v2231_v20 }
 0x22a   :  { %vm2235_vm0 = vcmp.ne.s32.totalorder %v2218_v22, 0  ;;  %vm2237_vm1 = vcmp.lt.s32.totalorder %v2218_v22, 0  ;;  %vm2236_vm2 = vcmp.ne.s32.totalorder %v2232_v21, 0  ;;  %vm2238_vm3 = vcmp.lt.s32.totalorder %v2232_v21, 0 }
 0x22b   :  { %v2241_v35 = vadd.s32 14, %v2218_v22  ;;  %vm2239_vm4 = vmand %vm2237_vm1, %vm2235_vm0  ;;  %v2242_v63 = vadd.s32 14, %v2232_v21 }
 0x22c   :  { %vm2240_vm5 = vmand %vm2238_vm3, %vm2236_vm2 }
 0x22d   :  { %v6430_v16 = vsel %vm2239_vm4, %v2241_v35, %v2218_v22  ;;  %v6432_v54 = vsel %vm2240_vm5, %v2242_v63, %v2232_v21 }
 0x22e   :  { %vm2245_vm6 = vcmp.ge.s32.totalorder %v6430_v16, 1  ;;  %vm2246_vm7 = vcmp.ge.s32.totalorder %v6432_v54, 1  ;;  %vm2247_vm8 = vcmp.le.s32.totalorder %v6430_v16, 12  ;;  %vm2248_vm9 = vcmp.le.s32.totalorder %v6432_v54, 12  ;;  %v6526_v54 = vld [vmem:[%s7913_s4 + $0x38] sm:$0xff] }
 0x292   :  { %v6412_v36 = vpop.f32.mrb[12].mxu0 }
 0x293   :  { %v6414_v46 = vpop.f32.mrb[13].mxu0 }
 0x296   :  { %v6416_v41 = vpop.f32.mrb[14].mxu0 }
 0x297   :  { %v6418_v32 = vpop.f32.mrb[15].mxu0 }
 0x2c6   :  { %v1958_v23 = vpop.f32.mrb[8].mxu1 }
 0x2c7   :  { %v1960_v39 = vpop.f32.mrb[9].mxu1 }
 0x2ca   :  { %v1743_v56 = vpop.f32.mrb[0].mxu0  ;;  %v1964_v25 = vpop.f32.mrb[10].mxu1 }
 0x2cb   :  { %v4289_v20 = vadd.f32 %v1743_v56, %v6337_v62  ;;  %v1745_v26 = vpop.f32.mrb[1].mxu0  ;;  %v1966_v27 = vpop.f32.mrb[11].mxu1 }
 0x2cc   :  { %v4290_v50 = vadd.f32 %v1745_v26, %v6339_v42 }
 0x2cd   :  { %v2253_v60 = vsel %vm2245_vm6, %v4289_v20, 0.0 }
 0x2ce   :  { %v2254_v22 = vsel %vm2246_vm7, %v4290_v50, 0.0  ;;  %v1749_v21 = vpop.f32.mrb[2].mxu0  ;;  %v1970_v40 = vpop.f32.mrb[12].mxu1  ;;  %v2261_v47 = vadd.f32 %v2253_v60, %v1958_v23 }
 0x2cf   :  { %v4291_v28 = vadd.f32 %v1749_v21, %v6343_v52  ;;  %v1751_v29 = vpop.f32.mrb[3].mxu0  ;;  %v1972_v35 = vpop.f32.mrb[13].mxu1  ;;  %v2262_v62 = vadd.f32 %v2254_v22, %v1960_v39 }
 0x2d0   :  { %v4292_v63 = vadd.f32 %v1751_v29, %v6345_v45 }
 0x2d1   :  { %v2255_v56 = vsel %vm2245_vm6, %v4291_v28, 0.0 }
 0x2d2   :  { %v2256_v42 = vsel %vm2246_vm7, %v4292_v63, 0.0  ;;  %v1755_v20 = vpop.f32.mrb[4].mxu0  ;;  %v1976_v26 = vpop.f32.mrb[14].mxu1  ;;  %v2263_v18 = vadd.f32 %v2255_v56, %v1964_v25 }
 0x2d3   :  { %v4293_v50 = vadd.f32 %v1755_v20, %v6349_v31  ;;  %v1757_v17 = vpop.f32.mrb[5].mxu0  ;;  %v1978_v23 = vpop.f32.mrb[15].mxu1  ;;  %v2264_v60 = vadd.f32 %v2256_v42, %v1966_v27 }
 0x2d4   :  { %v4294_v52 = vadd.f32 %v1757_v17, %v6351_v48  ;;  %v2305_v56 = vpop.xlane.xlu0 %2304 }
 0x2d5   :  { %v2257_v39 = vsel %vm2245_vm6, %v4293_v50, 0.0 }
 0x2d6   :  { %v2265_v45 = vadd.f32 %v2257_v39, %v1970_v40  ;;  %v2258_v22 = vsel %vm2246_vm7, %v4294_v52, 0.0  ;;  %v1761_v21 = vpop.f32.mrb[6].mxu0  ;;  %v2318_v40 = vmul.f32 0.0051020407, %v2305_v56 }
 0x2d7   :  { %v2266_v28 = vadd.f32 %v2258_v22, %v1972_v35  ;;  %v4295_v29 = vadd.f32 %v1761_v21, %v6359_v30  ;;  %v1763_v63 = vpop.f32.mrb[7].mxu0  ;;  %v2309_v35 = vpop.xlane.xlu1 %2308 }
 0x2d8   :  { %v4296_v25 = vadd.f32 %v1763_v63, %v6361_v61  ;;  %v2313_v42 = vpop.xlane.xlu0 %2312  ;;  %v6463_v30 = vsub.f32 %v6188_v38, %v2318_v40  ;;  %v6466_v50 = vsub.f32 %v6178_v58, %v2318_v40 }
 0x2d9   :  { %v2259_v31 = vsel %vm2245_vm6, %v4295_v29, 0.0 }
 0x2da   :  { %v2267_v27 = vadd.f32 %v2259_v31, %v1976_v26  ;;  %v2260_v17 = vsel %vm2246_vm7, %v4296_v25, 0.0  ;;  %v2320_v26 = vmul.f32 0.0051020407, %v2313_v42  ;;  %v2330_v25 = vmul.f32 %v6463_v30, %v6463_v30 }
 0x2db   :  { %v2268_v48 = vadd.f32 %v2260_v17, %v1978_v23  ;;  %v2319_v31 = vmul.f32 0.0051020407, %v2309_v35  ;;  %v2331_v40 = vmul.f32 %v6466_v50, %v6466_v50 }
 0x2eb   :  { %v2173_v61 = vpop.f32.mrb[8].mxu0  ;;  %v2185_v20 = vpop.f32.mrb[16].mxu1 }
 0x2ec   :  { %v2273_v23 = vsel %vm2247_vm8, %v2173_v61, 0.0  ;;  %v4297_v52 = vadd.f32 %v2185_v20, %v6412_v36  ;;  %v2175_v39 = vpop.f32.mrb[9].mxu0  ;;  %v2187_v22 = vpop.f32.mrb[17].mxu1 }
 0x2ed   :  { %v6471_v21 = vadd.f32 %v2273_v23, %v2261_v47  ;;  %v2274_v38 = vsel %vm2248_vm9, %v2175_v39, 0.0  ;;  %v4298_v29 = vadd.f32 %v2187_v22, %v6414_v46  ;;  %v6489_v46 = vsub.f32 %v6195_v44, %v2320_v26  ;;  %v2317_v22 = vpop.xlane.xlu0 %2316 }
 0x2ee   :  { %v2277_v63 = vsel %vm2247_vm8, %v4297_v52, 0.0  ;;  %v6478_v58 = vadd.f32 %v2274_v38, %v2262_v62 }
 0x2ef   :  { %v6482_v17 = vadd.f32 %v2277_v63, %v2265_v45  ;;  %v2278_v36 = vsel %vm2248_vm9, %v4298_v29, 0.0  ;;  %v2179_v47 = vpop.f32.mrb[10].mxu0  ;;  %v2191_v56 = vpop.f32.mrb[18].mxu1 }
 0x2f0   :  { %v2438_v62 = vsel %vm2301_vm10, %v6478_v58, 0.0  ;;  %v6493_v42 = vadd.f32 %v2278_v36, %v2266_v28  ;;  %v2275_v45 = vsel %vm2247_vm8, %v2179_v47, 0.0  ;;  %v4299_v35 = vadd.f32 %v2191_v56, %v6416_v41  ;;  %v2181_v61 = vpop.f32.mrb[11].mxu0  ;;  %v2193_v20 = vpop.f32.mrb[19].mxu1 }
 0x2f1   :  { %v2283_v23 = vadd.f32 %v2275_v45, %v2263_v18  ;;  %v2276_v52 = vsel %vm2248_vm9, %v2181_v61, 0.0  ;;  %v4300_v39 = vadd.f32 %v2193_v20, %v6418_v32  ;;  %v2439_v44 = vadd.f32 %v2438_v62, %v6471_v21 }
 0x2f2   :  { %v2279_v28 = vsel %vm2247_vm8, %v4299_v35, 0.0  ;;  %v2284_v38 = vadd.f32 %v2276_v52, %v2264_v60  ;;  %v2446_v29 = vsel %vm2301_vm10, %v6493_v42, 0.0  ;;  %v6507_v41 = vsub.f32 %v6217_v53, %v2319_v31 }
 0x2f3   :  { %v6509_v63 = vadd.f32 %v2279_v28, %v2267_v27  ;;  %v2280_v18 = vsel %vm2248_vm9, %v4300_v39, 0.0  ;;  %2440 = vadd.xlane.f32.xlu1 %v2439_v44  ;;  %v6514_v32 = vsub.f32 %v6209_v51, %v2320_v26  ;;  %v2338_v36 = vsel %vm2301_vm10, %v2331_v40, 0.0 }
 0x2f4   :  { %v2442_v16 = vsel %vm2301_vm10, %v2284_v38, 0.0  ;;  %v6518_v60 = vadd.f32 %v2280_v18, %v2268_v48  ;;  %v2335_v47 = vmul.f32 %v6489_v46, %v6489_v46  ;;  %v2321_v53 = vmul.f32 0.0051020407, %v2317_v22 }
 0x2f5   :  { %v2443_v56 = vadd.f32 %v2442_v16, %v2283_v23  ;;  %v2447_v27 = vadd.f32 %v2446_v29, %v6482_v17  ;;  %v6529_v51 = vsub.f32 %v6234_v55, %v2319_v31  ;;  %v2334_v48 = vmul.f32 %v6514_v32, %v6514_v32  ;;  %v6544_v55 = vld [vmem:[%s7913_s4 + $0x30] sm:$0xff]  ;;  %v2589_v16 = vpop.xlane.xlu0 %2588 }
 0x2f6   :  { %v2450_v26 = vsel %vm2301_vm10, %v6518_v60, 0.0  ;;  %v2339_v40 = vadd.f32 %v2338_v36, %v2330_v25  ;;  %v2333_v62 = vmul.f32 %v6507_v41, %v6507_v41  ;;  %v6538_v45 = vsub.f32 %v6227_v24, %v2321_v53 }
 0x2f7   :  { %2444 = vadd.xlane.f32.xlu0 %v2443_v56  ;;  %2448 = vadd.xlane.f32.xlu1 %v2447_v27  ;;  %v2346_v35 = vsel %vm2301_vm10, %v2335_v47, 0.0  ;;  %v2594_v31 = vsel %vm2301_vm10, %v6526_v54, 0.0  ;;  %v2451_v61 = vadd.f32 %v2450_v26, %v6509_v63  ;;  %v2332_v25 = vmul.f32 %v6529_v51, %v6529_v51 }
 0x2f8   :  { %v6552_v24 = vsub.f32 %v6245_v49, %v2321_v53  ;;  %v2347_v20 = vadd.f32 %v2346_v35, %v2334_v48  ;;  %v2595_v52 = vadd.f32 %v2594_v31, %v6544_v55  ;;  %v2337_v39 = vmul.f32 %v6538_v45, %v6538_v45  ;;  %v2585_v49 = vpop.xlane.xlu1 %2584 }
 0x2f9   :  { %v2342_v44 = vsel %vm2301_vm10, %v2333_v62, 0.0 }
 0x2fa   :  { %v2336_v22 = vmul.f32 %v6552_v24, %v6552_v24  ;;  %v2343_v28 = vadd.f32 %v2342_v44, %v2332_v25  ;;  %v2350_v29 = vsel %vm2301_vm10, %v2337_v39, 0.0 }
 0x2fb   :  { %2340 = vadd.xlane.f32.xlu1 %v2339_v40  ;;  %2452 = vadd.xlane.f32.xlu0 %v2451_v61 }
 0x2fc   :  { %v2351_v18 = vadd.f32 %v2350_v29, %v2336_v22  ;;  %v2593_v36 = vpop.xlane.xlu1 %2592 }
 0x2fd   :  { %v2600_v53 = vmul.f32 0.0051020407, %v2593_v36 }
 0x2ff   :  { %2348 = vadd.xlane.f32.xlu1 %v2347_v20  ;;  %2596 = vadd.xlane.f32.xlu0 %v2595_v52  ;;  %v6564_v26 = vsub.f32 %v6394_v33, %v2600_v53  ;;  %v6571_v35 = vsub.f32 %v6389_v34, %v2600_v53 }
 0x301   :  { %v2615_v25 = vmul.f32 %v6564_v26, %v6564_v26 }
 0x303   :  { %2344 = vadd.xlane.f32.xlu0 %v2343_v28  ;;  %v2626_v29 = vsel %vm2301_vm10, %v2615_v25, 0.0 }
 0x307   :  { %2352 = vadd.xlane.f32.xlu0 %v2351_v18 }
 0x380   :  { %v2441_v47 = vpop.xlane.xlu1 %2440 }
 0x384   :  { %v2445_v56 = vpop.xlane.xlu0 %2444  ;;  %v6561_v27 = vpop.xlane.xlu1 %2448 }
 0x385   :  { %v2455_v48 = vmul.f32 0.0051020407, %v2445_v56 }
 0x387   :  { %v6566_v40 = vsub.f32 %v2283_v23, %v2455_v48  ;;  %v6568_v62 = vsub.f32 %v2284_v38, %v2455_v48  ;;  %v2614_v38 = vmul.f32 %v6571_v35, %v6571_v35 }
 0x388   :  { %v2341_v31 = vpop.xlane.xlu1 %2340  ;;  %v6573_v61 = vpop.xlane.xlu0 %2452 }
 0x389   :  { %v2468_v20 = vmul.f32 %v6566_v40, %v6566_v40  ;;  %v2469_v33 = vmul.f32 %v6568_v62, %v6568_v62  ;;  %v2354_v52 = vmul.f32 0.0051020407, %v2341_v31  ;;  %v2627_v53 = vadd.f32 %v2626_v29, %v2614_v38  ;;  %v6594_v38 = vld [vmem:[%s7911_s2 + $0x110] sm:$0xff] }
 0x38b   :  { %v2478_v23 = vsel %vm2301_vm10, %v2469_v33, 0.0  ;;  %v2358_v34 = vadd.f32 1e-05, %v2354_v52  ;;  %v6588_v52 = vld [vmem:[%s7911_s2 + $0x100] sm:$0xff] }
 0x38c   :  { %v2349_v39 = vpop.xlane.xlu1 %2348  ;;  %v2597_v44 = vpop.xlane.xlu0 %2596  ;;  %v2479_v22 = vadd.f32 %v2478_v23, %v2468_v20 }
 0x38d   :  { %v2356_v28 = vmul.f32 0.0051020407, %v2349_v39  ;;  %5081 = vrsqrt.f32 %v2358_v34 }
 0x38e   :  { %2480 = vadd.xlane.f32.xlu0 %v2479_v22  ;;  %v2300_v22 = vld [vmem:[%s7911_s2 + $0x118] sm:$0xff] }
 0x38f   :  { %v2360_v18 = vadd.f32 1e-05, %v2356_v28 }
 0x390   :  { %v2345_v36 = vpop.xlane.xlu0 %2344 }
 0x391   :  { %5083 = vrsqrt.f32 %v2360_v18  ;;  %v2355_v56 = vmul.f32 0.0051020407, %v2345_v36  ;;  %v6603_v18 = vld [vmem:[%s7911_s2 + $0x108] sm:$0xff] }
 0x392   :  { %2628 = vadd.xlane.f32.xlu0 %v2627_v53 }
 0x393   :  { %v2359_v48 = vadd.f32 1e-05, %v2355_v56  ;;  %v7965_v56 = vmov 1  }
 0x394   :  { %v2353_v31 = vpop.xlane.xlu0 %2352 }
 0x395   :  { %v2357_v33 = vmul.f32 0.0051020407, %v2353_v31  ;;  %5085 = vrsqrt.f32 %v2359_v48  ;;  %v2598_v48 = vmul.f32 0.0051020407, %v2585_v49 }
 0x397   :  { %v2361_v20 = vadd.f32 1e-05, %v2357_v33  ;;  %v5082_v23 = vpop.eup %5081  ;;  %v6608_v31 = vsub.f32 %v6381_v59, %v2598_v48  ;;  %v2599_v33 = vmul.f32 0.0051020407, %v2589_v16 }
 0x398   :  { %v2366_v25 = vmul.f32 %v5082_v23, %v6588_v52 }
 0x399   :  { %5087 = vrsqrt.f32 %v2361_v20  ;;  %v6611_v20 = vsub.f32 %v6376_v57, %v2598_v48  ;;  %v2611_v23 = vmul.f32 %v6608_v31, %v6608_v31  ;;  %v2456_v57 = vmul.f32 0.0051020407, %v6561_v27 }
 0x39a   :  { %2372 = vperm.xlu1 %5073, %v2366_v25   ;;  %v6616_v25 = vsub.f32 %v6407_v37, %v2599_v33 }
 0x39b   :  { %v5084_v34 = vpop.eup %5083  ;;  %v2618_v16 = vsel %vm2301_vm10, %v2611_v23, 0.0  ;;  %v6645_v48 = vsub.f32 %v6482_v17, %v2456_v57 }
 0x39c   :  { %v2368_v39 = vmul.f32 %v5084_v34, %v6594_v38  ;;  %v2454_v34 = vmul.f32 0.0051020407, %v2441_v47  ;;  %v2613_v59 = vmul.f32 %v6616_v25, %v6616_v25 }
 0x39e   :  { %2382 = vperm.xlu1 %5073, %v2368_v39   ;;  %v2610_v39 = vmul.f32 %v6611_v20, %v6611_v20  ;;  %v6626_v49 = vsub.f32 %v6478_v58, %v2454_v34  ;;  %v6633_v47 = vsub.f32 %v6471_v21, %v2454_v34  ;;  %v2457_v58 = vmul.f32 0.0051020407, %v6573_v61 }
 0x39f   :  { %v5086_v28 = vpop.eup %5085  ;;  %v2470_v61 = vmul.f32 %v6645_v48, %v6645_v48 }
 0x3a0   :  { %v2367_v53 = vmul.f32 %v5086_v28, %v6603_v18  ;;  %v6621_v28 = vsub.f32 %v6402_v43, %v2599_v33  ;;  %v2467_v43 = vmul.f32 %v6626_v49, %v6626_v49  ;;  %v2466_v27 = vmul.f32 %v6633_v47, %v6633_v47 }
 0x3a1   :  { %v6650_v23 = vsub.f32 %v6518_v60, %v2457_v58 }
 0x3a2   :  { %v2612_v37 = vmul.f32 %v6621_v28, %v6621_v28  ;;  %v2474_v34 = vsel %vm2301_vm10, %v2467_v43, 0.0 }
 0x3a3   :  { %v5088_v29 = vpop.eup %5087  ;;  %v2473_v17 = vmul.f32 %v6650_v23, %v6650_v23 }
 0x3a4   :  { %v2369_v36 = vmul.f32 %v5088_v29, %v2300_v22  ;;  %v2619_v29 = vadd.f32 %v2618_v16, %v2610_v39  ;;  %v6656_v39 = vsub.f32 %v6509_v63, %v2457_v58 }
 0x3a6   :  { %2387 = vperm.xlu1 %5073, %v2369_v36   ;;  %v6638_v36 = vsub.f32 %v6493_v42, %v2456_v57  ;;  %v2601_v42 = vmul.f32 0.0051020407, %v2597_v44  ;;  %v2472_v44 = vmul.f32 %v6656_v39, %v6656_v39 }
 0x3a8   :  { %2377 = vperm.xlu0 %5074, %v2367_v53   ;;  %v2622_v53 = vsel %vm2301_vm10, %v2613_v59, 0.0  ;;  %v2471_v33 = vmul.f32 %v6638_v36, %v6638_v36  ;;  %v2475_v59 = vadd.f32 %v2474_v34, %v2466_v27  ;;  %v6661_v57 = vsub.f32 %v6526_v54, %v2601_v42  ;;  %v6686_v27 = vld [vmem:[%s7911_s2 + $0x130] sm:$0xff] }
 0x3a9   :  { %v2623_v21 = vadd.f32 %v2622_v53, %v2612_v37  ;;  %v6667_v16 = vsub.f32 %v6544_v55, %v2601_v42  ;;  %v6680_v55 = vld [vmem:[%s7911_s2 + $0x120] sm:$0xff] }
 0x3aa   :  { %5075 = vset.pattern.permute.xlu1 %v7965_v56  ;;  %v2482_v60 = vsel %vm2301_vm10, %v2471_v33, 0.0  ;;  %v2617_v63 = vmul.f32 %v6661_v57, %v6661_v57 }
 0x3ab   :  { %v2483_v37 = vadd.f32 %v2482_v60, %v2470_v61  ;;  %v2616_v54 = vmul.f32 %v6667_v16, %v6667_v16 }
 0x3ac   :  { %v2630_v58 = vsel %vm2301_vm10, %v2617_v63, 0.0 }
 0x3ad   :  { %v2631_v53 = vadd.f32 %v2630_v58, %v2616_v54 }
 0x3ca   :  { %2620 = vadd.xlane.f32.xlu1 %v2619_v29  ;;  %v2486_v29 = vsel %vm2301_vm10, %v2473_v17, 0.0 }
 0x3cb   :  { %v2487_v43 = vadd.f32 %v2486_v29, %v2472_v44 }
 0x3ce   :  { %2624 = vadd.xlane.f32.xlu1 %v2623_v21  ;;  %v8100_v21 = vmov 0  }
 0x3d2   :  { %2476 = vadd.xlane.f32.xlu1 %v2475_v59 }
 0x3d6   :  { %2484 = vadd.xlane.f32.xlu1 %v2483_v37 }
 0x3da   :  { %2488 = vadd.xlane.f32.xlu1 %v2487_v43  ;;  %v6693_v43 = vld [vmem:[%s7911_s2 + $0x140] sm:$0xff] }
 0x3de   :  { %2632 = vadd.xlane.f32.xlu1 %v2631_v53 }
 0x3ef   :  { %2400 = vperm.xlu1 %5075, %v6588_v52  }
 0x3f3   :  { %2410 = vperm.xlu1 %5075, %v6594_v38  }
 0x3f7   :  { %2415 = vperm.xlu1 %5075, %v2300_v22  }
 0x3fb   :  { %2536 = vperm.xlu1 %5075, %v6680_v55  }
 0x3ff   :  { %2546 = vperm.xlu1 %5075, %v6686_v27  }
 0x403   :  { %5076 = vset.pattern.permute.xlu1 %v8100_v21 }
 0x419   :  { %v2373_v52 = vpop.permute.xlu1 %2372 }
 0x41b   :  { %v2481_v38 = vpop.xlane.xlu0 %2480 }
 0x41d   :  { %v2383_v33 = vpop.permute.xlu1 %2382 }
 0x41e   :  { %v2394_v13 = vmul.f32 %v2383_v33, %v6514_v32  ;;  %v2395_v15 = vmul.f32 %v2383_v33, %v6489_v46  ;;  %v8101_v46 = vmov 1  }
 0x41f   :  { %v2629_v42 = vpop.xlane.xlu0 %2628 }
 0x420   :  { %v2636_v59 = vmul.f32 0.0051020407, %v2629_v42 }
 0x422   :  { %v2640_v37 = vadd.f32 1e-05, %v2636_v59  ;;  %v2491_v59 = vmul.f32 0.0051020407, %v2481_v38 }
 0x424   :  { %v2495_v14 = vadd.f32 1e-05, %v2491_v59 }
 0x425   :  { %v2388_v22 = vpop.permute.xlu1 %2387 }
 0x426   :  { %v2396_v33 = vmul.f32 %v2388_v22, %v6552_v24  ;;  %v2397_v59 = vmul.f32 %v2388_v22, %v6538_v45  ;;  %v2581_v24 = vld [vmem:[%s7911_s2 + $0x158] sm:$0xff] }
 0x457   :  { %v2621_v34 = vpop.xlane.xlu1 %2620 }
 0x458   :  { %v2634_v61 = vmul.f32 0.0051020407, %v2621_v34  ;;  %v2579_v34 = vld [vmem:[%s7911_s2 + $0x148] sm:$0xff] }
 0x45a   :  { %v2638_v17 = vadd.f32 1e-05, %v2634_v61 }
 0x45b   :  { %v2625_v60 = vpop.xlane.xlu1 %2624 }
 0x45c   :  { %5089 = vrsqrt.f32 %v2638_v17  ;;  %v2635_v44 = vmul.f32 0.0051020407, %v2625_v60 }
 0x45e   :  { %v2639_v63 = vadd.f32 1e-05, %v2635_v44 }
 0x45f   :  { %v2477_v29 = vpop.xlane.xlu1 %2476 }
 0x460   :  { %5091 = vrsqrt.f32 %v2639_v63  ;;  %v2490_v53 = vmul.f32 0.0051020407, %v2477_v29  ;;  %v2390_v29 = vmul.f32 %v2373_v52, %v6463_v30 }
 0x461   :  { %5093 = vrsqrt.f32 %v2640_v37 }
 0x462   :  { %v2494_v17 = vadd.f32 1e-05, %v2490_v53 }
 0x463   :  { %v2485_v54 = vpop.xlane.xlu1 %2484 }
 0x464   :  { %5095 = vrsqrt.f32 %v2494_v17  ;;  %v2492_v53 = vmul.f32 0.0051020407, %v2485_v54 }
 0x466   :  { %v5090_v58 = vpop.eup %5089 }
 0x467   :  { %v2489_v56 = vpop.xlane.xlu1 %2488  ;;  %v2646_v42 = vmul.f32 %v5090_v58, %v6693_v43  ;;  %v2391_v58 = vmul.f32 %v2373_v52, %v6466_v50  ;;  %v2496_v50 = vadd.f32 1e-05, %v2492_v53 }
 0x468   :  { %v2493_v52 = vmul.f32 0.0051020407, %v2489_v56 }
 0x469   :  { %2652 = vperm.xlu0 %5074, %v2646_v42  }
 0x46a   :  { %v5092_v61 = vpop.eup %5091 }
 0x46b   :  { %v2633_v60 = vpop.xlane.xlu1 %2632  ;;  %v2647_v44 = vmul.f32 %v5092_v61, %v2579_v34  ;;  %v5094_v37 = vpop.eup %5093 }
 0x46c   :  { %v2637_v63 = vmul.f32 0.0051020407, %v2633_v60  ;;  %v2648_v38 = vmul.f32 %v5094_v37, %v6702_v19 }
 0x46d   :  { %2657 = vperm.xlu1 %5076, %v2647_v44  }
 0x46e   :  { %v2641_v12 = vadd.f32 1e-05, %v2637_v63  ;;  %v5096_v45 = vpop.eup %5095  ;;  %v2435_v63 = vld [vmem:[%s7911_s2 + $0x128] sm:$0xff] }
 0x46f   :  { %v2401_v42 = vpop.permute.xlu1 %2400  ;;  %v2502_v37 = vmul.f32 %v5096_v45, %v6680_v55 }
 0x470   :  { %5097 = vrsqrt.f32 %v2641_v12  ;;  %v2418_v61 = vadd.f32 %v2401_v42, %v2390_v29  ;;  %v2419_v60 = vadd.f32 %v2401_v42, %v2391_v58  ;;  %v2437_v12 = vld [vmem:[%s7911_s2 + $0x138] sm:$0xff] }
 0x471   :  { %2662 = vperm.xlu1 %5076, %v2648_v38   ;;  %5099 = vrsqrt.f32 %v2495_v14 }
 0x472   :  { %2426 = vst [vmem:[%s7915_s6 + $0x200] sm:$0xff] %v2418_v61  ;;  %2427 = vst.msk [vmem:[%s7915_s6 + $0x208] sm:$0xff] %vm2301_vm10, %v2419_v60  ;;  %5101 = vrsqrt.f32 %v2496_v50 }
 0x473   :  { %v2411_v30 = vpop.permute.xlu1 %2410 }
 0x474   :  { %v2422_v32 = vadd.f32 %v2411_v30, %v2394_v13  ;;  %v2423_v54 = vadd.f32 %v2411_v30, %v2395_v15  ;;  %v2497_v13 = vadd.f32 1e-05, %v2493_v52 }
 0x475   :  { %5078 = vset.pattern.permute.xlu1 %v8101_v46 }
 0x476   :  { %2430 = vst [vmem:[%s7915_s6 + $0x220] sm:$0xff] %v2422_v32  ;;  %2431 = vst.msk [vmem:[%s7915_s6 + $0x228] sm:$0xff] %vm2301_vm10, %v2423_v54  ;;  %2551 = vperm.xlu1 %5078, %v2437_v12   ;;  %5103 = vrsqrt.f32 %v2497_v13 }
 0x477   :  { %v2416_v14 = vpop.permute.xlu1 %2415 }
 0x478   :  { %v2424_v15 = vadd.f32 %v2416_v14, %v2396_v33  ;;  %v2425_v56 = vadd.f32 %v2416_v14, %v2397_v59 }
 0x47a   :  { %v5098_v22 = vpop.eup %5097  ;;  %2432 = vst [vmem:[%s7915_s6 + $0x230] sm:$0xff] %v2424_v15  ;;  %2433 = vst.msk [vmem:[%s7915_s6 + $0x238] sm:$0xff] %vm2301_vm10, %v2425_v56  ;;  %2685 = vperm.xlu1 %5078, %v2579_v34  }
 0x47b   :  { %v2649_v17 = vmul.f32 %v5098_v22, %v2581_v24  ;;  %v5100_v44 = vpop.eup %5099  ;;  %v2537_v38 = vpop.permute.xlu1 %2536 }
 0x47c   :  { %v2503_v29 = vmul.f32 %v5100_v44, %v2435_v63  ;;  %v5102_v58 = vpop.eup %5101 }
 0x47d   :  { %2667 = vperm.xlu0 %5074, %v2649_v17   ;;  %v2504_v34 = vmul.f32 %v5102_v58, %v6686_v27 }
 0x47e   :  { %5079 = vset.pattern.permute.xlu1 %v8100_v21 }
 0x47f   :  { %2508 = vperm.xlu1 %5079, %v2502_v37   ;;  %v2547_v53 = vpop.permute.xlu1 %2546 }
 0x480   :  { %v5104_v42 = vpop.eup %5103 }
 0x481   :  { %5077 = vset.pattern.permute.xlu0 %v8101_v46  ;;  %v2505_v55 = vmul.f32 %v5104_v42, %v2437_v12 }
 0x482   :  { %2405 = vperm.xlu0 %5077, %v6603_v18   ;;  %v2378_v18 = vpop.permute.xlu0 %2377 }
 0x483   :  { %2513 = vperm.xlu1 %5079, %v2503_v29   ;;  %v2393_v59 = vmul.f32 %v2378_v18, %v6507_v41 }
 0x486   :  { %2541 = vperm.xlu0 %5077, %v2435_v63  }
 0x487   :  { %2518 = vperm.xlu1 %5079, %v2504_v34  }
 0x48a   :  { %2680 = vperm.xlu0 %5077, %v6693_v43  }
 0x48b   :  { %2523 = vperm.xlu1 %5079, %v2505_v55  }
 0x48e   :  { %2695 = vperm.xlu0 %5077, %v2581_v24  }
 0x48f   :  { %5080 = vset.pattern.permute.xlu1 %v8101_v46 }
 0x490   :  { %2690 = vperm.xlu1 %5080, %v6702_v19  }
 0x4e8   :  { %v2653_v50 = vpop.permute.xlu0 %2652 }
 0x4ec   :  { %v2658_v61 = vpop.permute.xlu1 %2657 }
 0x4ed   :  { %v2672_v27 = vmul.f32 %v2658_v61, %v6621_v28  ;;  %v2673_v52 = vmul.f32 %v2658_v61, %v6616_v25  ;;  %v2392_v25 = vmul.f32 %v2378_v18, %v6529_v51 }
 0x4f0   :  { %v2663_v60 = vpop.permute.xlu1 %2662 }
 0x4f5   :  { %v2552_v30 = vpop.permute.xlu1 %2551 }
 0x4f9   :  { %v2686_v12 = vpop.permute.xlu1 %2685 }
 0x4fa   :  { %v2700_v32 = vadd.f32 %v2686_v12, %v2672_v27  ;;  %v2701_v43 = vadd.f32 %v2686_v12, %v2673_v52  ;;  %v2818_v27 = vsel %vm2301_vm10, %v5242_v3, 0.0 }
 0x4fc   :  { %2708 = vst [vmem:[%s7915_s6 + $0x290] sm:$0xff] %v2700_v32  ;;  %2709 = vst.msk [vmem:[%s7915_s6 + $0x298] sm:$0xff] %vm2301_vm10, %v2701_v43  ;;  %v2668_v19 = vpop.permute.xlu0 %2667 }
 0x4fd   :  { %v2677_v55 = vmul.f32 %v2668_v19, %v6661_v57 }
 0x4fe   :  { %v2509_v54 = vpop.permute.xlu1 %2508 }
 0x4ff   :  { %v2526_v33 = vmul.f32 %v2509_v54, %v6633_v47  ;;  %v2527_v28 = vmul.f32 %v2509_v54, %v6626_v49 }
 0x501   :  { %v2554_v14 = vadd.f32 %v2537_v38, %v2526_v33  ;;  %v2555_v13 = vadd.f32 %v2537_v38, %v2527_v28  ;;  %v2406_v15 = vpop.permute.xlu0 %2405 }
 0x502   :  { %v2420_v56 = vadd.f32 %v2406_v15, %v2392_v25  ;;  %v2421_v24 = vadd.f32 %v2406_v15, %v2393_v59  ;;  %v2514_v45 = vpop.permute.xlu1 %2513 }
 0x503   :  { %2562 = vst [vmem:[%s7915_s6 + $0x240] sm:$0xff] %v2554_v14  ;;  %2563 = vst.msk [vmem:[%s7915_s6 + $0x248] sm:$0xff] %vm2301_vm10, %v2555_v13  ;;  %v2528_v49 = vmul.f32 %v2514_v45, %v6566_v40  ;;  %v2529_v51 = vmul.f32 %v2514_v45, %v6568_v62  ;;  %v2670_v40 = vmul.f32 %v2653_v50, %v6611_v20 }
 0x504   :  { %2428 = vst [vmem:[%s7915_s6 + $0x210] sm:$0xff] %v2420_v56  ;;  %2429 = vst.msk [vmem:[%s7915_s6 + $0x218] sm:$0xff] %vm2301_vm10, %v2421_v24  ;;  %v2671_v62 = vmul.f32 %v2653_v50, %v6608_v31  ;;  %v2826_v50 = vsel %vm2301_vm10, %v5262_v7, 0.0 }
 0x505   :  { %v2542_v41 = vpop.permute.xlu0 %2541 }
 0x506   :  { %v2556_v47 = vadd.f32 %v2542_v41, %v2528_v49  ;;  %v2557_v22 = vadd.f32 %v2542_v41, %v2529_v51  ;;  %v2519_v17 = vpop.permute.xlu1 %2518 }
 0x507   :  { %v2530_v44 = vmul.f32 %v2519_v17, %v6645_v48  ;;  %v2531_v37 = vmul.f32 %v2519_v17, %v6638_v36  ;;  %v2676_v36 = vmul.f32 %v2668_v19, %v6667_v16 }
 0x508   :  { %2564 = vst [vmem:[%s7915_s6 + $0x250] sm:$0xff] %v2556_v47  ;;  %2565 = vst.msk [vmem:[%s7915_s6 + $0x258] sm:$0xff] %vm2301_vm10, %v2557_v22 }
 0x509   :  { %v2558_v63 = vadd.f32 %v2547_v53, %v2530_v44  ;;  %v2559_v29 = vadd.f32 %v2547_v53, %v2531_v37  ;;  %v2681_v58 = vpop.permute.xlu0 %2680 }
 0x50a   :  { %v2698_v34 = vadd.f32 %v2681_v58, %v2670_v40  ;;  %v2699_v48 = vadd.f32 %v2681_v58, %v2671_v62  ;;  %v2524_v42 = vpop.permute.xlu1 %2523 }
 0x50b   :  { %2566 = vst [vmem:[%s7915_s6 + $0x260] sm:$0xff] %v2558_v63  ;;  %2567 = vst.msk [vmem:[%s7915_s6 + $0x268] sm:$0xff] %vm2301_vm10, %v2559_v29  ;;  %v2532_v31 = vmul.f32 %v2524_v42, %v6656_v39  ;;  %v2533_v20 = vmul.f32 %v2524_v42, %v6650_v23  ;;  %v2674_v39 = vmul.f32 %v2663_v60, %v6571_v35 }
 0x50c   :  { %2706 = vst [vmem:[%s7915_s6 + $0x280] sm:$0xff] %v2698_v34  ;;  %2707 = vst.msk [vmem:[%s7915_s6 + $0x288] sm:$0xff] %vm2301_vm10, %v2699_v48  ;;  %v2675_v23 = vmul.f32 %v2663_v60, %v6564_v26  ;;  %v2822_v60 = vsel %vm2301_vm10, %v5252_v5, 0.0 }
 0x50d   :  { %v2560_v38 = vadd.f32 %v2552_v30, %v2532_v31  ;;  %v2561_v53 = vadd.f32 %v2552_v30, %v2533_v20  ;;  %v2696_v61 = vpop.permute.xlu0 %2695  ;;  %v2814_v30 = vsel %vm2301_vm10, %v5232_v1, 0.0 }
 0x50e   :  { %v2704_v18 = vadd.f32 %v2696_v61, %v2676_v36  ;;  %v2705_v16 = vadd.f32 %v2696_v61, %v2677_v55 }
 0x50f   :  { %2568 = vst [vmem:[%s7915_s6 + $0x270] sm:$0xff] %v2560_v38  ;;  %2569 = vst.msk [vmem:[%s7915_s6 + $0x278] sm:$0xff] %vm2301_vm10, %v2561_v53  ;;  %v2691_v57 = vpop.permute.xlu1 %2690 }
 0x510   :  { %2712 = vst [vmem:[%s7915_s6 + $0x2b0] sm:$0xff] %v2704_v18  ;;  %2713 = vst.msk [vmem:[%s7915_s6 + $0x2b8] sm:$0xff] %vm2301_vm10, %v2705_v16  ;;  %v2702_v26 = vadd.f32 %v2691_v57, %v2674_v39  ;;  %v2703_v35 = vadd.f32 %v2691_v57, %v2675_v23 }
 0x512   :  { %2710 = vst [vmem:[%s7915_s6 + $0x2a0] sm:$0xff] %v2702_v26  ;;  %2711 = vst.msk [vmem:[%s7915_s6 + $0x2a8] sm:$0xff] %vm2301_vm10, %v2703_v35 }
 0x513   :  { %5175 = dma.done.wait [#allocation3], 8192 }
 0x514   :  { %5176 = vsyncadd [#allocation3], 4294959104  ;;  %5105 = vset.pattern.permute.xlu1 %v8101_v46  ;;  %5106 = vset.pattern.permute.xlu0 %v8101_v46  ;;  %v2823_v52 = vadd.f32 %v2822_v60, %v5247_v4  ;;  %v2815_v12 = vadd.f32 %v2814_v30, %v5227_v0  ;;  %v2827_v32 = vadd.f32 %v2826_v50, %v5257_v6  ;;  %v2834_v19 = vsel %vm2301_vm10, %v5282_v11, 0.0  ;;  %v8102_v25 = vld [vmem:[#allocation9_spill] sm:$0xff]  ;;  %v8103_v14 = vld [vmem:[#allocation7_spill] sm:$0xff] }
 0x515   :  { %v2819_v43 = vadd.f32 %v2818_v27, %v5237_v2  ;;  %v2830_v54 = vsel %vm2301_vm10, %v5272_v9, 0.0  ;;  %v2835_v33 = vadd.f32 %v2834_v19, %v5277_v10  ;;  %v2842_v59 = vsel %vm2301_vm10, %v8102_v25, 0.0  ;;  %v8104_v15 = vld [vmem:[#allocation8_spill] sm:$0xff]  ;;  %v8105_v24 = vld [vmem:[#allocation6_spill] sm:$0xff]  ;;  %v8106_v49 = vld [vmem:[#allocation13_spill] sm:$0xff] }
 0x516   :  { %2824 = vadd.xlane.f32.xlu1 %v2823_v52  ;;  %2816 = vadd.xlane.f32.xlu0 %v2815_v12  ;;  %v2831_v28 = vadd.f32 %v2830_v54, %v5267_v8  ;;  %v2838_v13 = vsel %vm2301_vm10, %v8103_v14, 0.0  ;;  %v2843_v56 = vadd.f32 %v2842_v59, %v8104_v15  ;;  %v2850_v51 = vsel %vm2301_vm10, %v8106_v49, 0.0  ;;  %v8107_v41 = vld [vmem:[#allocation11_spill] sm:$0xff]  ;;  %v8108_v22 = vld [vmem:[#allocation12_spill] sm:$0xff]  ;;  %v8109_v44 = vld [vmem:[#allocation10_spill] sm:$0xff] }
 0x517   :  { %v2839_v45 = vadd.f32 %v2838_v13, %v8105_v24  ;;  %v2846_v47 = vsel %vm2301_vm10, %v8107_v41, 0.0  ;;  %v2851_v17 = vadd.f32 %v2850_v51, %v8108_v22  ;;  %v8110_v40 = vld [vmem:[#allocation17_spill] sm:$0xff]  ;;  %v8111_v63 = vld [vmem:[#allocation15_spill] sm:$0xff]  ;;  %v8112_v58 = vld [vmem:[#allocation16_spill] sm:$0xff] }
 0x518   :  { %v2847_v37 = vadd.f32 %v2846_v47, %v8109_v44  ;;  %v2858_v62 = vsel %vm2301_vm10, %v8110_v40, 0.0  ;;  %v2854_v29 = vsel %vm2301_vm10, %v8111_v63, 0.0  ;;  %v8113_v48 = vld [vmem:[#allocation14_spill] sm:$0xff]  ;;  %v8114_v31 = vld [vmem:[#allocation21_spill] sm:$0xff]  ;;  %v8115_v36 = vld [vmem:[#allocation19_spill] sm:$0xff] }
 0x519   :  { %v2859_v34 = vadd.f32 %v2858_v62, %v8112_v58  ;;  %v2855_v42 = vadd.f32 %v2854_v29, %v8113_v48  ;;  %v2866_v20 = vsel %vm2301_vm10, %v8114_v31, 0.0  ;;  %v2862_v55 = vsel %vm2301_vm10, %v8115_v36, 0.0  ;;  %v8116_v38 = vld [vmem:[#allocation20_spill] sm:$0xff]  ;;  %v8117_v61 = vld [vmem:[#allocation18_spill] sm:$0xff]  ;;  %v8118_v23 = vld [vmem:[#allocation25_spill] sm:$0xff] }
 0x51a   :  { %2828 = vadd.xlane.f32.xlu1 %v2827_v32  ;;  %2820 = vadd.xlane.f32.xlu0 %v2819_v43  ;;  %v2867_v53 = vadd.f32 %v2866_v20, %v8116_v38  ;;  %v2863_v39 = vadd.f32 %v2862_v55, %v8117_v61  ;;  %v2874_v18 = vsel %vm2301_vm10, %v8118_v23, 0.0  ;;  %v8119_v16 = vld [vmem:[#allocation23_spill] sm:$0xff]  ;;  %v8120_v26 = vld [vmem:[#allocation24_spill] sm:$0xff]  ;;  %v8121_v60 = vld [vmem:[#allocation22_spill] sm:$0xff] }
 0x51b   :  { %v2870_v57 = vsel %vm2301_vm10, %v8119_v16, 0.0  ;;  %v2875_v35 = vadd.f32 %v2874_v18, %v8120_v26  ;;  %v8122_v50 = vld [vmem:[#allocation29_spill] sm:$0xff]  ;;  %v8123_v52 = vld [vmem:[#allocation27_spill] sm:$0xff]  ;;  %v8124_v32 = vld [vmem:[#allocation28_spill] sm:$0xff] }
 0x51c   :  { %v2871_v30 = vadd.f32 %v2870_v57, %v8121_v60  ;;  %v2882_v27 = vsel %vm2301_vm10, %v8122_v50, 0.0  ;;  %v2878_v12 = vsel %vm2301_vm10, %v8123_v52, 0.0  ;;  %v8125_v19 = vld [vmem:[#allocation26_spill] sm:$0xff]  ;;  %v8127_v59 = vld [vmem:[#allocation31_spill] sm:$0xff]  ;;  %v8142_v46 = vld [vmem:[#allocation49_spill] sm:$0xff] }
 0x51d   :  { %v2883_v43 = vadd.f32 %v2882_v27, %v8124_v32  ;;  %v2879_v54 = vadd.f32 %v2878_v12, %v8125_v19  ;;  %v2886_v13 = vsel %vm2301_vm10, %v8127_v59, 0.0  ;;  %v8129_v51 = vld [vmem:[#allocation30_spill] sm:$0xff]  ;;  %v8131_v62 = vld [vmem:[#allocation35_spill] sm:$0xff] }
 0x51e   :  { %2836 = vadd.xlane.f32.xlu1 %v2835_v33  ;;  %2832 = vadd.xlane.f32.xlu0 %v2831_v28  ;;  %v8126_v33 = vld [vmem:[#allocation33_spill] sm:$0xff]  ;;  %v2887_v47 = vadd.f32 %v2886_v13, %v8129_v51  ;;  %v2894_v29 = vsel %vm2301_vm10, %v8131_v62, 0.0  ;;  %v8133_v20 = vld [vmem:[#allocation34_spill] sm:$0xff]  ;;  %v8135_v18 = vld [vmem:[#allocation39_spill] sm:$0xff] }
 0x51f   :  { %v2890_v28 = vsel %vm2301_vm10, %v8126_v33, 0.0  ;;  %v2895_v55 = vadd.f32 %v2894_v29, %v8133_v20  ;;  %v2902_v57 = vsel %vm2301_vm10, %v8135_v18, 0.0  ;;  %v8137_v27 = vld [vmem:[#allocation38_spill] sm:$0xff]  ;;  %v8146_v18 = vld [vmem:[#allocation53_spill] sm:$0xff] }
 0x520   :  { %v2903_v12 = vadd.f32 %v2902_v57, %v8137_v27  ;;  %v8144_v57 = vld [vmem:[#allocation48_spill] sm:$0xff] }
 0x522   :  { %2844 = vadd.xlane.f32.xlu1 %v2843_v56  ;;  %2840 = vadd.xlane.f32.xlu0 %v2839_v45  ;;  %v8128_v56 = vld [vmem:[#allocation32_spill] sm:$0xff] }
 0x523   :  { %v2891_v45 = vadd.f32 %v2890_v28, %v8128_v56  ;;  %v8139_v28 = vld [vmem:[#allocation43_spill] sm:$0xff] }
 0x524   :  { %v2910_v13 = vsel %vm2301_vm10, %v8139_v28, 0.0 }
 0x526   :  { %2852 = vadd.xlane.f32.xlu1 %v2851_v17  ;;  %2848 = vadd.xlane.f32.xlu0 %v2847_v37  ;;  %v8130_v17 = vld [vmem:[#allocation37_spill] sm:$0xff] }
 0x527   :  { %v2898_v37 = vsel %vm2301_vm10, %v8130_v17, 0.0 }
 0x52a   :  { %2860 = vadd.xlane.f32.xlu1 %v2859_v34  ;;  %2856 = vadd.xlane.f32.xlu0 %v2855_v42  ;;  %v8132_v34 = vld [vmem:[#allocation36_spill] sm:$0xff] }
 0x52b   :  { %v2899_v42 = vadd.f32 %v2898_v37, %v8132_v34  ;;  %v8141_v37 = vld [vmem:[#allocation42_spill] sm:$0xff] }
 0x52c   :  { %v2911_v29 = vadd.f32 %v2910_v13, %v8141_v37  ;;  %v8148_v13 = vld [vmem:[#allocation52_spill] sm:$0xff] }
 0x52e   :  { %2868 = vadd.xlane.f32.xlu1 %v2867_v53  ;;  %2864 = vadd.xlane.f32.xlu0 %v2863_v39  ;;  %v8134_v53 = vld [vmem:[#allocation41_spill] sm:$0xff] }
 0x52f   :  { %v2906_v39 = vsel %vm2301_vm10, %v8134_v53, 0.0 }
 0x532   :  { %2876 = vadd.xlane.f32.xlu1 %v2875_v35  ;;  %2872 = vadd.xlane.f32.xlu0 %v2871_v30  ;;  %v8136_v35 = vld [vmem:[#allocation40_spill] sm:$0xff] }
 0x533   :  { %v2907_v30 = vadd.f32 %v2906_v39, %v8136_v35 }
 0x536   :  { %2884 = vadd.xlane.f32.xlu1 %v2883_v43  ;;  %2880 = vadd.xlane.f32.xlu0 %v2879_v54  ;;  %v8138_v43 = vld [vmem:[#allocation45_spill] sm:$0xff] }
 0x537   :  { %v2914_v54 = vsel %vm2301_vm10, %v8138_v43, 0.0  ;;  %v8145_v43 = vld [vmem:[#allocation46_spill] sm:$0xff] }
 0x53a   :  { %2892 = vadd.xlane.f32.xlu1 %v2891_v45  ;;  %2888 = vadd.xlane.f32.xlu0 %v2887_v47  ;;  %v8140_v45 = vld [vmem:[#allocation44_spill] sm:$0xff] }
 0x53b   :  { %v2915_v47 = vadd.f32 %v2914_v54, %v8140_v45  ;;  %v8150_v45 = vld [vmem:[#allocation57_spill] sm:$0xff] }
 0x53e   :  { %2900 = vadd.xlane.f32.xlu1 %v2899_v42  ;;  %2896 = vadd.xlane.f32.xlu0 %v2895_v55  ;;  %v2922_v42 = vsel %vm2301_vm10, %v8142_v46, 0.0  ;;  %v8143_v55 = vld [vmem:[#allocation47_spill] sm:$0xff]  ;;  %v8149_v46 = vld [vmem:[#allocation50_spill] sm:$0xff] }
 0x53f   :  { %v2918_v39 = vsel %vm2301_vm10, %v8143_v55, 0.0  ;;  %v2923_v21 = vadd.f32 %v2922_v42, %v8144_v57 }
 0x540   :  { %v2919_v35 = vadd.f32 %v2918_v39, %v8145_v43  ;;  %v8152_v39 = vld [vmem:[#allocation56_spill] sm:$0xff] }
 0x542   :  { %2908 = vadd.xlane.f32.xlu1 %v2907_v30  ;;  %2904 = vadd.xlane.f32.xlu0 %v2903_v12  ;;  %v2930_v30 = vsel %vm2301_vm10, %v8146_v18, 0.0  ;;  %v8147_v12 = vld [vmem:[#allocation51_spill] sm:$0xff]  ;;  %v8153_v18 = vld [vmem:[#allocation54_spill] sm:$0xff] }
 0x543   :  { %v2926_v54 = vsel %vm2301_vm10, %v8147_v12, 0.0  ;;  %v2931_v28 = vadd.f32 %v2930_v30, %v8148_v13  ;;  %v6967_v30 = vld [vmem:[%s7911_s2 + $0x30] sm:$0xff] }
 0x544   :  { %v2927_v37 = vadd.f32 %v2926_v54, %v8149_v46  ;;  %8160 = vst [vmem:[#allocation12_spill] sm:$0xff] %v6967_v30  ;;  %v6974_v54 = vld [vmem:[%s7911_s2 + $0x38] sm:$0xff] }
 0x545   :  { %8161 = vst [vmem:[#allocation10_spill] sm:$0xff] %v6974_v54 }
 0x546   :  { %2916 = vadd.xlane.f32.xlu1 %v2915_v47  ;;  %2912 = vadd.xlane.f32.xlu0 %v2911_v29  ;;  %v2938_v47 = vsel %vm2301_vm10, %v8150_v45, 0.0  ;;  %v8151_v29 = vld [vmem:[#allocation55_spill] sm:$0xff] }
 0x547   :  { %v2934_v42 = vsel %vm2301_vm10, %v8151_v29, 0.0  ;;  %v2939_v57 = vadd.f32 %v2938_v47, %v8152_v39  ;;  %v6979_v47 = vld [vmem:[%s7911_s2 + $0x40] sm:$0xff] }
 0x548   :  { %v2935_v55 = vadd.f32 %v2934_v42, %v8153_v18  ;;  %8162 = vst [vmem:[#allocation17_spill] sm:$0xff] %v6979_v47  ;;  %v6986_v42 = vld [vmem:[%s7911_s2 + $0x48] sm:$0xff] }
 0x549   :  { %8163 = vst [vmem:[#allocation15_spill] sm:$0xff] %v6986_v42 }
 0x54a   :  { %2924 = vadd.xlane.f32.xlu1 %v2923_v21  ;;  %2920 = vadd.xlane.f32.xlu0 %v2919_v35  ;;  %v6932_v21 = vld [vmem:[%s7911_s2] sm:$0xff]  ;;  %v6938_v35 = vld [vmem:[%s7911_s2 + $0x10] sm:$0xff] }
 0x54b   :  { %8154 = vst [vmem:[#allocation9_spill] sm:$0xff] %v6932_v21  ;;  %8155 = vst [vmem:[#allocation7_spill] sm:$0xff] %v6938_v35 }
 0x54e   :  { %2932 = vadd.xlane.f32.xlu1 %v2931_v28  ;;  %2928 = vadd.xlane.f32.xlu0 %v2927_v37  ;;  %v6943_v28 = vld [vmem:[%s7911_s2 + $0x8] sm:$0xff]  ;;  %v6950_v37 = vld [vmem:[%s7911_s2 + $0x18] sm:$0xff] }
 0x54f   :  { %8156 = vst [vmem:[#allocation8_spill] sm:$0xff] %v6943_v28  ;;  %8157 = vst [vmem:[#allocation6_spill] sm:$0xff] %v6950_v37 }
 0x552   :  { %2940 = vadd.xlane.f32.xlu1 %v2939_v57  ;;  %2936 = vadd.xlane.f32.xlu0 %v2935_v55  ;;  %v6955_v55 = vld [vmem:[%s7911_s2 + $0x20] sm:$0xff]  ;;  %v6962_v57 = vld [vmem:[%s7911_s2 + $0x28] sm:$0xff] }
 0x553   :  { %8158 = vst [vmem:[#allocation13_spill] sm:$0xff] %v6955_v55  ;;  %8159 = vst [vmem:[#allocation11_spill] sm:$0xff] %v6962_v57 }
 0x563   :  { %3584 = vperm.xlu1 %5105, %v6932_v21  }
 0x567   :  { %3594 = vperm.xlu1 %5105, %v6938_v35  }
 0x568   :  { %3589 = vperm.xlu0 %5106, %v6943_v28  }
 0x56b   :  { %3599 = vperm.xlu1 %5105, %v6950_v37  }
 0x56c   :  { %3604 = vperm.xlu0 %5106, %v6955_v55  }
 0x56f   :  { %3609 = vperm.xlu1 %5105, %v6962_v57  }
 0x570   :  { %3614 = vperm.xlu0 %5106, %v6967_v30   ;;  %v6991_v30 = vld [vmem:[%s7911_s2 + $0x50] sm:$0xff] }
 0x571   :  { %8164 = vst [vmem:[#allocation16_spill] sm:$0xff] %v6991_v30 }
 0x573   :  { %3619 = vperm.xlu1 %5105, %v6974_v54   ;;  %v6998_v54 = vld [vmem:[%s7911_s2 + $0x58] sm:$0xff] }
 0x574   :  { %3624 = vperm.xlu0 %5106, %v6979_v47   ;;  %8165 = vst [vmem:[#allocation14_spill] sm:$0xff] %v6998_v54  ;;  %v7003_v47 = vld [vmem:[%s7911_s2 + $0x60] sm:$0xff] }
 0x575   :  { %8166 = vst [vmem:[#allocation21_spill] sm:$0xff] %v7003_v47 }
 0x577   :  { %3629 = vperm.xlu1 %5105, %v6986_v42  }
 0x578   :  { %3634 = vperm.xlu0 %5106, %v6991_v30  }
 0x57b   :  { %3639 = vperm.xlu1 %5105, %v6998_v54  }
 0x57c   :  { %3644 = vperm.xlu0 %5106, %v7003_v47  }
 0x5a3   :  { %v2825_v57 = vpop.xlane.xlu1 %2824  ;;  %v2817_v55 = vpop.xlane.xlu0 %2816 }
 0x5a4   :  { %v2944_v37 = vmul.f32 0.0051020407, %v2825_v57  ;;  %v2942_v42 = vmul.f32 0.0051020407, %v2817_v55 }
 0x5a6   :  { %v7008_v30 = vsub.f32 %v5247_v4, %v2944_v37  ;;  %v7011_v35 = vsub.f32 %v5252_v5, %v2944_v37  ;;  %v7014_v28 = vsub.f32 %v5227_v0, %v2942_v42  ;;  %v7017_v21 = vsub.f32 %v5232_v1, %v2942_v42 }
 0x5a7   :  { %v2829_v39 = vpop.xlane.xlu1 %2828  ;;  %v2821_v54 = vpop.xlane.xlu0 %2820 }
 0x5a8   :  { %8167 = vst [vmem:[#allocation19_spill] sm:$0xff] %v7008_v30  ;;  %8168 = vst [vmem:[#allocation20_spill] sm:$0xff] %v7011_v35  ;;  %v2945_v29 = vmul.f32 0.0051020407, %v2829_v39  ;;  %v2943_v47 = vmul.f32 0.0051020407, %v2821_v54  ;;  %v3038_v57 = vmul.f32 %v7014_v28, %v7014_v28  ;;  %v3039_v4 = vmul.f32 %v7017_v21, %v7017_v21 }
 0x5a9   :  { %8169 = vst [vmem:[#allocation18_spill] sm:$0xff] %v7014_v28  ;;  %8170 = vst [vmem:[#allocation25_spill] sm:$0xff] %v7017_v21  ;;  %v3043_v5 = vmul.f32 %v7011_v35, %v7011_v35  ;;  %v3042_v39 = vmul.f32 %v7008_v30, %v7008_v30 }
 0x5aa   :  { %v7026_v37 = vsub.f32 %v5262_v7, %v2945_v29  ;;  %v7029_v0 = vsub.f32 %v5237_v2, %v2943_v47  ;;  %v7032_v1 = vsub.f32 %v5242_v3, %v2943_v47  ;;  %v7037_v55 = vsub.f32 %v5257_v6, %v2945_v29 }
 0x5ab   :  { %v2837_v54 = vpop.xlane.xlu1 %2836  ;;  %v2833_v42 = vpop.xlane.xlu0 %2832  ;;  %v3102_v21 = vsel %vm2301_vm10, %v3039_v4, 0.0  ;;  %v3110_v35 = vsel %vm2301_vm10, %v3043_v5, 0.0 }
 0x5ac   :  { %8171 = vst [vmem:[#allocation23_spill] sm:$0xff] %v7026_v37  ;;  %8172 = vst [vmem:[#allocation24_spill] sm:$0xff] %v7032_v1  ;;  %v2947_v7 = vmul.f32 0.0051020407, %v2837_v54  ;;  %v2946_v28 = vmul.f32 0.0051020407, %v2833_v42  ;;  %v3103_v18 = vadd.f32 %v3102_v21, %v3038_v57  ;;  %v3040_v2 = vmul.f32 %v7029_v0, %v7029_v0 }
 0x5ad   :  { %v3041_v3 = vmul.f32 %v7032_v1, %v7032_v1  ;;  %v3045_v47 = vmul.f32 %v7026_v37, %v7026_v37  ;;  %v3111_v21 = vadd.f32 %v3110_v35, %v3042_v39  ;;  %v3044_v37 = vmul.f32 %v7037_v55, %v7037_v55 }
 0x5ae   :  { %v7048_v6 = vsub.f32 %v5282_v11, %v2947_v7  ;;  %v7051_v29 = vsub.f32 %v5267_v8, %v2946_v28  ;;  %v7054_v4 = vsub.f32 %v5272_v9, %v2946_v28  ;;  %3104 = vadd.xlane.f32.xlu0 %v3103_v18  ;;  %v7057_v57 = vsub.f32 %v5277_v10, %v2947_v7 }
 0x5af   :  { %v2845_v5 = vpop.xlane.xlu1 %2844  ;;  %v2841_v54 = vpop.xlane.xlu0 %2840  ;;  %v3106_v42 = vsel %vm2301_vm10, %v3041_v3, 0.0  ;;  %v3114_v11 = vsel %vm2301_vm10, %v3045_v47, 0.0 }
 0x5b0   :  { %v2949_v30 = vmul.f32 0.0051020407, %v2845_v5  ;;  %v2948_v8 = vmul.f32 0.0051020407, %v2841_v54  ;;  %v3107_v1 = vadd.f32 %v3106_v42, %v3040_v2  ;;  %v3046_v9 = vmul.f32 %v7051_v29, %v7051_v29 }
 0x5b1   :  { %v3047_v18 = vmul.f32 %v7054_v4, %v7054_v4  ;;  %v3049_v10 = vmul.f32 %v7048_v6, %v7048_v6  ;;  %v3115_v5 = vadd.f32 %v3114_v11, %v3044_v37 }
 0x5b2   :  { %v7070_v35 = vsub.f32 %v8104_v15, %v2949_v30  ;;  %v7073_v28 = vsub.f32 %v8102_v25, %v2949_v30  ;;  %v7076_v39 = vsub.f32 %v8105_v24, %v2948_v8  ;;  %v7079_v7 = vsub.f32 %v8103_v14, %v2948_v8  ;;  %3112 = vadd.xlane.f32.xlu0 %v3111_v21 }
 0x5b3   :  { %3108 = vadd.xlane.f32.xlu1 %v3107_v1  ;;  %v2853_v2 = vpop.xlane.xlu1 %2852  ;;  %v2849_v3 = vpop.xlane.xlu0 %2848  ;;  %v3118_v47 = vsel %vm2301_vm10, %v3047_v18, 0.0  ;;  %v3048_v15 = vmul.f32 %v7057_v57, %v7057_v57  ;;  %v3122_v54 = vsel %vm2301_vm10, %v3049_v10, 0.0 }
 0x5b4   :  { %8173 = vst [vmem:[#allocation22_spill] sm:$0xff] %v7073_v28  ;;  %v2951_v25 = vmul.f32 0.0051020407, %v2853_v2  ;;  %v2950_v30 = vmul.f32 0.0051020407, %v2849_v3  ;;  %v3119_v42 = vadd.f32 %v3118_v47, %v3046_v9  ;;  %v3050_v24 = vmul.f32 %v7076_v39, %v7076_v39 }
 0x5b5   :  { %v3051_v14 = vmul.f32 %v7079_v7, %v7079_v7  ;;  %v3053_v1 = vmul.f32 %v7073_v28, %v7073_v28  ;;  %v3052_v8 = vmul.f32 %v7070_v35, %v7070_v35 }
 0x5b6   :  { %v7092_v21 = vsub.f32 %v8106_v49, %v2951_v25  ;;  %v7095_v37 = vsub.f32 %v8109_v44, %v2950_v30  ;;  %v7098_v11 = vsub.f32 %v8107_v41, %v2950_v30  ;;  %3120 = vadd.xlane.f32.xlu0 %v3119_v42  ;;  %v7103_v9 = vsub.f32 %v8108_v22, %v2951_v25 }
 0x5b7   :  { %3116 = vadd.xlane.f32.xlu1 %v3115_v5  ;;  %v2861_v18 = vpop.xlane.xlu1 %2860  ;;  %v2857_v10 = vpop.xlane.xlu0 %2856  ;;  %v3126_v2 = vsel %vm2301_vm10, %v3051_v14, 0.0  ;;  %v3123_v49 = vadd.f32 %v3122_v54, %v3048_v15  ;;  %v3130_v3 = vsel %vm2301_vm10, %v3053_v1, 0.0 }
 0x5b8   :  { %8174 = vst [vmem:[#allocation29_spill] sm:$0xff] %v7095_v37  ;;  %8175 = vst [vmem:[#allocation27_spill] sm:$0xff] %v7098_v11  ;;  %v2953_v44 = vmul.f32 0.0051020407, %v2861_v18  ;;  %v2952_v47 = vmul.f32 0.0051020407, %v2857_v10  ;;  %v3127_v28 = vadd.f32 %v3126_v2, %v3050_v24  ;;  %v3054_v41 = vmul.f32 %v7095_v37, %v7095_v37 }
 0x5b9   :  { %v3055_v30 = vmul.f32 %v7098_v11, %v7098_v11  ;;  %v3057_v22 = vmul.f32 %v7092_v21, %v7092_v21  ;;  %v3131_v54 = vadd.f32 %v3130_v3, %v3052_v8 }
 0x5ba   :  { %v7114_v5 = vsub.f32 %v8110_v40, %v2953_v44  ;;  %v7117_v25 = vsub.f32 %v8113_v48, %v2952_v47  ;;  %v7120_v15 = vsub.f32 %v8111_v63, %v2952_v47  ;;  %3128 = vadd.xlane.f32.xlu0 %v3127_v28  ;;  %v7123_v42 = vsub.f32 %v8112_v58, %v2953_v44 }
 0x5bb   :  { %3124 = vadd.xlane.f32.xlu1 %v3123_v49  ;;  %v2869_v24 = vpop.xlane.xlu1 %2868  ;;  %v2865_v14 = vpop.xlane.xlu0 %2864  ;;  %v3134_v1 = vsel %vm2301_vm10, %v3055_v30, 0.0  ;;  %v3056_v40 = vmul.f32 %v7103_v9, %v7103_v9  ;;  %v3138_v18 = vsel %vm2301_vm10, %v3057_v22, 0.0 }
 0x5bc   :  { %8176 = vst [vmem:[#allocation28_spill] sm:$0xff] %v7117_v25  ;;  %8177 = vst [vmem:[#allocation26_spill] sm:$0xff] %v7120_v15  ;;  %v2955_v48 = vmul.f32 0.0051020407, %v2869_v24  ;;  %v2954_v10 = vmul.f32 0.0051020407, %v2865_v14  ;;  %v3135_v2 = vadd.f32 %v3134_v1, %v3054_v41  ;;  %v3058_v63 = vmul.f32 %v7117_v25, %v7117_v25 }
 0x5bd   :  { %v3059_v58 = vmul.f32 %v7120_v15, %v7120_v15  ;;  %v3061_v28 = vmul.f32 %v7114_v5, %v7114_v5  ;;  %v3139_v22 = vadd.f32 %v3138_v18, %v3056_v40 }
 0x5be   :  { %v7136_v8 = vsub.f32 %v8116_v38, %v2955_v48  ;;  %v7139_v49 = vsub.f32 %v8114_v31, %v2955_v48  ;;  %v7142_v3 = vsub.f32 %v8117_v61, %v2954_v10  ;;  %v7145_v44 = vsub.f32 %v8115_v36, %v2954_v10  ;;  %3136 = vadd.xlane.f32.xlu0 %v3135_v2 }
 0x5bf   :  { %3132 = vadd.xlane.f32.xlu1 %v3131_v54  ;;  %v2877_v47 = vpop.xlane.xlu1 %2876  ;;  %v2873_v41 = vpop.xlane.xlu0 %2872  ;;  %v3142_v30 = vsel %vm2301_vm10, %v3059_v58, 0.0  ;;  %v3060_v38 = vmul.f32 %v7123_v42, %v7123_v42  ;;  %v3146_v24 = vsel %vm2301_vm10, %v3061_v28, 0.0 }
 0x5c0   :  { %8178 = vst [vmem:[#allocation33_spill] sm:$0xff] %v7136_v8  ;;  %8179 = vst [vmem:[#allocation31_spill] sm:$0xff] %v7139_v49  ;;  %v2957_v31 = vmul.f32 0.0051020407, %v2877_v47  ;;  %v2956_v14 = vmul.f32 0.0051020407, %v2873_v41  ;;  %v3143_v1 = vadd.f32 %v3142_v30, %v3058_v63  ;;  %v3062_v61 = vmul.f32 %v7142_v3, %v7142_v3 }
 0x5c1   :  { %8180 = vst [vmem:[#allocation32_spill] sm:$0xff] %v7142_v3  ;;  %8181 = vst [vmem:[#allocation30_spill] sm:$0xff] %v7145_v44  ;;  %v3063_v36 = vmul.f32 %v7145_v44, %v7145_v44  ;;  %v3065_v54 = vmul.f32 %v7139_v49, %v7139_v49  ;;  %v3064_v10 = vmul.f32 %v7136_v8, %v7136_v8 }
 0x5c2   :  { %v7158_v48 = vsub.f32 %v8118_v23, %v2957_v31  ;;  %v7161_v40 = vsub.f32 %v8121_v60, %v2956_v14  ;;  %v7164_v18 = vsub.f32 %v8119_v16, %v2956_v14  ;;  %3144 = vadd.xlane.f32.xlu0 %v3143_v1  ;;  %v7169_v2 = vsub.f32 %v8120_v26, %v2957_v31 }
 0x5c3   :  { %3140 = vadd.xlane.f32.xlu1 %v3139_v22  ;;  %v2885_v63 = vpop.xlane.xlu1 %2884  ;;  %v2881_v58 = vpop.xlane.xlu0 %2880  ;;  %v3150_v28 = vsel %vm2301_vm10, %v3063_v36, 0.0  ;;  %v3147_v23 = vadd.f32 %v3146_v24, %v3060_v38  ;;  %v3154_v47 = vsel %vm2301_vm10, %v3065_v54, 0.0 }
 0x5c4   :  { %8182 = vst [vmem:[#allocation37_spill] sm:$0xff] %v7158_v48  ;;  %8183 = vst [vmem:[#allocation35_spill] sm:$0xff] %v7161_v40  ;;  %v2959_v60 = vmul.f32 0.0051020407, %v2885_v63  ;;  %v2958_v41 = vmul.f32 0.0051020407, %v2881_v58  ;;  %v3151_v30 = vadd.f32 %v3150_v28, %v3062_v61  ;;  %v3066_v16 = vmul.f32 %v7161_v40, %v7161_v40 }
 0x5c5   :  { %8184 = vst [vmem:[#allocation36_spill] sm:$0xff] %v7164_v18  ;;  %8185 = vst [vmem:[#allocation34_spill] sm:$0xff] %v7169_v2  ;;  %v3067_v14 = vmul.f32 %v7164_v18, %v7164_v18  ;;  %v3069_v26 = vmul.f32 %v7158_v48, %v7158_v48  ;;  %v3155_v24 = vadd.f32 %v3154_v47, %v3064_v10 }
 0x5c6   :  { %v7180_v22 = vsub.f32 %v8122_v50, %v2959_v60  ;;  %v7183_v31 = vsub.f32 %v8125_v19, %v2958_v41  ;;  %v7186_v38 = vsub.f32 %v8123_v52, %v2958_v41  ;;  %3152 = vadd.xlane.f32.xlu0 %v3151_v30  ;;  %v7189_v1 = vsub.f32 %v8124_v32, %v2959_v60 }
 0x5c7   :  { %3148 = vadd.xlane.f32.xlu1 %v3147_v23  ;;  %v2893_v61 = vpop.xlane.xlu1 %2892  ;;  %v2889_v36 = vpop.xlane.xlu0 %2888  ;;  %v3158_v54 = vsel %vm2301_vm10, %v3067_v14, 0.0  ;;  %v3068_v50 = vmul.f32 %v7169_v2, %v7169_v2  ;;  %v3162_v63 = vsel %vm2301_vm10, %v3069_v26, 0.0  ;;  %v8237_v2 = vld [vmem:[#allocation8_spill] sm:$0xff] }
 0x5c8   :  { %8186 = vst [vmem:[#allocation41_spill] sm:$0xff] %v7180_v22  ;;  %8187 = vst [vmem:[#allocation38_spill] sm:$0xff] %v7183_v31  ;;  %v2961_v19 = vmul.f32 0.0051020407, %v2893_v61  ;;  %v2960_v58 = vmul.f32 0.0051020407, %v2889_v36  ;;  %v3159_v28 = vadd.f32 %v3158_v54, %v3066_v16  ;;  %v3070_v52 = vmul.f32 %v7183_v31, %v7183_v31 }
 0x5c9   :  { %8188 = vst [vmem:[#allocation46_spill] sm:$0xff] %v7186_v38  ;;  %8189 = vst [vmem:[#allocation51_spill] sm:$0xff] %v7189_v1  ;;  %v3071_v32 = vmul.f32 %v7186_v38, %v7186_v38  ;;  %v3073_v10 = vmul.f32 %v7180_v22, %v7180_v22  ;;  %v3163_v26 = vadd.f32 %v3162_v63, %v3068_v50 }
 0x5ca   :  { %v7202_v23 = vsub.f32 %v8128_v56, %v2961_v19  ;;  %v7205_v47 = vsub.f32 %v8126_v33, %v2961_v19  ;;  %v7208_v60 = vsub.f32 %v8129_v51, %v2960_v58  ;;  %v7211_v41 = vsub.f32 %v8127_v59, %v2960_v58  ;;  %3160 = vadd.xlane.f32.xlu0 %v3159_v28 }
 0x5cb   :  { %3156 = vadd.xlane.f32.xlu1 %v3155_v24  ;;  %v2901_v30 = vpop.xlane.xlu1 %2900  ;;  %v2897_v16 = vpop.xlane.xlu0 %2896  ;;  %v3166_v14 = vsel %vm2301_vm10, %v3071_v32, 0.0  ;;  %v3072_v56 = vmul.f32 %v7189_v1, %v7189_v1  ;;  %v3170_v61 = vsel %vm2301_vm10, %v3073_v10, 0.0 }
 0x5cc   :  { %8190 = vst [vmem:[#allocation52_spill] sm:$0xff] %v7202_v23  ;;  %8191 = vst [vmem:[#allocation50_spill] sm:$0xff] %v7205_v47  ;;  %v2963_v33 = vmul.f32 0.0051020407, %v2901_v30  ;;  %v2962_v36 = vmul.f32 0.0051020407, %v2897_v16  ;;  %v3167_v54 = vadd.f32 %v3166_v14, %v3070_v52  ;;  %v3074_v51 = vmul.f32 %v7208_v60, %v7208_v60 }
 0x5cd   :  { %8192 = vst [vmem:[#allocation57_spill] sm:$0xff] %v7208_v60  ;;  %8193 = vst [vmem:[#allocation58_spill] sm:$0xff] %v7211_v41  ;;  %v3075_v59 = vmul.f32 %v7211_v41, %v7211_v41  ;;  %v3077_v24 = vmul.f32 %v7205_v47, %v7205_v47  ;;  %v3076_v58 = vmul.f32 %v7202_v23, %v7202_v23 }
 0x5ce   :  { %v7224_v19 = vsub.f32 %v8130_v17, %v2963_v33  ;;  %v7227_v50 = vsub.f32 %v8133_v20, %v2962_v36  ;;  %v7230_v63 = vsub.f32 %v8131_v62, %v2962_v36  ;;  %3168 = vadd.xlane.f32.xlu0 %v3167_v54  ;;  %v7235_v28 = vsub.f32 %v8132_v34, %v2963_v33 }
 0x5cf   :  { %3164 = vadd.xlane.f32.xlu1 %v3163_v26  ;;  %v2909_v52 = vpop.xlane.xlu1 %2908  ;;  %v2905_v32 = vpop.xlane.xlu0 %2904  ;;  %v3174_v10 = vsel %vm2301_vm10, %v3075_v59, 0.0  ;;  %v3171_v17 = vadd.f32 %v3170_v61, %v3072_v56  ;;  %v3178_v30 = vsel %vm2301_vm10, %v3077_v24, 0.0  ;;  %v8200_v56 = vld [vmem:[#allocation39_spill] sm:$0xff] }
 0x5d0   :  { %8194 = vst [vmem:[#allocation59_spill] sm:$0xff] %v7224_v19  ;;  %8195 = vst [vmem:[#allocation60_spill] sm:$0xff] %v7227_v50  ;;  %v2965_v20 = vmul.f32 0.0051020407, %v2909_v52  ;;  %v2964_v16 = vmul.f32 0.0051020407, %v2905_v32  ;;  %v3175_v14 = vadd.f32 %v3174_v10, %v3074_v51  ;;  %v3078_v62 = vmul.f32 %v7227_v50, %v7227_v50 }
 0x5d1   :  { %8196 = vst [vmem:[#allocation61_spill] sm:$0xff] %v7230_v63  ;;  %8197 = vst [vmem:[#allocation62_spill] sm:$0xff] %v7235_v28  ;;  %v3079_v36 = vmul.f32 %v7230_v63, %v7230_v63  ;;  %v3081_v34 = vmul.f32 %v7224_v19, %v7224_v19  ;;  %v3179_v54 = vadd.f32 %v3178_v30, %v3076_v58  ;;  %v8202_v51 = vld [vmem:[#allocation40_spill] sm:$0xff] }
 0x5d2   :  { %v7246_v26 = vsub.f32 %v8134_v53, %v2965_v20  ;;  %v7249_v33 = vsub.f32 %v8137_v27, %v2964_v16  ;;  %v7252_v61 = vsub.f32 %v8200_v56, %v2964_v16  ;;  %3176 = vadd.xlane.f32.xlu0 %v3175_v14  ;;  %v7255_v59 = vsub.f32 %v8202_v51, %v2965_v20  ;;  %v8204_v30 = vld [vmem:[#allocation44_spill] sm:$0xff]  ;;  %v8206_v14 = vld [vmem:[#allocation45_spill] sm:$0xff]  ;;  %v8208_v56 = vld [vmem:[#allocation42_spill] sm:$0xff] }
 0x5d3   :  { %3172 = vadd.xlane.f32.xlu1 %v3171_v17  ;;  %v2917_v24 = vpop.xlane.xlu1 %2916  ;;  %v2913_v52 = vpop.xlane.xlu0 %2912  ;;  %v3182_v32 = vsel %vm2301_vm10, %v3079_v36, 0.0  ;;  %v3080_v53 = vmul.f32 %v7235_v28, %v7235_v28  ;;  %v3186_v10 = vsel %vm2301_vm10, %v3081_v34, 0.0  ;;  %v8210_v51 = vld [vmem:[#allocation43_spill] sm:$0xff] }
 0x5d4   :  { %8198 = vst [vmem:[#allocation63_spill] sm:$0xff] %v7246_v26  ;;  %8199 = vst [vmem:[#allocation64_spill] sm:$0xff] %v7249_v33  ;;  %v2967_v27 = vmul.f32 0.0051020407, %v2917_v24  ;;  %v2966_v63 = vmul.f32 0.0051020407, %v2913_v52  ;;  %v3183_v50 = vadd.f32 %v3182_v32, %v3078_v62  ;;  %v3082_v16 = vmul.f32 %v7249_v33, %v7249_v33 }
 0x5d5   :  { %8201 = vst [vmem:[#allocation39_spill] sm:$0xff] %v7252_v61  ;;  %8203 = vst [vmem:[#allocation40_spill] sm:$0xff] %v7255_v59  ;;  %v3083_v58 = vmul.f32 %v7252_v61, %v7252_v61  ;;  %v3085_v17 = vmul.f32 %v7246_v26, %v7246_v26  ;;  %v3187_v61 = vadd.f32 %v3186_v10, %v3080_v53  ;;  %v8215_v10 = vld [vmem:[#allocation47_spill] sm:$0xff] }
 0x5d6   :  { %v7268_v20 = vsub.f32 %v8204_v30, %v2967_v27  ;;  %v7271_v36 = vsub.f32 %v8206_v14, %v2967_v27  ;;  %v7274_v34 = vsub.f32 %v8208_v56, %v2966_v63  ;;  %v7277_v62 = vsub.f32 %v8210_v51, %v2966_v63  ;;  %3184 = vadd.xlane.f32.xlu0 %v3183_v50  ;;  %v8217_v51 = vld [vmem:[#allocation48_spill] sm:$0xff] }
 0x5d7   :  { %3180 = vadd.xlane.f32.xlu1 %v3179_v54  ;;  %v2925_v24 = vpop.xlane.xlu1 %2924  ;;  %v2921_v52 = vpop.xlane.xlu0 %2920  ;;  %v3190_v32 = vsel %vm2301_vm10, %v3083_v58, 0.0  ;;  %v3084_v30 = vmul.f32 %v7255_v59, %v7255_v59  ;;  %v3194_v33 = vsel %vm2301_vm10, %v3085_v17, 0.0  ;;  %v8212_v54 = vld [vmem:[#allocation49_spill] sm:$0xff] }
 0x5d8   :  { %8205 = vst [vmem:[#allocation44_spill] sm:$0xff] %v7268_v20  ;;  %8207 = vst [vmem:[#allocation45_spill] sm:$0xff] %v7271_v36  ;;  %v2969_v27 = vmul.f32 0.0051020407, %v2925_v24  ;;  %v2968_v14 = vmul.f32 0.0051020407, %v2921_v52  ;;  %v3191_v41 = vadd.f32 %v3190_v32, %v3082_v16  ;;  %v3086_v56 = vmul.f32 %v7274_v34, %v7274_v34 }
 0x5d9   :  { %8209 = vst [vmem:[#allocation42_spill] sm:$0xff] %v7274_v34  ;;  %8211 = vst [vmem:[#allocation43_spill] sm:$0xff] %v7277_v62  ;;  %v3087_v50 = vmul.f32 %v7277_v62, %v7277_v62  ;;  %v3089_v63 = vmul.f32 %v7271_v36, %v7271_v36  ;;  %v3088_v16 = vmul.f32 %v7268_v20, %v7268_v20 }
 0x5da   :  { %v7290_v58 = vsub.f32 %v8212_v54, %v2969_v27  ;;  %v7293_v53 = vsub.f32 %v8145_v43, %v2968_v14  ;;  %v7296_v17 = vsub.f32 %v8215_v10, %v2968_v14  ;;  %3192 = vadd.xlane.f32.xlu0 %v3191_v41  ;;  %v7301_v24 = vsub.f32 %v8217_v51, %v2969_v27 }
 0x5db   :  { %3188 = vadd.xlane.f32.xlu1 %v3187_v61  ;;  %v2933_v52 = vpop.xlane.xlu1 %2932  ;;  %v2929_v32 = vpop.xlane.xlu0 %2928  ;;  %v3198_v62 = vsel %vm2301_vm10, %v3087_v50, 0.0  ;;  %v3195_v54 = vadd.f32 %v3194_v33, %v3084_v30  ;;  %v3202_v34 = vsel %vm2301_vm10, %v3089_v63, 0.0  ;;  %v8219_v61 = vld [vmem:[#allocation53_spill] sm:$0xff] }
 0x5dc   :  { %8213 = vst [vmem:[#allocation49_spill] sm:$0xff] %v7290_v58  ;;  %8214 = vst [vmem:[#allocation65_spill] sm:$0xff] %v7293_v53  ;;  %v2971_v43 = vmul.f32 0.0051020407, %v2933_v52  ;;  %v2970_v36 = vmul.f32 0.0051020407, %v2929_v32  ;;  %v3199_v60 = vadd.f32 %v3198_v62, %v3086_v56  ;;  %v3090_v41 = vmul.f32 %v7293_v53, %v7293_v53 }
 0x5dd   :  { %8216 = vst [vmem:[#allocation47_spill] sm:$0xff] %v7296_v17  ;;  %8218 = vst [vmem:[#allocation48_spill] sm:$0xff] %v7301_v24  ;;  %v3091_v14 = vmul.f32 %v7296_v17, %v7296_v17  ;;  %v3093_v27 = vmul.f32 %v7290_v58, %v7290_v58  ;;  %v3203_v62 = vadd.f32 %v3202_v34, %v3088_v16  ;;  %v8225_v34 = vld [vmem:[#allocation54_spill] sm:$0xff] }
 0x5de   :  { %v7312_v10 = vsub.f32 %v8219_v61, %v2971_v43  ;;  %v7315_v50 = vsub.f32 %v8149_v46, %v2970_v36  ;;  %v7318_v33 = vsub.f32 %v8147_v12, %v2970_v36  ;;  %3200 = vadd.xlane.f32.xlu0 %v3199_v60  ;;  %v7321_v30 = vsub.f32 %v8148_v13, %v2971_v43 }
 0x5df   :  { %3196 = vadd.xlane.f32.xlu1 %v3195_v54  ;;  %v2941_v56 = vpop.xlane.xlu1 %2940  ;;  %v2937_v63 = vpop.xlane.xlu0 %2936  ;;  %v3206_v51 = vsel %vm2301_vm10, %v3091_v14, 0.0  ;;  %v3092_v52 = vmul.f32 %v7301_v24, %v7301_v24  ;;  %v3210_v32 = vsel %vm2301_vm10, %v3093_v27, 0.0  ;;  %v8227_v54 = vld [vmem:[#allocation55_spill] sm:$0xff] }
 0x5e0   :  { %8220 = vst [vmem:[#allocation53_spill] sm:$0xff] %v7312_v10  ;;  %8221 = vst [vmem:[#allocation66_spill] sm:$0xff] %v7315_v50  ;;  %v2973_v46 = vmul.f32 0.0051020407, %v2941_v56  ;;  %v2972_v61 = vmul.f32 0.0051020407, %v2937_v63  ;;  %v3207_v17 = vadd.f32 %v3206_v51, %v3090_v41  ;;  %v3094_v12 = vmul.f32 %v7315_v50, %v7315_v50 }
 0x5e1   :  { %8222 = vst [vmem:[#allocation67_spill] sm:$0xff] %v7318_v33  ;;  %8223 = vst [vmem:[#allocation68_spill] sm:$0xff] %v7321_v30  ;;  %v3095_v13 = vmul.f32 %v7318_v33, %v7318_v33  ;;  %v3097_v60 = vmul.f32 %v7312_v10, %v7312_v10  ;;  %v8229_v41 = vld [vmem:[#allocation56_spill] sm:$0xff]  ;;  %v3211_v56 = vadd.f32 %v3210_v32, %v3092_v52  ;;  %v8231_v33 = vmov 0  }
 0x5e2   :  { %v7334_v36 = vsub.f32 %v8150_v45, %v2973_v46  ;;  %v7337_v16 = vsub.f32 %v8225_v34, %v2972_v61  ;;  %v7340_v43 = vsub.f32 %v8227_v54, %v2972_v61  ;;  %3208 = vadd.xlane.f32.xlu0 %v3207_v17  ;;  %v7343_v14 = vsub.f32 %v8229_v41, %v2973_v46  ;;  %v7367_v54 = vld [vmem:[%s7911_s2 + $0x70] sm:$0xff]  ;;  %v7374_v41 = vld [vmem:[%s7911_s2 + $0x78] sm:$0xff] }
 0x5e3   :  { %3204 = vadd.xlane.f32.xlu1 %v3203_v62  ;;  %v3214_v27 = vsel %vm2301_vm10, %v3095_v13, 0.0  ;;  %v3096_v63 = vmul.f32 %v7321_v30, %v7321_v30  ;;  %v3218_v61 = vsel %vm2301_vm10, %v3097_v60, 0.0  ;;  %v7362_v60 = vld [vmem:[%s7911_s2 + $0x68] sm:$0xff] }
 0x5e4   :  { %8224 = vst [vmem:[#allocation69_spill] sm:$0xff] %v7334_v36  ;;  %8226 = vst [vmem:[#allocation54_spill] sm:$0xff] %v7337_v16  ;;  %v3215_v51 = vadd.f32 %v3214_v27, %v3094_v12  ;;  %v3098_v45 = vmul.f32 %v7337_v16, %v7337_v16  ;;  %v3099_v34 = vmul.f32 %v7340_v43, %v7340_v43  ;;  %v7379_v27 = vld [vmem:[%s7911_s2 + $0x80] sm:$0xff] }
 0x5e5   :  { %8228 = vst [vmem:[#allocation55_spill] sm:$0xff] %v7340_v43  ;;  %8230 = vst [vmem:[#allocation56_spill] sm:$0xff] %v7343_v14  ;;  %v3101_v17 = vmul.f32 %v7334_v36, %v7334_v36  ;;  %v3219_v32 = vadd.f32 %v3218_v61, %v3096_v63  ;;  %v3100_v46 = vmul.f32 %v7343_v14, %v7343_v14  ;;  %v7391_v63 = vld [vmem:[%s7911_s2 + $0x90] sm:$0xff]  ;;  %v7455_v36 = vld [vmem:[%s7911_s2 + $0xe0] sm:$0xff] }
 0x5e6   :  { %3216 = vadd.xlane.f32.xlu0 %v3215_v51  ;;  %v3222_v62 = vsel %vm2301_vm10, %v3099_v34, 0.0  ;;  %v7398_v51 = vld [vmem:[%s7911_s2 + $0x98] sm:$0xff]  ;;  %v7410_v34 = vld [vmem:[%s7911_s2 + $0xa8] sm:$0xff]  ;;  %v7415_v61 = vld [vmem:[%s7911_s2 + $0xb0] sm:$0xff] }
 0x5e7   :  { %3212 = vadd.xlane.f32.xlu1 %v3211_v56  ;;  %v3223_v52 = vadd.f32 %v3222_v62, %v3098_v45  ;;  %v3226_v12 = vsel %vm2301_vm10, %v3101_v17, 0.0  ;;  %v7386_v56 = vld [vmem:[%s7911_s2 + $0x88] sm:$0xff]  ;;  %v7403_v45 = vld [vmem:[%s7911_s2 + $0xa0] sm:$0xff]  ;;  %v7422_v17 = vld [vmem:[%s7911_s2 + $0xb8] sm:$0xff] }
 0x5e8   :  { %v3227_v13 = vadd.f32 %v3226_v12, %v3100_v46  ;;  %v7427_v62 = vld [vmem:[%s7911_s2 + $0xc0] sm:$0xff]  ;;  %v7441_v46 = vpop.permute.xlu1 %3584  ;;  %v7445_v12 = vpop.permute.xlu0 %3589  ;;  %v7462_v14 = vld [vmem:[%s7911_s2 + $0xe8] sm:$0xff] }
 0x5ea   :  { %3224 = vadd.xlane.f32.xlu0 %v3223_v52  ;;  %v7434_v52 = vld [vmem:[%s7911_s2 + $0xc8] sm:$0xff] }
 0x5eb   :  { %3220 = vadd.xlane.f32.xlu1 %v3219_v32  ;;  %v7439_v32 = vld [vmem:[%s7911_s2 + $0xd0] sm:$0xff] }
 0x5ec   :  { %v7464_v43 = vpop.permute.xlu1 %3594  ;;  %v7466_v16 = vpop.permute.xlu0 %3604 }
 0x5ef   :  { %3228 = vadd.xlane.f32.xlu1 %v3227_v13  ;;  %v7450_v13 = vld [vmem:[%s7911_s2 + $0xd8] sm:$0xff] }
 0x5f0   :  { %v7470_v50 = vpop.permute.xlu1 %3599  ;;  %v7473_v53 = vpop.permute.xlu0 %3614 }
 0x5f4   :  { %v7475_v10 = vpop.permute.xlu1 %3609  ;;  %v7477_v30 = vpop.permute.xlu0 %3624 }
 0x5f5   :  { %8232 = vst [vmem:[#allocation70_spill] sm:$0xff] %v7477_v30  ;;  %v8236_v30 = vld [vmem:[#allocation9_spill] sm:$0xff] }
 0x5f8   :  { %v7479_v58 = vpop.permute.xlu1 %3619  ;;  %v7481_v24 = vpop.permute.xlu0 %3634 }
 0x5f9   :  { %8233 = vst [vmem:[#allocation71_spill] sm:$0xff] %v7479_v58  ;;  %8234 = vst [vmem:[#allocation72_spill] sm:$0xff] %v7481_v24 }
 0x5fc   :  { %v7483_v20 = vpop.permute.xlu1 %3629  ;;  %v7485_v26 = vpop.permute.xlu0 %3644 }
 0x5fd   :  { %8235 = vst [vmem:[#allocation73_spill] sm:$0xff] %v7485_v26 }
 0x600   :  { %3649 = vperm.xlu1 %5105, %v7362_v60   ;;  %3654 = vperm.xlu0 %5106, %v7367_v54   ;;  %v7487_v38 = vpop.permute.xlu1 %3639 }
 0x604   :  { %3659 = vperm.xlu1 %5105, %v7374_v41   ;;  %3664 = vperm.xlu0 %5106, %v7379_v27  }
 0x608   :  { %3669 = vperm.xlu1 %5105, %v7386_v56   ;;  %3674 = vperm.xlu0 %5106, %v7391_v63  }
 0x60c   :  { %3679 = vperm.xlu1 %5105, %v7398_v51   ;;  %3684 = vperm.xlu0 %5106, %v7403_v45  }
 0x610   :  { %3689 = vperm.xlu1 %5105, %v7410_v34   ;;  %3694 = vperm.xlu0 %5106, %v7415_v61  }
 0x614   :  { %3699 = vperm.xlu1 %5105, %v7422_v17   ;;  %3704 = vperm.xlu0 %5106, %v7427_v62  }
 0x618   :  { %3709 = vperm.xlu1 %5105, %v7434_v52   ;;  %3714 = vperm.xlu0 %5106, %v7439_v32  }
 0x61c   :  { %3719 = vperm.xlu1 %5105, %v7450_v13   ;;  %3724 = vperm.xlu0 %5106, %v7455_v36  }
 0x620   :  { %3729 = vperm.xlu1 %5105, %v7462_v14   ;;  %5107 = vset.pattern.permute.xlu0 %v8231_v33 }
 0x624   :  { %5108 = vset.pattern.permute.xlu1 %v8231_v33 }
 0x63b   :  { %v3105_v59 = vpop.xlane.xlu0 %3104 }
 0x63c   :  { %v3230_v31 = vmul.f32 0.0051020407, %v3105_v59 }
 0x63e   :  { %v3262_v19 = vadd.f32 1e-05, %v3230_v31 }
 0x63f   :  { %v3113_v33 = vpop.xlane.xlu0 %3112 }
 0x640   :  { %5111 = vrsqrt.f32 %v3262_v19  ;;  %v3109_v28 = vpop.xlane.xlu1 %3108  ;;  %v3232_v18 = vmul.f32 0.0051020407, %v3113_v33 }
 0x641   :  { %v3231_v40 = vmul.f32 0.0051020407, %v3109_v28 }
 0x642   :  { %v3264_v47 = vadd.f32 1e-05, %v3232_v18 }
 0x643   :  { %v3263_v23 = vadd.f32 1e-05, %v3231_v40  ;;  %v3121_v44 = vpop.xlane.xlu0 %3120 }
 0x644   :  { %5113 = vrsqrt.f32 %v3264_v47  ;;  %v3117_v3 = vpop.xlane.xlu1 %3116  ;;  %v3234_v22 = vmul.f32 0.0051020407, %v3121_v44 }
 0x645   :  { %5115 = vrsqrt.f32 %v3263_v23  ;;  %v3233_v24 = vmul.f32 0.0051020407, %v3117_v3 }
 0x646   :  { %v3266_v25 = vadd.f32 1e-05, %v3234_v22 }
 0x647   :  { %v3265_v1 = vadd.f32 1e-05, %v3233_v24  ;;  %v3129_v26 = vpop.xlane.xlu0 %3128 }
 0x648   :  { %v3125_v15 = vpop.xlane.xlu1 %3124  ;;  %v3236_v33 = vmul.f32 0.0051020407, %v3129_v26 }
 0x649   :  { %5117 = vrsqrt.f32 %v3265_v1  ;;  %v3235_v59 = vmul.f32 0.0051020407, %v3125_v15  ;;  %v8238_v15 = vld [vmem:[#allocation7_spill] sm:$0xff] }
 0x64a   :  { %v5112_v31 = vpop.eup %5111  ;;  %5119 = vrsqrt.f32 %v3266_v25  ;;  %v3268_v3 = vadd.f32 1e-05, %v3236_v33  ;;  %v8239_v33 = vld [vmem:[#allocation6_spill] sm:$0xff] }
 0x64b   :  { %v3326_v19 = vmul.f32 %v5112_v31, %v8236_v30  ;;  %v3137_v48 = vpop.xlane.xlu0 %3136  ;;  %v3267_v40 = vadd.f32 1e-05, %v3235_v59 }
 0x64c   :  { %v3133_v28 = vpop.xlane.xlu1 %3132  ;;  %v3238_v59 = vmul.f32 0.0051020407, %v3137_v48 }
 0x64d   :  { %3360 = vperm.xlu0 %5107, %v3326_v19   ;;  %v3237_v44 = vmul.f32 0.0051020407, %v3133_v28  ;;  %5121 = vrsqrt.f32 %v3267_v40 }
 0x64e   :  { %v5114_v18 = vpop.eup %5113  ;;  %5123 = vrsqrt.f32 %v3268_v3  ;;  %v3270_v40 = vadd.f32 1e-05, %v3238_v59 }
 0x64f   :  { %v5116_v47 = vpop.eup %5115  ;;  %v3145_v23 = vpop.xlane.xlu0 %3144  ;;  %v3328_v1 = vmul.f32 %v5114_v18, %v8238_v15  ;;  %v3269_v25 = vadd.f32 1e-05, %v3237_v44 }
 0x650   :  { %v3141_v24 = vpop.xlane.xlu1 %3140  ;;  %v3327_v11 = vmul.f32 %v5116_v47, %v8237_v2 }
 0x651   :  { %v3239_v22 = vmul.f32 0.0051020407, %v3141_v24  ;;  %v8240_v24 = vld [vmem:[#allocation13_spill] sm:$0xff] }
 0x652   :  { %3365 = vperm.xlu1 %5108, %v3327_v11   ;;  %v3240_v11 = vmul.f32 0.0051020407, %v3145_v23 }
 0x653   :  { %v5118_v30 = vpop.eup %5117  ;;  %v3271_v31 = vadd.f32 1e-05, %v3239_v22  ;;  %v3153_v26 = vpop.xlane.xlu0 %3152 }
 0x654   :  { %v3149_v19 = vpop.xlane.xlu1 %3148  ;;  %v3329_v28 = vmul.f32 %v5118_v30, %v8239_v33  ;;  %v5120_v58 = vpop.eup %5119  ;;  %v3272_v15 = vadd.f32 1e-05, %v3240_v11 }
 0x655   :  { %5125 = vrsqrt.f32 %v3271_v31  ;;  %v3241_v37 = vmul.f32 0.0051020407, %v3149_v19  ;;  %v3330_v3 = vmul.f32 %v5120_v58, %v8240_v24 }
 0x656   :  { %3370 = vperm.xlu1 %5108, %v3328_v1   ;;  %5127 = vrsqrt.f32 %v3269_v25  ;;  %v3242_v1 = vmul.f32 0.0051020407, %v3153_v26  ;;  %v8241_v25 = vld [vmem:[#allocation11_spill] sm:$0xff]  ;;  %v8243_v26 = vld [vmem:[#allocation12_spill] sm:$0xff] }
 0x657   :  { %v3273_v49 = vadd.f32 1e-05, %v3241_v37  ;;  %v3161_v2 = vpop.xlane.xlu0 %3160  ;;  %v5122_v44 = vpop.eup %5121 }
 0x658   :  { %v3157_v47 = vpop.xlane.xlu1 %3156  ;;  %v5124_v37 = vpop.eup %5123  ;;  %v3331_v59 = vmul.f32 %v5122_v44, %v8241_v25  ;;  %v3274_v33 = vadd.f32 1e-05, %v3242_v1 }
 0x659   :  { %5129 = vrsqrt.f32 %v3273_v49  ;;  %v3243_v18 = vmul.f32 0.0051020407, %v3157_v47  ;;  %v8242_v47 = vld [vmem:[#allocation15_spill] sm:$0xff]  ;;  %v3332_v24 = vmul.f32 %v5124_v37, %v8243_v26  ;;  %v8246_v26 = vld [vmem:[#allocation17_spill] sm:$0xff] }
 0x65a   :  { %3375 = vperm.xlu1 %5108, %v3329_v28   ;;  %5131 = vrsqrt.f32 %v3270_v40  ;;  %v3244_v28 = vmul.f32 0.0051020407, %v3161_v2 }
 0x65b   :  { %v3275_v48 = vadd.f32 1e-05, %v3243_v18  ;;  %v3169_v22 = vpop.xlane.xlu0 %3168 }
 0x65c   :  { %v3165_v31 = vpop.xlane.xlu1 %3164  ;;  %v3276_v44 = vadd.f32 1e-05, %v3244_v28 }
 0x65d   :  { %5133 = vrsqrt.f32 %v3275_v48  ;;  %v3245_v30 = vmul.f32 0.0051020407, %v3165_v31 }
 0x65e   :  { %3380 = vperm.xlu1 %5108, %v3330_v3   ;;  %5135 = vrsqrt.f32 %v3272_v15  ;;  %v8244_v15 = vld [vmem:[#allocation14_spill] sm:$0xff] }
 0x65f   :  { %v5126_v23 = vpop.eup %5125  ;;  %v3277_v19 = vadd.f32 1e-05, %v3245_v30  ;;  %v3177_v49 = vpop.xlane.xlu0 %3176  ;;  %v3246_v30 = vmul.f32 0.0051020407, %v3169_v22 }
 0x660   :  { %v3173_v58 = vpop.xlane.xlu1 %3172  ;;  %v3335_v18 = vmul.f32 %v5126_v23, %v8242_v47  ;;  %v5128_v11 = vpop.eup %5127  ;;  %v8245_v23 = vld [vmem:[#allocation10_spill] sm:$0xff]  ;;  %v3248_v47 = vmul.f32 0.0051020407, %v3177_v49 }
 0x661   :  { %5137 = vrsqrt.f32 %v3277_v19  ;;  %v3247_v40 = vmul.f32 0.0051020407, %v3173_v58  ;;  %v3333_v19 = vmul.f32 %v5128_v11, %v8245_v23  ;;  %v3278_v37 = vadd.f32 1e-05, %v3246_v30 }
 0x662   :  { %3385 = vperm.xlu1 %5108, %v3331_v59   ;;  %3405 = vperm.xlu0 %5107, %v3335_v18   ;;  %5139 = vrsqrt.f32 %v3274_v33  ;;  %v3280_v11 = vadd.f32 1e-05, %v3248_v47 }
 0x663   :  { %v5130_v48 = vpop.eup %5129  ;;  %v3279_v3 = vadd.f32 1e-05, %v3247_v40  ;;  %v3185_v31 = vpop.xlane.xlu0 %3184 }
 0x664   :  { %v3181_v25 = vpop.xlane.xlu1 %3180  ;;  %v3337_v1 = vmul.f32 %v5130_v48, %v8244_v15  ;;  %v5132_v8 = vpop.eup %5131 }
 0x665   :  { %5141 = vrsqrt.f32 %v3279_v3  ;;  %v3249_v2 = vmul.f32 0.0051020407, %v3181_v25  ;;  %v3334_v48 = vmul.f32 %v5132_v8, %v8246_v26  ;;  %v3250_v25 = vmul.f32 0.0051020407, %v3185_v31 }
 0x666   :  { %3390 = vperm.xlu1 %5108, %v3332_v24   ;;  %3415 = vperm.xlu0 %5107, %v3337_v1   ;;  %5143 = vrsqrt.f32 %v3276_v44  ;;  %v8247_v1 = vld [vmem:[#allocation16_spill] sm:$0xff] }
 0x667   :  { %v5134_v59 = vpop.eup %5133  ;;  %v3281_v58 = vadd.f32 1e-05, %v3249_v2  ;;  %v3193_v28 = vpop.xlane.xlu0 %3192  ;;  %v3282_v8 = vadd.f32 1e-05, %v3250_v25 }
 0x668   :  { %v3189_v18 = vpop.xlane.xlu1 %3188  ;;  %v3339_v33 = vmul.f32 %v5134_v59, %v7362_v60  ;;  %v5136_v40 = vpop.eup %5135  ;;  %v3252_v59 = vmul.f32 0.0051020407, %v3193_v28 }
 0x669   :  { %5145 = vrsqrt.f32 %v3281_v58  ;;  %v3251_v22 = vmul.f32 0.0051020407, %v3189_v18  ;;  %v3336_v2 = vmul.f32 %v5136_v40, %v8247_v1 }
 0x66a   :  { %3395 = vperm.xlu1 %5108, %v3333_v19   ;;  %3425 = vperm.xlu0 %5107, %v3339_v33   ;;  %5147 = vrsqrt.f32 %v3278_v37  ;;  %v3284_v26 = vadd.f32 1e-05, %v3252_v59 }
 0x66b   :  { %v5138_v24 = vpop.eup %5137  ;;  %v3283_v3 = vadd.f32 1e-05, %v3251_v22  ;;  %v3201_v60 = vpop.xlane.xlu0 %3200 }
 0x66c   :  { %v3197_v15 = vpop.xlane.xlu1 %3196  ;;  %v3341_v44 = vmul.f32 %v5138_v24, %v7374_v41  ;;  %v5140_v30 = vpop.eup %5139  ;;  %v8248_v41 = vld [vmem:[#allocation21_spill] sm:$0xff]  ;;  %v3254_v40 = vmul.f32 0.0051020407, %v3201_v60 }
 0x66d   :  { %5149 = vrsqrt.f32 %v3283_v3  ;;  %v3253_v49 = vmul.f32 0.0051020407, %v3197_v15  ;;  %v3338_v18 = vmul.f32 %v5140_v30, %v8248_v41 }
 0x66e   :  { %3400 = vperm.xlu1 %5108, %v3334_v48   ;;  %3435 = vperm.xlu0 %5107, %v3341_v44   ;;  %5151 = vrsqrt.f32 %v3280_v11  ;;  %v3286_v44 = vadd.f32 1e-05, %v3254_v40 }
 0x66f   :  { %v5142_v23 = vpop.eup %5141  ;;  %v3285_v19 = vadd.f32 1e-05, %v3253_v49  ;;  %v3209_v48 = vpop.xlane.xlu0 %3208 }
 0x670   :  { %v3205_v58 = vpop.xlane.xlu1 %3204  ;;  %v3343_v37 = vmul.f32 %v5142_v23, %v7386_v56  ;;  %v5144_v47 = vpop.eup %5143  ;;  %v3256_v49 = vmul.f32 0.0051020407, %v3209_v48 }
 0x671   :  { %5153 = vrsqrt.f32 %v3285_v19  ;;  %v3255_v31 = vmul.f32 0.0051020407, %v3205_v58  ;;  %v3340_v56 = vmul.f32 %v5144_v47, %v7367_v54 }
 0x672   :  { %3410 = vperm.xlu1 %5108, %v3336_v2   ;;  %3445 = vperm.xlu0 %5107, %v3343_v37   ;;  %5155 = vrsqrt.f32 %v3282_v8  ;;  %v3288_v54 = vadd.f32 1e-05, %v3256_v49  ;;  %v2812_v49 = vld [vmem:[%s7911_s2 + $0xf0] sm:$0xff] }
 0x673   :  { %v5146_v33 = vpop.eup %5145  ;;  %v3287_v22 = vadd.f32 1e-05, %v3255_v31  ;;  %v3217_v23 = vpop.xlane.xlu0 %3216 }
 0x674   :  { %v3213_v24 = vpop.xlane.xlu1 %3212  ;;  %v3345_v3 = vmul.f32 %v5146_v33, %v7398_v51  ;;  %v5148_v11 = vpop.eup %5147  ;;  %v3258_v37 = vmul.f32 0.0051020407, %v3217_v23 }
 0x675   :  { %5157 = vrsqrt.f32 %v3287_v22  ;;  %v3257_v28 = vmul.f32 0.0051020407, %v3213_v24  ;;  %v3342_v51 = vmul.f32 %v5148_v11, %v7379_v27 }
 0x676   :  { %3420 = vperm.xlu1 %5108, %v3338_v18   ;;  %3455 = vperm.xlu0 %5107, %v3345_v3   ;;  %5159 = vrsqrt.f32 %v3284_v26  ;;  %v3290_v22 = vadd.f32 1e-05, %v3258_v37 }
 0x677   :  { %v5150_v25 = vpop.eup %5149  ;;  %v3289_v15 = vadd.f32 1e-05, %v3257_v28  ;;  %v3225_v33 = vpop.xlane.xlu0 %3224 }
 0x678   :  { %v3221_v30 = vpop.xlane.xlu1 %3220  ;;  %v3347_v1 = vmul.f32 %v5150_v25, %v7410_v34  ;;  %v5152_v2 = vpop.eup %5151  ;;  %v3260_v26 = vmul.f32 0.0051020407, %v3225_v33 }
 0x679   :  { %5161 = vrsqrt.f32 %v3289_v15  ;;  %v3259_v60 = vmul.f32 0.0051020407, %v3221_v30  ;;  %v3344_v34 = vmul.f32 %v5152_v2, %v7391_v63  ;;  %v8249_v30 = vmov 1  }
 0x67a   :  { %3430 = vperm.xlu1 %5108, %v3340_v56   ;;  %3465 = vperm.xlu0 %5107, %v3347_v1   ;;  %5163 = vrsqrt.f32 %v3286_v44  ;;  %v3292_v3 = vadd.f32 1e-05, %v3260_v26  ;;  %v2813_v56 = vld [vmem:[%s7911_s2 + $0xf8] sm:$0xff] }
 0x67b   :  { %v5154_v19 = vpop.eup %5153  ;;  %v3291_v8 = vadd.f32 1e-05, %v3259_v60  ;;  %v8251_v26 = vld [vmem:[#allocation25_spill] sm:$0xff] }
 0x67c   :  { %v3229_v59 = vpop.xlane.xlu1 %3228  ;;  %v3349_v58 = vmul.f32 %v5154_v19, %v7422_v17  ;;  %v5156_v47 = vpop.eup %5155 }
 0x67d   :  { %5165 = vrsqrt.f32 %v3291_v8  ;;  %v3261_v31 = vmul.f32 0.0051020407, %v3229_v59  ;;  %v3346_v17 = vmul.f32 %v5156_v47, %v7403_v45 }
 0x67e   :  { %3440 = vperm.xlu1 %5108, %v3342_v51   ;;  %3475 = vperm.xlu0 %5107, %v3349_v58   ;;  %5167 = vrsqrt.f32 %v3288_v54 }
 0x67f   :  { %v5158_v41 = vpop.eup %5157  ;;  %v3293_v18 = vadd.f32 1e-05, %v3261_v31  ;;  %v7528_v2 = vpop.permute.xlu0 %3654 }
 0x680   :  { %v3351_v27 = vmul.f32 %v5158_v41, %v7434_v52  ;;  %v5160_v40 = vpop.eup %5159  ;;  %v7526_v60 = vpop.permute.xlu1 %3649 }
 0x681   :  { %5169 = vrsqrt.f32 %v3293_v18  ;;  %v3348_v28 = vmul.f32 %v5160_v40, %v7415_v61 }
 0x682   :  { %3450 = vperm.xlu1 %5108, %v3344_v34   ;;  %3485 = vperm.xlu0 %5107, %v3351_v27   ;;  %5171 = vrsqrt.f32 %v3290_v22  ;;  %v8250_v27 = vld [vmem:[#allocation18_spill] sm:$0xff] }
 0x683   :  { %v5162_v48 = vpop.eup %5161  ;;  %5173 = vrsqrt.f32 %v3292_v3 }
 0x684   :  { %v3353_v24 = vmul.f32 %v5162_v48, %v7450_v13  ;;  %v5164_v63 = vpop.eup %5163 }
 0x685   :  { %v3350_v45 = vmul.f32 %v5164_v63, %v7427_v62  ;;  %v8252_v63 = vld [vmem:[#allocation24_spill] sm:$0xff] }
 0x686   :  { %3460 = vperm.xlu1 %5108, %v3346_v17   ;;  %3495 = vperm.xlu0 %5107, %v3353_v24  }
 0x687   :  { %v5166_v11 = vpop.eup %5165 }
 0x688   :  { %v3355_v52 = vmul.f32 %v5166_v11, %v7462_v14  ;;  %v5168_v25 = vpop.eup %5167 }
 0x689   :  { %v3352_v44 = vmul.f32 %v5168_v25, %v7439_v32  ;;  %v7531_v32 = vpop.permute.xlu1 %3659 }
 0x68a   :  { %3470 = vperm.xlu1 %5108, %v3348_v28   ;;  %3505 = vperm.xlu0 %5107, %v3355_v52  }
 0x68b   :  { %v5170_v13 = vpop.eup %5169 }
 0x68c   :  { %v3357_v15 = vmul.f32 %v5170_v13, %v2813_v56  ;;  %v5172_v61 = vpop.eup %5171 }
 0x68d   :  { %v3354_v14 = vmul.f32 %v5172_v61, %v7455_v36  ;;  %v5174_v1 = vpop.eup %5173  ;;  %v7533_v36 = vpop.permute.xlu0 %3664  ;;  %v8255_v61 = vld [vmem:[#allocation23_spill] sm:$0xff] }
 0x68e   :  { %3480 = vperm.xlu1 %5108, %v3350_v45   ;;  %3515 = vperm.xlu0 %5107, %v3357_v15   ;;  %v3356_v62 = vmul.f32 %v5174_v1, %v2812_v49  ;;  %v7535_v23 = vpop.permute.xlu1 %3669  ;;  %v8254_v45 = vld [vmem:[#allocation20_spill] sm:$0xff] }
 0x691   :  { %v7537_v51 = vpop.permute.xlu0 %3674 }
 0x692   :  { %3490 = vperm.xlu1 %5108, %v3352_v44   ;;  %5109 = vset.pattern.permute.xlu0 %v8249_v30  ;;  %v7539_v19 = vpop.permute.xlu1 %3679 }
 0x693   :  { %3734 = vperm.xlu0 %5109, %v2812_v49  }
 0x695   :  { %v7541_v8 = vpop.permute.xlu0 %3684 }
 0x696   :  { %3500 = vperm.xlu1 %5108, %v3354_v14   ;;  %v7543_v54 = vpop.permute.xlu1 %3689 }
 0x699   :  { %v7545_v59 = vpop.permute.xlu0 %3694 }
 0x69a   :  { %3510 = vperm.xlu1 %5108, %v3356_v62   ;;  %v7547_v58 = vpop.permute.xlu1 %3699 }
 0x69d   :  { %v7549_v37 = vpop.permute.xlu0 %3704 }
 0x69e   :  { %5110 = vset.pattern.permute.xlu1 %v8249_v30  ;;  %v7551_v31 = vpop.permute.xlu1 %3709 }
 0x69f   :  { %3739 = vperm.xlu1 %5110, %v2813_v56  }
 0x6a1   :  { %v7553_v47 = vpop.permute.xlu0 %3714 }
 0x6a2   :  { %v7555_v34 = vpop.permute.xlu1 %3719 }
 0x6a5   :  { %v7557_v41 = vpop.permute.xlu0 %3724 }
 0x6a6   :  { %v7559_v33 = vpop.permute.xlu1 %3729 }
 0x6cc   :  { %v3361_v18 = vpop.permute.xlu0 %3360 }
 0x6cd   :  { %v3518_v22 = vmul.f32 %v3361_v18, %v8250_v27  ;;  %v3519_v40 = vmul.f32 %v3361_v18, %v8251_v26 }
 0x6cf   :  { %v3742_v17 = vadd.f32 %v7441_v46, %v3518_v22  ;;  %v3743_v48 = vadd.f32 %v7441_v46, %v3519_v40  ;;  %v8253_v46 = vld [vmem:[#allocation19_spill] sm:$0xff] }
 0x6d1   :  { %3806 = vst [vmem:[%s7915_s6] sm:$0xff] %v3742_v17  ;;  %3807 = vst.msk [vmem:[%s7915_s6 + $0x8] sm:$0xff] %vm2301_vm10, %v3743_v48  ;;  %v3366_v24 = vpop.permute.xlu1 %3365 }
 0x6d2   :  { %v3520_v3 = vmul.f32 %v3366_v24, %v7029_v0  ;;  %v3521_v28 = vmul.f32 %v3366_v24, %v8252_v63 }
 0x6d4   :  { %v3744_v11 = vadd.f32 %v7445_v12, %v3520_v3  ;;  %v3745_v52 = vadd.f32 %v7445_v12, %v3521_v28 }
 0x6d5   :  { %v3371_v56 = vpop.permute.xlu1 %3370 }
 0x6d6   :  { %3808 = vst [vmem:[%s7915_s6 + $0x10] sm:$0xff] %v3744_v11  ;;  %3809 = vst.msk [vmem:[%s7915_s6 + $0x18] sm:$0xff] %vm2301_vm10, %v3745_v52  ;;  %v3522_v25 = vmul.f32 %v3371_v56, %v8253_v46  ;;  %v3523_v0 = vmul.f32 %v3371_v56, %v8254_v45  ;;  %v8259_v46 = vld [vmem:[#allocation71_spill] sm:$0xff] }
 0x6d8   :  { %v3746_v13 = vadd.f32 %v7464_v43, %v3522_v25  ;;  %v3747_v15 = vadd.f32 %v7464_v43, %v3523_v0 }
 0x6d9   :  { %v3376_v44 = vpop.permute.xlu1 %3375 }
 0x6da   :  { %3810 = vst [vmem:[%s7915_s6 + $0x20] sm:$0xff] %v3746_v13  ;;  %3811 = vst.msk [vmem:[%s7915_s6 + $0x28] sm:$0xff] %vm2301_vm10, %v3747_v15  ;;  %v3524_v12 = vmul.f32 %v3376_v44, %v7037_v55  ;;  %v3525_v14 = vmul.f32 %v3376_v44, %v8255_v61 }
 0x6dc   :  { %v3748_v49 = vadd.f32 %v7470_v50, %v3524_v12  ;;  %v3749_v30 = vadd.f32 %v7470_v50, %v3525_v14  ;;  %v8261_v12 = vld [vmem:[#allocation27_spill] sm:$0xff]  ;;  %v8262_v14 = vld [vmem:[#allocation34_spill] sm:$0xff] }
 0x6dd   :  { %v3381_v1 = vpop.permute.xlu1 %3380 }
 0x6de   :  { %3812 = vst [vmem:[%s7915_s6 + $0x30] sm:$0xff] %v3748_v49  ;;  %3813 = vst.msk [vmem:[%s7915_s6 + $0x38] sm:$0xff] %vm2301_vm10, %v3749_v30  ;;  %v3526_v43 = vmul.f32 %v3381_v1, %v7051_v29  ;;  %v3527_v55 = vmul.f32 %v3381_v1, %v7054_v4  ;;  %v8263_v30 = vld [vmem:[#allocation37_spill] sm:$0xff] }
 0x6e0   :  { %v3750_v62 = vadd.f32 %v7466_v16, %v3526_v43  ;;  %v3751_v18 = vadd.f32 %v7466_v16, %v3527_v55  ;;  %v8264_v43 = vld [vmem:[#allocation70_spill] sm:$0xff] }
 0x6e1   :  { %v3386_v27 = vpop.permute.xlu1 %3385  ;;  %v3406_v50 = vpop.permute.xlu0 %3405 }
 0x6e2   :  { %3814 = vst [vmem:[%s7915_s6 + $0x40] sm:$0xff] %v3750_v62  ;;  %3815 = vst.msk [vmem:[%s7915_s6 + $0x48] sm:$0xff] %vm2301_vm10, %v3751_v18  ;;  %v3528_v22 = vmul.f32 %v3386_v27, %v7057_v57  ;;  %v3529_v29 = vmul.f32 %v3386_v27, %v7048_v6  ;;  %v3536_v4 = vmul.f32 %v3406_v50, %v7103_v9 }
 0x6e3   :  { %v3537_v26 = vmul.f32 %v3406_v50, %v7092_v21 }
 0x6e4   :  { %v3752_v16 = vadd.f32 %v7475_v10, %v3528_v22  ;;  %v3753_v40 = vadd.f32 %v7475_v10, %v3529_v29  ;;  %v3760_v17 = vadd.f32 %v7483_v20, %v3536_v4  ;;  %v8266_v4 = vld [vmem:[#allocation26_spill] sm:$0xff] }
 0x6e5   :  { %v3761_v48 = vadd.f32 %v7483_v20, %v3537_v26  ;;  %v3391_v24 = vpop.permute.xlu1 %3390  ;;  %v3416_v3 = vpop.permute.xlu0 %3415 }
 0x6e6   :  { %3816 = vst [vmem:[%s7915_s6 + $0x50] sm:$0xff] %v3752_v16  ;;  %3817 = vst.msk [vmem:[%s7915_s6 + $0x58] sm:$0xff] %vm2301_vm10, %v3753_v40  ;;  %v3530_v6 = vmul.f32 %v3391_v24, %v7076_v39  ;;  %v3531_v57 = vmul.f32 %v3391_v24, %v7079_v7  ;;  %v3540_v21 = vmul.f32 %v3416_v3, %v7123_v42  ;;  %v8256_v7 = vld [vmem:[#allocation22_spill] sm:$0xff]  ;;  %v8257_v42 = vld [vmem:[#allocation33_spill] sm:$0xff] }
 0x6e7   :  { %3824 = vst [vmem:[%s7915_s6 + $0x90] sm:$0xff] %v3760_v17  ;;  %3825 = vst.msk [vmem:[%s7915_s6 + $0x98] sm:$0xff] %vm2301_vm10, %v3761_v48  ;;  %v3541_v9 = vmul.f32 %v3416_v3, %v7114_v5  ;;  %v8267_v16 = vld [vmem:[#allocation51_spill] sm:$0xff]  ;;  %v8268_v17 = vld [vmem:[#allocation41_spill] sm:$0xff] }
 0x6e8   :  { %v3754_v20 = vadd.f32 %v7473_v53, %v3530_v6  ;;  %v3755_v10 = vadd.f32 %v7473_v53, %v3531_v57  ;;  %v3764_v63 = vadd.f32 %v7487_v38, %v3540_v21  ;;  %v8258_v53 = vld [vmem:[#allocation31_spill] sm:$0xff]  ;;  %v8269_v24 = vld [vmem:[#allocation72_spill] sm:$0xff] }
 0x6e9   :  { %v3765_v28 = vadd.f32 %v7487_v38, %v3541_v9  ;;  %v3396_v11 = vpop.permute.xlu1 %3395  ;;  %v3426_v52 = vpop.permute.xlu0 %3425 }
 0x6ea   :  { %3818 = vst [vmem:[%s7915_s6 + $0x60] sm:$0xff] %v3754_v20  ;;  %3819 = vst.msk [vmem:[%s7915_s6 + $0x68] sm:$0xff] %vm2301_vm10, %v3755_v10  ;;  %v3532_v39 = vmul.f32 %v3396_v11, %v7070_v35  ;;  %v3533_v5 = vmul.f32 %v3396_v11, %v8256_v7  ;;  %v3544_v38 = vmul.f32 %v3426_v52, %v8257_v42  ;;  %v8260_v35 = vld [vmem:[#allocation29_spill] sm:$0xff]  ;;  %v8272_v11 = vld [vmem:[#allocation52_spill] sm:$0xff] }
 0x6eb   :  { %3828 = vst [vmem:[%s7915_s6 + $0xb0] sm:$0xff] %v3764_v63  ;;  %3829 = vst.msk [vmem:[%s7915_s6 + $0xb8] sm:$0xff] %vm2301_vm10, %v3765_v28  ;;  %v3545_v56 = vmul.f32 %v3426_v52, %v8258_v53  ;;  %v8271_v63 = vld [vmem:[#allocation30_spill] sm:$0xff] }
 0x6ec   :  { %v3756_v25 = vadd.f32 %v8259_v46, %v3532_v39  ;;  %v3757_v45 = vadd.f32 %v8259_v46, %v3533_v5  ;;  %v3768_v0 = vadd.f32 %v7526_v60, %v3544_v38  ;;  %v8273_v39 = vld [vmem:[#allocation50_spill] sm:$0xff]  ;;  %v8274_v5 = vld [vmem:[#allocation73_spill] sm:$0xff] }
 0x6ed   :  { %v3769_v13 = vadd.f32 %v7526_v60, %v3545_v56  ;;  %v3401_v15 = vpop.permute.xlu1 %3400  ;;  %v3436_v44 = vpop.permute.xlu0 %3435 }
 0x6ee   :  { %3820 = vst [vmem:[%s7915_s6 + $0x70] sm:$0xff] %v3756_v25  ;;  %3821 = vst.msk [vmem:[%s7915_s6 + $0x78] sm:$0xff] %vm2301_vm10, %v3757_v45  ;;  %v3534_v60 = vmul.f32 %v3401_v15, %v8260_v35  ;;  %v3535_v61 = vmul.f32 %v3401_v15, %v8261_v12  ;;  %v3548_v49 = vmul.f32 %v3436_v44, %v8262_v14  ;;  %v8277_v15 = vld [vmem:[#allocation62_spill] sm:$0xff]  ;;  %v8278_v35 = vld [vmem:[#allocation59_spill] sm:$0xff] }
 0x6ef   :  { %3832 = vst [vmem:[%s7915_s6 + $0xd0] sm:$0xff] %v3768_v0  ;;  %3833 = vst.msk [vmem:[%s7915_s6 + $0xd8] sm:$0xff] %vm2301_vm10, %v3769_v13  ;;  %v3549_v1 = vmul.f32 %v3436_v44, %v8263_v30  ;;  %v8276_v0 = vld [vmem:[#allocation36_spill] sm:$0xff] }
 0x6f0   :  { %v3758_v55 = vadd.f32 %v8264_v43, %v3534_v60  ;;  %v3759_v62 = vadd.f32 %v8264_v43, %v3535_v61  ;;  %v3772_v18 = vadd.f32 %v7531_v32, %v3548_v49  ;;  %v8280_v43 = vld [vmem:[#allocation46_spill] sm:$0xff] }
 0x6f1   :  { %v3773_v27 = vadd.f32 %v7531_v32, %v3549_v1  ;;  %v3411_v50 = vpop.permute.xlu1 %3410  ;;  %v3446_v22 = vpop.permute.xlu0 %3445  ;;  %v8265_v32 = vld [vmem:[#allocation28_spill] sm:$0xff] }
 0x6f2   :  { %3822 = vst [vmem:[%s7915_s6 + $0x80] sm:$0xff] %v3758_v55  ;;  %3823 = vst.msk [vmem:[%s7915_s6 + $0x88] sm:$0xff] %vm2301_vm10, %v3759_v62  ;;  %v3538_v29 = vmul.f32 %v3411_v50, %v8265_v32  ;;  %v3539_v26 = vmul.f32 %v3411_v50, %v8266_v4  ;;  %v3552_v40 = vmul.f32 %v3446_v22, %v8267_v16  ;;  %v8281_v62 = vld [vmem:[#allocation40_spill] sm:$0xff] }
 0x6f3   :  { %3836 = vst [vmem:[%s7915_s6 + $0xf0] sm:$0xff] %v3772_v18  ;;  %3837 = vst.msk [vmem:[%s7915_s6 + $0xf8] sm:$0xff] %vm2301_vm10, %v3773_v27  ;;  %v3553_v48 = vmul.f32 %v3446_v22, %v8268_v17  ;;  %v8282_v27 = vld [vmem:[#allocation63_spill] sm:$0xff] }
 0x6f4   :  { %v3762_v3 = vadd.f32 %v8269_v24, %v3538_v29  ;;  %v3763_v6 = vadd.f32 %v8269_v24, %v3539_v26  ;;  %v3776_v57 = vadd.f32 %v7535_v23, %v3552_v40  ;;  %v8284_v40 = vld [vmem:[#allocation58_spill] sm:$0xff] }
 0x6f5   :  { %v3777_v21 = vadd.f32 %v7535_v23, %v3553_v48  ;;  %v3421_v9 = vpop.permute.xlu1 %3420  ;;  %v3456_v20 = vpop.permute.xlu0 %3455  ;;  %v8270_v23 = vld [vmem:[#allocation32_spill] sm:$0xff] }
 0x6f6   :  { %3826 = vst [vmem:[%s7915_s6 + $0xa0] sm:$0xff] %v3762_v3  ;;  %3827 = vst.msk [vmem:[%s7915_s6 + $0xa8] sm:$0xff] %vm2301_vm10, %v3763_v6  ;;  %v3542_v10 = vmul.f32 %v3421_v9, %v8270_v23  ;;  %v3543_v28 = vmul.f32 %v3421_v9, %v8271_v63  ;;  %v3556_v52 = vmul.f32 %v3456_v20, %v8272_v11  ;;  %v8285_v48 = vld [vmem:[#allocation44_spill] sm:$0xff]  ;;  %v8286_v3 = vld [vmem:[#allocation45_spill] sm:$0xff] }
 0x6f7   :  { %3840 = vst [vmem:[%s7915_s6 + $0x110] sm:$0xff] %v3776_v57  ;;  %3841 = vst.msk [vmem:[%s7915_s6 + $0x118] sm:$0xff] %vm2301_vm10, %v3777_v21  ;;  %v3557_v7 = vmul.f32 %v3456_v20, %v8273_v39  ;;  %v8288_v63 = vld [vmem:[#allocation61_spill] sm:$0xff]  ;;  %v8289_v11 = vld [vmem:[#allocation48_spill] sm:$0xff] }
 0x6f8   :  { %v3766_v42 = vadd.f32 %v8274_v5, %v3542_v10  ;;  %v3767_v38 = vadd.f32 %v8274_v5, %v3543_v28  ;;  %v3780_v53 = vadd.f32 %v7539_v19, %v3556_v52  ;;  %v8290_v39 = vld [vmem:[#allocation49_spill] sm:$0xff] }
 0x6f9   :  { %v3781_v56 = vadd.f32 %v7539_v19, %v3557_v7  ;;  %v3431_v46 = vpop.permute.xlu1 %3430  ;;  %v3466_v25 = vpop.permute.xlu0 %3465  ;;  %v8275_v19 = vld [vmem:[#allocation35_spill] sm:$0xff] }
 0x6fa   :  { %3830 = vst [vmem:[%s7915_s6 + $0xc0] sm:$0xff] %v3766_v42  ;;  %3831 = vst.msk [vmem:[%s7915_s6 + $0xc8] sm:$0xff] %vm2301_vm10, %v3767_v38  ;;  %v3546_v45 = vmul.f32 %v3431_v46, %v8275_v19  ;;  %v3547_v13 = vmul.f32 %v3431_v46, %v8276_v0  ;;  %v3560_v44 = vmul.f32 %v3466_v25, %v8277_v15 }
 0x6fb   :  { %3844 = vst [vmem:[%s7915_s6 + $0x130] sm:$0xff] %v3780_v53  ;;  %3845 = vst.msk [vmem:[%s7915_s6 + $0x138] sm:$0xff] %vm2301_vm10, %v3781_v56  ;;  %v3561_v60 = vmul.f32 %v3466_v25, %v8278_v35  ;;  %v8292_v25 = vld [vmem:[#allocation39_spill] sm:$0xff] }
 0x6fc   :  { %v3770_v12 = vadd.f32 %v7528_v2, %v3546_v45  ;;  %v3771_v61 = vadd.f32 %v7528_v2, %v3547_v13  ;;  %v3784_v14 = vadd.f32 %v7543_v54, %v3560_v44  ;;  %v8279_v2 = vld [vmem:[#allocation38_spill] sm:$0xff]  ;;  %v8293_v45 = vld [vmem:[#allocation68_spill] sm:$0xff]  ;;  %v8294_v13 = vld [vmem:[#allocation53_spill] sm:$0xff] }
 0x6fd   :  { %v3785_v49 = vadd.f32 %v7543_v54, %v3561_v60  ;;  %v3441_v30 = vpop.permute.xlu1 %3440  ;;  %v3476_v1 = vpop.permute.xlu0 %3475 }
 0x6fe   :  { %3834 = vst [vmem:[%s7915_s6 + $0xe0] sm:$0xff] %v3770_v12  ;;  %3835 = vst.msk [vmem:[%s7915_s6 + $0xe8] sm:$0xff] %vm2301_vm10, %v3771_v61  ;;  %v3550_v54 = vmul.f32 %v3441_v30, %v8279_v2  ;;  %v3551_v55 = vmul.f32 %v3441_v30, %v8280_v43  ;;  %v3564_v18 = vmul.f32 %v3476_v1, %v8281_v62 }
 0x6ff   :  { %3848 = vst [vmem:[%s7915_s6 + $0x150] sm:$0xff] %v3784_v14  ;;  %3849 = vst.msk [vmem:[%s7915_s6 + $0x158] sm:$0xff] %vm2301_vm10, %v3785_v49  ;;  %v3565_v50 = vmul.f32 %v3476_v1, %v8282_v27  ;;  %v8296_v14 = vld [vmem:[#allocation43_spill] sm:$0xff] }
 0x700   :  { %v3774_v22 = vadd.f32 %v7533_v36, %v3550_v54  ;;  %v3775_v32 = vadd.f32 %v7533_v36, %v3551_v55  ;;  %v3788_v29 = vadd.f32 %v7547_v58, %v3564_v18  ;;  %v8283_v36 = vld [vmem:[#allocation57_spill] sm:$0xff]  ;;  %v8298_v55 = vld [vmem:[#allocation47_spill] sm:$0xff] }
 0x701   :  { %v3789_v4 = vadd.f32 %v7547_v58, %v3565_v50  ;;  %v3451_v26 = vpop.permute.xlu1 %3450  ;;  %v3486_v16 = vpop.permute.xlu0 %3485  ;;  %v8297_v54 = vld [vmem:[#allocation65_spill] sm:$0xff] }
 0x702   :  { %3838 = vst [vmem:[%s7915_s6 + $0x100] sm:$0xff] %v3774_v22  ;;  %3839 = vst.msk [vmem:[%s7915_s6 + $0x108] sm:$0xff] %vm2301_vm10, %v3775_v32  ;;  %v3554_v58 = vmul.f32 %v3451_v26, %v8283_v36  ;;  %v3555_v17 = vmul.f32 %v3451_v26, %v8284_v40  ;;  %v3568_v24 = vmul.f32 %v3486_v16, %v8285_v48  ;;  %v8299_v22 = vld [vmem:[#allocation66_spill] sm:$0xff] }
 0x703   :  { %3852 = vst [vmem:[%s7915_s6 + $0x170] sm:$0xff] %v3788_v29  ;;  %3853 = vst.msk [vmem:[%s7915_s6 + $0x178] sm:$0xff] %vm2301_vm10, %v3789_v4  ;;  %v3569_v6 = vmul.f32 %v3486_v16, %v8286_v3  ;;  %v8300_v29 = vld [vmem:[#allocation67_spill] sm:$0xff] }
 0x704   :  { %v3778_v57 = vadd.f32 %v7537_v51, %v3554_v58  ;;  %v3779_v21 = vadd.f32 %v7537_v51, %v3555_v17  ;;  %v3792_v9 = vadd.f32 %v7551_v31, %v3568_v24  ;;  %v8287_v51 = vld [vmem:[#allocation60_spill] sm:$0xff]  ;;  %v8301_v58 = vld [vmem:[#allocation54_spill] sm:$0xff]  ;;  %v8302_v17 = vld [vmem:[#allocation55_spill] sm:$0xff] }
 0x705   :  { %v3793_v20 = vadd.f32 %v7551_v31, %v3569_v6  ;;  %v3461_v23 = vpop.permute.xlu1 %3460  ;;  %v3496_v10 = vpop.permute.xlu0 %3495  ;;  %v8303_v6 = vld [vmem:[#allocation56_spill] sm:$0xff] }
 0x706   :  { %3842 = vst [vmem:[%s7915_s6 + $0x120] sm:$0xff] %v3778_v57  ;;  %3843 = vst.msk [vmem:[%s7915_s6 + $0x128] sm:$0xff] %vm2301_vm10, %v3779_v21  ;;  %v3558_v31 = vmul.f32 %v3461_v23, %v8287_v51  ;;  %v3559_v28 = vmul.f32 %v3461_v23, %v8288_v63  ;;  %v3572_v52 = vmul.f32 %v3496_v10, %v8289_v11 }
 0x707   :  { %3856 = vst [vmem:[%s7915_s6 + $0x190] sm:$0xff] %v3792_v9  ;;  %3857 = vst.msk [vmem:[%s7915_s6 + $0x198] sm:$0xff] %vm2301_vm10, %v3793_v20  ;;  %v3573_v7 = vmul.f32 %v3496_v10, %v8290_v39 }
 0x708   :  { %v3782_v5 = vadd.f32 %v7541_v8, %v3558_v31  ;;  %v3783_v42 = vadd.f32 %v7541_v8, %v3559_v28  ;;  %v3796_v38 = vadd.f32 %v7555_v34, %v3572_v52  ;;  %v8291_v8 = vld [vmem:[#allocation64_spill] sm:$0xff] }
 0x709   :  { %v3797_v53 = vadd.f32 %v7555_v34, %v3573_v7  ;;  %v3471_v56 = vpop.permute.xlu1 %3470  ;;  %v3506_v46 = vpop.permute.xlu0 %3505 }
 0x70a   :  { %3846 = vst [vmem:[%s7915_s6 + $0x140] sm:$0xff] %v3782_v5  ;;  %3847 = vst.msk [vmem:[%s7915_s6 + $0x148] sm:$0xff] %vm2301_vm10, %v3783_v42  ;;  %v3562_v34 = vmul.f32 %v3471_v56, %v8291_v8  ;;  %v3563_v19 = vmul.f32 %v3471_v56, %v8292_v25  ;;  %v3576_v0 = vmul.f32 %v3506_v46, %v8293_v45 }
 0x70b   :  { %3860 = vst [vmem:[%s7915_s6 + $0x1b0] sm:$0xff] %v3796_v38  ;;  %3861 = vst.msk [vmem:[%s7915_s6 + $0x1b8] sm:$0xff] %vm2301_vm10, %v3797_v53  ;;  %v3577_v15 = vmul.f32 %v3506_v46, %v8294_v13 }
 0x70c   :  { %v3786_v44 = vadd.f32 %v7545_v59, %v3562_v34  ;;  %v3787_v35 = vadd.f32 %v7545_v59, %v3563_v19  ;;  %v3800_v60 = vadd.f32 %v7559_v33, %v3576_v0  ;;  %v8295_v59 = vld [vmem:[#allocation42_spill] sm:$0xff] }
 0x70d   :  { %v3801_v12 = vadd.f32 %v7559_v33, %v3577_v15  ;;  %v3481_v61 = vpop.permute.xlu1 %3480  ;;  %v3516_v50 = vpop.permute.xlu0 %3515 }
 0x70e   :  { %3850 = vst [vmem:[%s7915_s6 + $0x160] sm:$0xff] %v3786_v44  ;;  %3851 = vst.msk [vmem:[%s7915_s6 + $0x168] sm:$0xff] %vm2301_vm10, %v3787_v35  ;;  %v3566_v33 = vmul.f32 %v3481_v61, %v8295_v59  ;;  %v3567_v49 = vmul.f32 %v3481_v61, %v8296_v14  ;;  %v3580_v57 = vmul.f32 %v3516_v50, %v8303_v6 }
 0x70f   :  { %3864 = vst [vmem:[%s7915_s6 + $0x1d0] sm:$0xff] %v3800_v60  ;;  %3865 = vst.msk [vmem:[%s7915_s6 + $0x1d8] sm:$0xff] %vm2301_vm10, %v3801_v12 }
 0x710   :  { %v3790_v30 = vadd.f32 %v7549_v37, %v3566_v33  ;;  %v3791_v1 = vadd.f32 %v7549_v37, %v3567_v49 }
 0x711   :  { %v3491_v2 = vpop.permute.xlu1 %3490 }
 0x712   :  { %3854 = vst [vmem:[%s7915_s6 + $0x180] sm:$0xff] %v3790_v30  ;;  %3855 = vst.msk [vmem:[%s7915_s6 + $0x188] sm:$0xff] %vm2301_vm10, %v3791_v1  ;;  %v3570_v43 = vmul.f32 %v3491_v2, %v8297_v54  ;;  %v3571_v62 = vmul.f32 %v3491_v2, %v8298_v55  ;;  %v3735_v36 = vpop.permute.xlu0 %3734 }
 0x714   :  { %v3794_v18 = vadd.f32 %v7553_v47, %v3570_v43  ;;  %v3795_v27 = vadd.f32 %v7553_v47, %v3571_v62 }
 0x715   :  { %v3501_v37 = vpop.permute.xlu1 %3500 }
 0x716   :  { %3858 = vst [vmem:[%s7915_s6 + $0x1a0] sm:$0xff] %v3794_v18  ;;  %3859 = vst.msk [vmem:[%s7915_s6 + $0x1a8] sm:$0xff] %vm2301_vm10, %v3795_v27  ;;  %v3574_v32 = vmul.f32 %v3501_v37, %v8299_v22  ;;  %v3575_v4 = vmul.f32 %v3501_v37, %v8300_v29 }
 0x718   :  { %v3798_v26 = vadd.f32 %v7557_v41, %v3574_v32  ;;  %v3799_v16 = vadd.f32 %v7557_v41, %v3575_v4  ;;  %v8304_v41 = vld [vmem:[#allocation69_spill] sm:$0xff] }
 0x719   :  { %v3511_v47 = vpop.permute.xlu1 %3510  ;;  %v3581_v21 = vmul.f32 %v3516_v50, %v8304_v41 }
 0x71a   :  { %3862 = vst [vmem:[%s7915_s6 + $0x1c0] sm:$0xff] %v3798_v26  ;;  %3863 = vst.msk [vmem:[%s7915_s6 + $0x1c8] sm:$0xff] %vm2301_vm10, %v3799_v16  ;;  %v3578_v40 = vmul.f32 %v3511_v47, %v8301_v58  ;;  %v3579_v48 = vmul.f32 %v3511_v47, %v8302_v17 }
 0x71c   :  { %v3802_v24 = vadd.f32 %v3735_v36, %v3578_v40  ;;  %v3803_v3 = vadd.f32 %v3735_v36, %v3579_v48 }
 0x71e   :  { %3866 = vst [vmem:[%s7915_s6 + $0x1e0] sm:$0xff] %v3802_v24  ;;  %3867 = vst.msk [vmem:[%s7915_s6 + $0x1e8] sm:$0xff] %vm2301_vm10, %v3803_v3  ;;  %v3740_v9 = vpop.permute.xlu1 %3739 }
 0x71f   :  { %v3804_v20 = vadd.f32 %v3740_v9, %v3580_v57  ;;  %v3805_v23 = vadd.f32 %v3740_v9, %v3581_v21 }
 0x721   :  { %3868 = vst [vmem:[%s7915_s6 + $0x1f0] sm:$0xff] %v3804_v20  ;;  %3869 = vst.msk [vmem:[%s7915_s6 + $0x1f8] sm:$0xff] %vm2301_vm10, %v3805_v23 }
 0x722   :  { %3874 = vsyncmov [#allocation3] }
 0x725   :  { %s3875_s22 = vpop.sfrf %3874 }
 0x726   :  { %p3968_p0 = scmp.ne.s32.totalorder %s3875_s22, 0 }
 0x728   :  { %3879 = shalt.err (%p3968_p0)  }

</bundles_post_ra>
